<compile_context>
chip_gen: v6e
topology: v6e:2x2x1
jax: 0.10.0
libtpu: 0.0.40
codegen_flags: <defaults>
</compile_context>

<pallas_src>
import math
from functools import partial

import jax
import jax.numpy as jnp
from jax import lax
from jax.experimental import pallas as pl
from jax.experimental.pallas import tpu as pltpu


def _layernorm(t, gamma, beta, eps=1e-6):
    # torch.nn.LayerNorm(eps=1e-6): biased variance over last dim (computed in f32)
    mu = jnp.mean(t, axis=-1, keepdims=True)
    var = jnp.mean((t - mu) ** 2, axis=-1, keepdims=True)
    return (t - mu) * lax.rsqrt(var + eps) * gamma + beta


def block_kernel(x_ref, y_ref, mx_ref, my_ref,
                 ln1_g_ref, ln1_b_ref,
                 wq_ref, bq_ref, wk_ref, bk_ref, wv_ref, bv_ref,
                 wo_ref, bo_ref,
                 ln2_g_ref, ln2_b_ref,
                 w1_ref, b1_ref, w2_ref, b2_ref,
                 o_ref,
                 k_sc, v_sc, ctx_sc,
                 *, num_heads, head_dim):
    # One program per (batch element, query-row tile).  K/V are cached in VMEM scratch and
    # only recomputed when the batch element changes (query-tile axis is "arbitrary", so the
    # scratch persists across qi iterations on the same core).
    qi = pl.program_id(1)

    @pl.when(qi == 0)
    def _():
        y = y_ref[0].astype(jnp.float32)                     # (Ny, D)
        my = my_ref[0].astype(jnp.float32)                   # (Ny, 1)
        yn = _layernorm(y, ln1_g_ref[0], ln1_b_ref[0]).astype(jnp.bfloat16)
        k = jnp.dot(yn, wk_ref[...], preferred_element_type=jnp.float32) + bk_ref[0]
        v = jnp.dot(yn, wv_ref[...], preferred_element_type=jnp.float32) + bv_ref[0]
        k_sc[...] = (k * my).astype(jnp.bfloat16)            # (Ny, D) masked keys
        v_sc[...] = (v * my).astype(jnp.bfloat16)            # (Ny, D) masked values

    x = x_ref[0].astype(jnp.float32)                         # (TQ, D) query tile
    mx = mx_ref[0].astype(jnp.float32)                       # (TQ, 1)

    # ---- attention_norm + query projection (+ row mask, exactly as in PyTorch) ----
    xn = _layernorm(x, ln1_g_ref[0], ln1_b_ref[0]).astype(jnp.bfloat16)
    q = (jnp.dot(xn, wq_ref[...], preferred_element_type=jnp.float32) + bq_ref[0]) * mx
    q = q.astype(jnp.bfloat16)

    # ---- per-head attention; contexts packed into a (TQ, D) slab for one full Wo matmul ----
    inv_sqrt_dh = 1.0 / math.sqrt(head_dim)
    for h in range(num_heads):                               # static (unrolled) loop over heads
        lo = h * head_dim
        qh = q[:, lo:lo + head_dim]                          # (TQ, dh) bf16
        kh = k_sc[:, lo:lo + head_dim]                       # (Ny, dh) bf16 (cached)
        vh = v_sc[:, lo:lo + head_dim]                       # (Ny, dh) bf16 (cached)
        # 'nt'-form matmul: contract last dims directly, no explicit transpose.
        s = lax.dot_general(qh, kh, (((1,), (1,)), ((), ())),
                            preferred_element_type=jnp.float32) * inv_sqrt_dh
        s = s - jnp.max(s, axis=-1, keepdims=True)
        p = jnp.exp(s)
        p = p * pl.reciprocal(jnp.sum(p, axis=-1, keepdims=True), approx=True)
        ctx_sc[:, lo:lo + head_dim] = jnp.dot(
            p.astype(jnp.bfloat16), vh,
            preferred_element_type=jnp.float32).astype(jnp.bfloat16)

    # Single full-contraction output projection (no per-head small-K matmuls, no value-sliced Wo).
    attn_out = jnp.dot(ctx_sc[...], wo_ref[...],
                       preferred_element_type=jnp.float32) + bo_ref[0]
    # attn_dropout / proj_dropout: identity in eval mode

    x1 = x + attn_out

    # ---- ffn_norm + Mlp (exact GELU, matching F.gelu default) ----
    xn2 = _layernorm(x1, ln2_g_ref[0], ln2_b_ref[0]).astype(jnp.bfloat16)
    h1 = jnp.dot(xn2, w1_ref[...], preferred_element_type=jnp.float32) + b1_ref[0]
    h1 = 0.5 * h1 * (1.0 + lax.erf(h1 * (1.0 / math.sqrt(2.0))))
    h2 = jnp.dot(h1.astype(jnp.bfloat16), w2_ref[...],
                 preferred_element_type=jnp.float32) + b2_ref[0]

    o_ref[0] = (x1 + h2).astype(o_ref.dtype)


def _vmem_limit_bytes():
    # Size VMEM budget per generation: ~3/4 of physical, capped at 100 MiB.
    # v7x (64 MiB) -> ~48 MiB; v5e/v6e (128 MiB) -> ~96 MiB.
    try:
        cap = int(pltpu.get_tpu_info().vmem_capacity_bytes)
    except Exception:
        cap = 64 * 1024 * 1024
    return min(cap * 3 // 4, 100 * 1024 * 1024)


def block_forward(x, y, params, mask_x=None, mask_y=None, *, num_heads, tq=None):
    B, Nx, D = x.shape
    _, Ny, _ = y.shape
    head_dim = D // num_heads
    mlp_dim = params["w1"].shape[1]

    if mask_x is None:
        mask_x = jnp.ones((B, Nx), dtype=x.dtype)
        mask_y = jnp.ones((B, Ny), dtype=y.dtype)
    mask_x = mask_x.astype(x.dtype).reshape(B, Nx, 1)
    mask_y = mask_y.astype(y.dtype).reshape(B, Ny, 1)

    # Query-row tile (multiple of 8, or full Nx when small) bounds live activations
    # (scores TQxNy, h1 TQxmlp_dim) independently of Nx.
    if tq is None:
        tq = Nx if Nx <= 256 else 256

    # Weights in bf16 (MXU-native, half the DMA/VMEM); biases and LN params stay f32.
    wdt = jnp.bfloat16
    wq, wk, wv, wo = (params[n].astype(wdt) for n in ("wq", "wk", "wv", "wo"))
    w1, w2 = params["w1"].astype(wdt), params["w2"].astype(wdt)

    kernel = partial(block_kernel, num_heads=num_heads, head_dim=head_dim)
    vmem_limit = _vmem_limit_bytes()

    def build(single_buffer_weights, tq_):
        n_qt = pl.cdiv(Nx, tq_)
        if single_buffer_weights:
            # Constant index_map => block never changes; single buffer halves weight VMEM.
            wspec = lambda shape: pl.BlockSpec(
                shape, lambda b, qi: (0,) * len(shape),
                pipeline_mode=pl.Buffered(1))
        else:
            wspec = lambda shape: pl.BlockSpec(shape, lambda b, qi: (0,) * len(shape))

        in_specs = [
            pl.BlockSpec((1, tq_, D), lambda b, qi: (b, qi, 0)),   # x   (query tile)
            pl.BlockSpec((1, Ny, D), lambda b, qi: (b, 0, 0)),     # y   (full K/V seq, per batch)
            pl.BlockSpec((1, tq_, 1), lambda b, qi: (b, qi, 0)),   # mask_x
            pl.BlockSpec((1, Ny, 1), lambda b, qi: (b, 0, 0)),     # mask_y
            wspec((1, D)), wspec((1, D)),                          # ln1 gamma / beta
            wspec((D, D)), wspec((1, D)),                          # Wq, bq
            wspec((D, D)), wspec((1, D)),                          # Wk, bk
            wspec((D, D)), wspec((1, D)),                          # Wv, bv
            wspec((D, D)), wspec((1, D)),                          # Wo, bo
            wspec((1, D)), wspec((1, D)),                          # ln2 gamma / beta
            wspec((D, mlp_dim)), wspec((1, mlp_dim)),              # fc1
            wspec((mlp_dim, D)), wspec((1, D)),                    # fc2
        ]
        out_spec = pl.BlockSpec((1, tq_, D), lambda b, qi: (b, qi, 0))

        return pl.pallas_call(
            kernel,
            out_shape=jax.ShapeDtypeStruct((B, Nx, D), x.dtype),
            grid_spec=pltpu.PrefetchScalarGridSpec(
                num_scalar_prefetch=0,
                grid=(B, n_qt),
                in_specs=in_specs,
                out_specs=out_spec,
                scratch_shapes=[
                    pltpu.VMEM((Ny, D), jnp.bfloat16),   # cached masked K (per batch element)
                    pltpu.VMEM((Ny, D), jnp.bfloat16),   # cached masked V (per batch element)
                    pltpu.VMEM((tq_, D), jnp.bfloat16),  # per-tile packed head contexts
                ],
            ),
            compiler_params=pltpu.CompilerParams(
                # Batch axis independent -> "parallel" (v7x megacore sharding; needs B >= 2
                # to keep both TCs busy).  Query-tile axis must be sequential so the K/V
                # scratch computed at qi == 0 persists across tiles -> "arbitrary".
                dimension_semantics=("parallel", "arbitrary"),
                vmem_limit_bytes=vmem_limit,
            ),
        )

    args = (x, y, mask_x, mask_y,
            params["ln1_g"], params["ln1_b"],
            wq, params["bq"], wk, params["bk"],
            wv, params["bv"], wo, params["bo"],
            params["ln2_g"], params["ln2_b"],
            w1, params["b1"], w2, params["b2"])

    try:
        return jax.block_until_ready(build(True, tq)(*args))
    except Exception:
        # Fallback if this JAX version rejects single-buffered (pl.Buffered(1)) specs.
        # Double-buffered weights cost 2x VMEM, so also shrink the query tile to compensate.
        tq_fb = tq if tq <= 128 else 128
        return jax.block_until_ready(build(False, tq_fb)(*args))


def block_reference(x, y, params, num_heads):
    """Pure-JAX reference of the PyTorch Block.forward (eval mode, masks all-ones)."""
    B, Nx, D = x.shape
    Ny = y.shape[1]
    dh = D // num_heads

    def ln(t, g, b):
        mu = jnp.mean(t, -1, keepdims=True)
        var = jnp.mean((t - mu) ** 2, -1, keepdims=True)
        return (t - mu) / jnp.sqrt(var + 1e-6) * g[0] + b[0]

    xn = ln(x, params["ln1_g"], params["ln1_b"])
    yn = ln(y, params["ln1_g"], params["ln1_b"])
    q = xn @ params["wq"] + params["bq"][0]
    k = yn @ params["wk"] + params["bk"][0]
    v = yn @ params["wv"] + params["bv"][0]
    qh = q.reshape(B, Nx, num_heads, dh).transpose(0, 2, 1, 3)
    kh = k.reshape(B, Ny, num_heads, dh).transpose(0, 2, 1, 3)
    vh = v.reshape(B, Ny, num_heads, dh).transpose(0, 2, 1, 3)
    s = jnp.einsum("bhqd,bhkd->bhqk", qh, kh) / math.sqrt(dh)
    p = jax.nn.softmax(s, axis=-1)
    ctx = jnp.einsum("bhqk,bhkd->bhqd", p, vh).transpose(0, 2, 1, 3).reshape(B, Nx, D)
    attn = ctx @ params["wo"] + params["bo"][0]
    x1 = x + attn
    xn2 = ln(x1, params["ln2_g"], params["ln2_b"])
    h1 = xn2 @ params["w1"] + params["b1"][0]
    h1 = jax.nn.gelu(h1, approximate=False)
    h2 = h1 @ params["w2"] + params["b2"][0]
    return x1 + h2


def init_params(key, embed_dim, mlp_dim):
    ks = jax.random.split(key, 12)
    n = lambda k, shape, s=0.02: (jax.random.normal(k, shape, jnp.float32) * s)
    return {
        "ln1_g": jnp.ones((1, embed_dim), jnp.float32),
        "ln1_b": jnp.zeros((1, embed_dim), jnp.float32),
        "ln2_g": jnp.ones((1, embed_dim), jnp.float32),
        "ln2_b": jnp.zeros((1, embed_dim), jnp.float32),
        "wq": n(ks[0], (embed_dim, embed_dim)), "bq": n(ks[1], (1, embed_dim), 0.01),
        "wk": n(ks[2], (embed_dim, embed_dim)), "bk": n(ks[3], (1, embed_dim), 0.01),
        "wv": n(ks[4], (embed_dim, embed_dim)), "bv": n(ks[5], (1, embed_dim), 0.01),
        "wo": n(ks[6], (embed_dim, embed_dim)), "bo": n(ks[7], (1, embed_dim), 0.01),
        "w1": n(ks[8], (embed_dim, mlp_dim)),   "b1": n(ks[9], (1, mlp_dim), 1e-6),
        "w2": n(ks[10], (mlp_dim, embed_dim)),  "b2": n(ks[11], (1, embed_dim), 1e-6),
    }


if __name__ == "__main__":
    B, Nx, Ny, D, H, MLP = 2, 8, 8, 32, 4, 64
    key = jax.random.PRNGKey(0)
    kx, ky, kp = jax.random.split(key, 3)
    x = jax.random.normal(kx, (B, Nx, D), jnp.float32)
    y = jax.random.normal(ky, (B, Ny, D), jnp.float32)
    params = init_params(kp, D, MLP)

    out = block_forward(x, y, params, num_heads=H)   # mask_x/mask_y None -> all-ones
    out = jax.block_until_ready(out)

    ref = block_reference(x, y, params, H)
    assert out.shape == (B, Nx, D)
    # bf16 matmuls + approx reciprocal softmax: parity within ~1e-2 of the f32 reference.
    assert jnp.allclose(out, ref, rtol=2e-2, atol=2e-2), "Pallas output mismatch vs reference"

    print("KERNEL_OK")
</pallas_src>

<mosaic_0001>
module attributes {stable_mosaic.version = 11 : i64} {
  func.func @block_kernel(%arg0: i32, %arg1: i32, %arg2: memref<1x8x32xf32, #tpu.memory_space<vmem>>, %arg3: memref<1x8x32xf32, #tpu.memory_space<vmem>>, %arg4: memref<1x8x1xf32, #tpu.memory_space<vmem>>, %arg5: memref<1x8x1xf32, #tpu.memory_space<vmem>>, %arg6: memref<1x32xf32, #tpu.memory_space<vmem>>, %arg7: memref<1x32xf32, #tpu.memory_space<vmem>>, %arg8: memref<32x32xbf16, #tpu.memory_space<vmem>>, %arg9: memref<1x32xf32, #tpu.memory_space<vmem>>, %arg10: memref<32x32xbf16, #tpu.memory_space<vmem>>, %arg11: memref<1x32xf32, #tpu.memory_space<vmem>>, %arg12: memref<32x32xbf16, #tpu.memory_space<vmem>>, %arg13: memref<1x32xf32, #tpu.memory_space<vmem>>, %arg14: memref<32x32xbf16, #tpu.memory_space<vmem>>, %arg15: memref<1x32xf32, #tpu.memory_space<vmem>>, %arg16: memref<1x32xf32, #tpu.memory_space<vmem>>, %arg17: memref<1x32xf32, #tpu.memory_space<vmem>>, %arg18: memref<32x64xbf16, #tpu.memory_space<vmem>>, %arg19: memref<1x64xf32, #tpu.memory_space<vmem>>, %arg20: memref<64x32xbf16, #tpu.memory_space<vmem>>, %arg21: memref<1x32xf32, #tpu.memory_space<vmem>>, %arg22: memref<1x8x32xf32, #tpu.memory_space<vmem>>, %arg23: memref<8x32xbf16, #tpu.memory_space<vmem>>, %arg24: memref<8x32xbf16, #tpu.memory_space<vmem>>, %arg25: memref<8x32xbf16, #tpu.memory_space<vmem>>) attributes {dimension_semantics = [#tpu.dimension_semantics<parallel>, #tpu.dimension_semantics<arbitrary>], iteration_bounds = array<i64: 2, 1>, scalar_prefetch = 0 : i64, scratch_operands = 3 : i64, tpu.core_type = #tpu.core_type<tc>, window_params = [{transform_indices = @transform_0, window_bounds = array<i64: 1, 8, 32>}, {transform_indices = @transform_1, window_bounds = array<i64: 1, 8, 32>}, {transform_indices = @transform_2, window_bounds = array<i64: 1, 8, 1>}, {transform_indices = @transform_3, window_bounds = array<i64: 1, 8, 1>}, {pipeline_mode = #tpu.pipeline_mode<synchronous>, transform_indices = @transform_4, window_bounds = array<i64: 1, 32>}, {pipeline_mode = #tpu.pipeline_mode<synchronous>, transform_indices = @transform_5, window_bounds = array<i64: 1, 32>}, {pipeline_mode = #tpu.pipeline_mode<synchronous>, transform_indices = @transform_6, window_bounds = array<i64: 32, 32>}, {pipeline_mode = #tpu.pipeline_mode<synchronous>, transform_indices = @transform_7, window_bounds = array<i64: 1, 32>}, {pipeline_mode = #tpu.pipeline_mode<synchronous>, transform_indices = @transform_8, window_bounds = array<i64: 32, 32>}, {pipeline_mode = #tpu.pipeline_mode<synchronous>, transform_indices = @transform_9, window_bounds = array<i64: 1, 32>}, {pipeline_mode = #tpu.pipeline_mode<synchronous>, transform_indices = @transform_10, window_bounds = array<i64: 32, 32>}, {pipeline_mode = #tpu.pipeline_mode<synchronous>, transform_indices = @transform_11, window_bounds = array<i64: 1, 32>}, {pipeline_mode = #tpu.pipeline_mode<synchronous>, transform_indices = @transform_12, window_bounds = array<i64: 32, 32>}, {pipeline_mode = #tpu.pipeline_mode<synchronous>, transform_indices = @transform_13, window_bounds = array<i64: 1, 32>}, {pipeline_mode = #tpu.pipeline_mode<synchronous>, transform_indices = @transform_14, window_bounds = array<i64: 1, 32>}, {pipeline_mode = #tpu.pipeline_mode<synchronous>, transform_indices = @transform_15, window_bounds = array<i64: 1, 32>}, {pipeline_mode = #tpu.pipeline_mode<synchronous>, transform_indices = @transform_16, window_bounds = array<i64: 32, 64>}, {pipeline_mode = #tpu.pipeline_mode<synchronous>, transform_indices = @transform_17, window_bounds = array<i64: 1, 64>}, {pipeline_mode = #tpu.pipeline_mode<synchronous>, transform_indices = @transform_18, window_bounds = array<i64: 64, 32>}, {pipeline_mode = #tpu.pipeline_mode<synchronous>, transform_indices = @transform_19, window_bounds = array<i64: 1, 32>}, {transform_indices = @transform_20, window_bounds = array<i64: 1, 8, 32>}]} {
    %c0_i32 = arith.constant 0 : i32
    %0 = arith.cmpi eq, %arg1, %c0_i32 : i32
    %1 = arith.extui %0 : i1 to i32
    %c0_i32_0 = arith.constant 0 : i32
    %2 = arith.cmpi ne, %1, %c0_i32_0 : i32
    scf.if %2 {
      %c0_92 = arith.constant 0 : index
      %c0_93 = arith.constant 0 : index
      %c0_94 = arith.constant 0 : index
      %191 = vector.load %arg3[%c0_92, %c0_93, %c0_94] : memref<1x8x32xf32, #tpu.memory_space<vmem>>, vector<1x8x32xf32>
      %192 = vector.shape_cast %191 : vector<1x8x32xf32> to vector<8x32xf32>
      %c0_95 = arith.constant 0 : index
      %c0_96 = arith.constant 0 : index
      %c0_97 = arith.constant 0 : index
      %193 = vector.load %arg5[%c0_95, %c0_96, %c0_97] : memref<1x8x1xf32, #tpu.memory_space<vmem>>, vector<1x8x1xf32>
      %194 = vector.shape_cast %193 : vector<1x8x1xf32> to vector<8x1xf32>
      %c0_98 = arith.constant 0 : index
      %c0_99 = arith.constant 0 : index
      %195 = vector.load %arg6[%c0_98, %c0_99] : memref<1x32xf32, #tpu.memory_space<vmem>>, vector<1x32xf32>
      %196 = vector.shape_cast %195 : vector<1x32xf32> to vector<32xf32>
      %c0_100 = arith.constant 0 : index
      %c0_101 = arith.constant 0 : index
      %197 = vector.load %arg7[%c0_100, %c0_101] : memref<1x32xf32, #tpu.memory_space<vmem>>, vector<1x32xf32>
      %198 = vector.shape_cast %197 : vector<1x32xf32> to vector<32xf32>
      %cst_102 = arith.constant dense<0.000000e+00> : vector<8xf32>
      %199 = vector.multi_reduction <add>, %192, %cst_102 [1] : vector<8x32xf32> to vector<8xf32>
      %200 = vector.shape_cast %199 : vector<8xf32> to vector<8x1xf32>
      %cst_103 = arith.constant 3.200000e+01 : f32
      %201 = vector.broadcast %cst_103 : f32 to vector<8x1xf32>
      %202 = arith.divf %200, %201 : vector<8x1xf32>
      %203 = vector.broadcast %202 : vector<8x1xf32> to vector<8x32xf32>
      %204 = arith.subf %192, %203 : vector<8x32xf32>
      %205 = arith.mulf %204, %204 : vector<8x32xf32>
      %cst_104 = arith.constant dense<0.000000e+00> : vector<8xf32>
      %206 = vector.multi_reduction <add>, %205, %cst_104 [1] : vector<8x32xf32> to vector<8xf32>
      %207 = vector.shape_cast %206 : vector<8xf32> to vector<8x1xf32>
      %cst_105 = arith.constant 3.200000e+01 : f32
      %208 = vector.broadcast %cst_105 : f32 to vector<8x1xf32>
      %209 = arith.divf %207, %208 : vector<8x1xf32>
      %210 = vector.broadcast %202 : vector<8x1xf32> to vector<8x32xf32>
      %211 = arith.subf %192, %210 : vector<8x32xf32>
      %cst_106 = arith.constant 9.99999997E-7 : f32
      %212 = vector.broadcast %cst_106 : f32 to vector<8x1xf32>
      %213 = arith.addf %209, %212 : vector<8x1xf32>
      %214 = math.rsqrt %213 : vector<8x1xf32>
      %215 = vector.broadcast %214 : vector<8x1xf32> to vector<8x32xf32>
      %216 = arith.mulf %211, %215 : vector<8x32xf32>
      %217 = vector.shape_cast %196 : vector<32xf32> to vector<1x32xf32>
      %218 = vector.broadcast %217 : vector<1x32xf32> to vector<8x32xf32>
      %219 = arith.mulf %216, %218 : vector<8x32xf32>
      %220 = vector.shape_cast %198 : vector<32xf32> to vector<1x32xf32>
      %221 = vector.broadcast %220 : vector<1x32xf32> to vector<8x32xf32>
      %222 = arith.addf %219, %221 : vector<8x32xf32>
      %223 = arith.truncf %222 : vector<8x32xf32> to vector<8x32xbf16>
      %c0_107 = arith.constant 0 : index
      %c0_108 = arith.constant 0 : index
      %224 = vector.load %arg10[%c0_107, %c0_108] : memref<32x32xbf16, #tpu.memory_space<vmem>>, vector<32x32xbf16>
      %cst_109 = arith.constant dense<0.000000e+00> : vector<8x32xf32>
      %225 = tpu.matmul %223, %224, %cst_109 {dimension_numbers = #tpu.dot_dimension_numbers<[1], [0], [0], [1], [0, 0, 1, 1], [], []>} : vector<8x32xbf16>, vector<32x32xbf16>, vector<8x32xf32> -> vector<8x32xf32>
      %c0_110 = arith.constant 0 : index
      %c0_111 = arith.constant 0 : index
      %226 = vector.load %arg11[%c0_110, %c0_111] : memref<1x32xf32, #tpu.memory_space<vmem>>, vector<1x32xf32>
      %227 = vector.shape_cast %226 : vector<1x32xf32> to vector<32xf32>
      %228 = vector.shape_cast %227 : vector<32xf32> to vector<1x32xf32>
      %229 = vector.broadcast %228 : vector<1x32xf32> to vector<8x32xf32>
      %230 = arith.addf %225, %229 : vector<8x32xf32>
      %c0_112 = arith.constant 0 : index
      %c0_113 = arith.constant 0 : index
      %231 = vector.load %arg12[%c0_112, %c0_113] : memref<32x32xbf16, #tpu.memory_space<vmem>>, vector<32x32xbf16>
      %cst_114 = arith.constant dense<0.000000e+00> : vector<8x32xf32>
      %232 = tpu.matmul %223, %231, %cst_114 {dimension_numbers = #tpu.dot_dimension_numbers<[1], [0], [0], [1], [0, 0, 1, 1], [], []>} : vector<8x32xbf16>, vector<32x32xbf16>, vector<8x32xf32> -> vector<8x32xf32>
      %c0_115 = arith.constant 0 : index
      %c0_116 = arith.constant 0 : index
      %233 = vector.load %arg13[%c0_115, %c0_116] : memref<1x32xf32, #tpu.memory_space<vmem>>, vector<1x32xf32>
      %234 = vector.shape_cast %233 : vector<1x32xf32> to vector<32xf32>
      %235 = vector.shape_cast %234 : vector<32xf32> to vector<1x32xf32>
      %236 = vector.broadcast %235 : vector<1x32xf32> to vector<8x32xf32>
      %237 = arith.addf %232, %236 : vector<8x32xf32>
      %238 = vector.broadcast %194 : vector<8x1xf32> to vector<8x32xf32>
      %239 = arith.mulf %230, %238 : vector<8x32xf32>
      %240 = arith.truncf %239 : vector<8x32xf32> to vector<8x32xbf16>
      %c0_117 = arith.constant 0 : index
      %c0_118 = arith.constant 0 : index
      %241 = vector.load %arg23[%c0_117, %c0_118] : memref<8x32xbf16, #tpu.memory_space<vmem>>, vector<8x32xbf16>
      tpu.vector_store %arg23[%c0_117, %c0_118], %240 {strides = array<i32>} : memref<8x32xbf16, #tpu.memory_space<vmem>>, vector<8x32xbf16>,
      %242 = vector.broadcast %194 : vector<8x1xf32> to vector<8x32xf32>
      %243 = arith.mulf %237, %242 : vector<8x32xf32>
      %244 = arith.truncf %243 : vector<8x32xf32> to vector<8x32xbf16>
      %c0_119 = arith.constant 0 : index
      %c0_120 = arith.constant 0 : index
      %245 = vector.load %arg24[%c0_119, %c0_120] : memref<8x32xbf16, #tpu.memory_space<vmem>>, vector<8x32xbf16>
      tpu.vector_store %arg24[%c0_119, %c0_120], %244 {strides = array<i32>} : memref<8x32xbf16, #tpu.memory_space<vmem>>, vector<8x32xbf16>,
    } else {
    }
    %c0 = arith.constant 0 : index
    %c0_1 = arith.constant 0 : index
    %c0_2 = arith.constant 0 : index
    %3 = vector.load %arg2[%c0, %c0_1, %c0_2] : memref<1x8x32xf32, #tpu.memory_space<vmem>>, vector<1x8x32xf32>
    %4 = vector.shape_cast %3 : vector<1x8x32xf32> to vector<8x32xf32>
    %c0_3 = arith.constant 0 : index
    %c0_4 = arith.constant 0 : index
    %c0_5 = arith.constant 0 : index
    %5 = vector.load %arg4[%c0_3, %c0_4, %c0_5] : memref<1x8x1xf32, #tpu.memory_space<vmem>>, vector<1x8x1xf32>
    %6 = vector.shape_cast %5 : vector<1x8x1xf32> to vector<8x1xf32>
    %c0_6 = arith.constant 0 : index
    %c0_7 = arith.constant 0 : index
    %7 = vector.load %arg6[%c0_6, %c0_7] : memref<1x32xf32, #tpu.memory_space<vmem>>, vector<1x32xf32>
    %8 = vector.shape_cast %7 : vector<1x32xf32> to vector<32xf32>
    %c0_8 = arith.constant 0 : index
    %c0_9 = arith.constant 0 : index
    %9 = vector.load %arg7[%c0_8, %c0_9] : memref<1x32xf32, #tpu.memory_space<vmem>>, vector<1x32xf32>
    %10 = vector.shape_cast %9 : vector<1x32xf32> to vector<32xf32>
    %cst = arith.constant dense<0.000000e+00> : vector<8xf32>
    %11 = vector.multi_reduction <add>, %4, %cst [1] : vector<8x32xf32> to vector<8xf32>
    %12 = vector.shape_cast %11 : vector<8xf32> to vector<8x1xf32>
    %cst_10 = arith.constant 3.200000e+01 : f32
    %13 = vector.broadcast %cst_10 : f32 to vector<8x1xf32>
    %14 = arith.divf %12, %13 : vector<8x1xf32>
    %15 = vector.broadcast %14 : vector<8x1xf32> to vector<8x32xf32>
    %16 = arith.subf %4, %15 : vector<8x32xf32>
    %17 = arith.mulf %16, %16 : vector<8x32xf32>
    %cst_11 = arith.constant dense<0.000000e+00> : vector<8xf32>
    %18 = vector.multi_reduction <add>, %17, %cst_11 [1] : vector<8x32xf32> to vector<8xf32>
    %19 = vector.shape_cast %18 : vector<8xf32> to vector<8x1xf32>
    %cst_12 = arith.constant 3.200000e+01 : f32
    %20 = vector.broadcast %cst_12 : f32 to vector<8x1xf32>
    %21 = arith.divf %19, %20 : vector<8x1xf32>
    %22 = vector.broadcast %14 : vector<8x1xf32> to vector<8x32xf32>
    %23 = arith.subf %4, %22 : vector<8x32xf32>
    %cst_13 = arith.constant 9.99999997E-7 : f32
    %24 = vector.broadcast %cst_13 : f32 to vector<8x1xf32>
    %25 = arith.addf %21, %24 : vector<8x1xf32>
    %26 = math.rsqrt %25 : vector<8x1xf32>
    %27 = vector.broadcast %26 : vector<8x1xf32> to vector<8x32xf32>
    %28 = arith.mulf %23, %27 : vector<8x32xf32>
    %29 = vector.shape_cast %8 : vector<32xf32> to vector<1x32xf32>
    %30 = vector.broadcast %29 : vector<1x32xf32> to vector<8x32xf32>
    %31 = arith.mulf %28, %30 : vector<8x32xf32>
    %32 = vector.shape_cast %10 : vector<32xf32> to vector<1x32xf32>
    %33 = vector.broadcast %32 : vector<1x32xf32> to vector<8x32xf32>
    %34 = arith.addf %31, %33 : vector<8x32xf32>
    %35 = arith.truncf %34 : vector<8x32xf32> to vector<8x32xbf16>
    %c0_14 = arith.constant 0 : index
    %c0_15 = arith.constant 0 : index
    %36 = vector.load %arg8[%c0_14, %c0_15] : memref<32x32xbf16, #tpu.memory_space<vmem>>, vector<32x32xbf16>
    %cst_16 = arith.constant dense<0.000000e+00> : vector<8x32xf32>
    %37 = tpu.matmul %35, %36, %cst_16 {dimension_numbers = #tpu.dot_dimension_numbers<[1], [0], [0], [1], [0, 0, 1, 1], [], []>} : vector<8x32xbf16>, vector<32x32xbf16>, vector<8x32xf32> -> vector<8x32xf32>
    %c0_17 = arith.constant 0 : index
    %c0_18 = arith.constant 0 : index
    %38 = vector.load %arg9[%c0_17, %c0_18] : memref<1x32xf32, #tpu.memory_space<vmem>>, vector<1x32xf32>
    %39 = vector.shape_cast %38 : vector<1x32xf32> to vector<32xf32>
    %40 = vector.shape_cast %39 : vector<32xf32> to vector<1x32xf32>
    %41 = vector.broadcast %40 : vector<1x32xf32> to vector<8x32xf32>
    %42 = arith.addf %37, %41 : vector<8x32xf32>
    %43 = vector.broadcast %6 : vector<8x1xf32> to vector<8x32xf32>
    %44 = arith.mulf %42, %43 : vector<8x32xf32>
    %45 = arith.truncf %44 : vector<8x32xf32> to vector<8x32xbf16>
    %46 = vector.extract_strided_slice %45 {offsets = [0, 0], sizes = [8, 8], strides = [1, 1]} : vector<8x32xbf16> to vector<8x8xbf16>
    %c0_19 = arith.constant 0 : index
    %c0_20 = arith.constant 0 : index
    %47 = vector.load %arg23[%c0_19, %c0_20] : memref<8x32xbf16, #tpu.memory_space<vmem>>, vector<8x8xbf16>
    %c0_21 = arith.constant 0 : index
    %c0_22 = arith.constant 0 : index
    %48 = vector.load %arg24[%c0_21, %c0_22] : memref<8x32xbf16, #tpu.memory_space<vmem>>, vector<8x8xbf16>
    %cst_23 = arith.constant dense<0.000000e+00> : vector<8x8xf32>
    %49 = tpu.matmul %46, %47, %cst_23 {dimension_numbers = #tpu.dot_dimension_numbers<[1], [1], [0], [0], [0, 0, 1, 0], [], []>} : vector<8x8xbf16>, vector<8x8xbf16>, vector<8x8xf32> -> vector<8x8xf32>
    %cst_24 = arith.constant 0.353553385 : f32
    %50 = vector.broadcast %cst_24 : f32 to vector<8x8xf32>
    %51 = arith.mulf %49, %50 : vector<8x8xf32>
    %cst_25 = arith.constant dense<0xFF800000> : vector<8xf32>
    %52 = vector.multi_reduction <maximumf>, %51, %cst_25 [1] : vector<8x8xf32> to vector<8xf32>
    %53 = vector.shape_cast %52 : vector<8xf32> to vector<8x1xf32>
    %54 = vector.broadcast %53 : vector<8x1xf32> to vector<8x8xf32>
    %55 = arith.subf %51, %54 : vector<8x8xf32>
    %56 = math.exp %55 : vector<8x8xf32>
    %cst_26 = arith.constant dense<0.000000e+00> : vector<8xf32>
    %57 = vector.multi_reduction <add>, %56, %cst_26 [1] : vector<8x8xf32> to vector<8xf32>
    %58 = vector.shape_cast %57 : vector<8xf32> to vector<8x1xf32>
    %59 = tpu.reciprocal %58 {approx = true} : vector<8x1xf32> -> vector<8x1xf32>
    %60 = vector.broadcast %59 : vector<8x1xf32> to vector<8x8xf32>
    %61 = arith.mulf %56, %60 : vector<8x8xf32>
    %62 = arith.truncf %61 : vector<8x8xf32> to vector<8x8xbf16>
    %cst_27 = arith.constant dense<0.000000e+00> : vector<8x8xf32>
    %63 = tpu.matmul %62, %48, %cst_27 {dimension_numbers = #tpu.dot_dimension_numbers<[1], [0], [0], [1], [0, 0, 1, 1], [], []>} : vector<8x8xbf16>, vector<8x8xbf16>, vector<8x8xf32> -> vector<8x8xf32>
    %64 = arith.truncf %63 : vector<8x8xf32> to vector<8x8xbf16>
    %c0_28 = arith.constant 0 : index
    %c0_29 = arith.constant 0 : index
    %65 = vector.load %arg25[%c0_28, %c0_29] : memref<8x32xbf16, #tpu.memory_space<vmem>>, vector<8x8xbf16>
    tpu.vector_store %arg25[%c0_28, %c0_29], %64 {strides = array<i32>} : memref<8x32xbf16, #tpu.memory_space<vmem>>, vector<8x8xbf16>,
    %66 = vector.extract_strided_slice %45 {offsets = [0, 8], sizes = [8, 8], strides = [1, 1]} : vector<8x32xbf16> to vector<8x8xbf16>
    %c0_30 = arith.constant 0 : index
    %c8 = arith.constant 8 : index
    %67 = vector.load %arg23[%c0_30, %c8] : memref<8x32xbf16, #tpu.memory_space<vmem>>, vector<8x8xbf16>
    %c0_31 = arith.constant 0 : index
    %c8_32 = arith.constant 8 : index
    %68 = vector.load %arg24[%c0_31, %c8_32] : memref<8x32xbf16, #tpu.memory_space<vmem>>, vector<8x8xbf16>
    %cst_33 = arith.constant dense<0.000000e+00> : vector<8x8xf32>
    %69 = tpu.matmul %66, %67, %cst_33 {dimension_numbers = #tpu.dot_dimension_numbers<[1], [1], [0], [0], [0, 0, 1, 0], [], []>} : vector<8x8xbf16>, vector<8x8xbf16>, vector<8x8xf32> -> vector<8x8xf32>
    %cst_34 = arith.constant 0.353553385 : f32
    %70 = vector.broadcast %cst_34 : f32 to vector<8x8xf32>
    %71 = arith.mulf %69, %70 : vector<8x8xf32>
    %cst_35 = arith.constant dense<0xFF800000> : vector<8xf32>
    %72 = vector.multi_reduction <maximumf>, %71, %cst_35 [1] : vector<8x8xf32> to vector<8xf32>
    %73 = vector.shape_cast %72 : vector<8xf32> to vector<8x1xf32>
    %74 = vector.broadcast %73 : vector<8x1xf32> to vector<8x8xf32>
    %75 = arith.subf %71, %74 : vector<8x8xf32>
    %76 = math.exp %75 : vector<8x8xf32>
    %cst_36 = arith.constant dense<0.000000e+00> : vector<8xf32>
    %77 = vector.multi_reduction <add>, %76, %cst_36 [1] : vector<8x8xf32> to vector<8xf32>
    %78 = vector.shape_cast %77 : vector<8xf32> to vector<8x1xf32>
    %79 = tpu.reciprocal %78 {approx = true} : vector<8x1xf32> -> vector<8x1xf32>
    %80 = vector.broadcast %79 : vector<8x1xf32> to vector<8x8xf32>
    %81 = arith.mulf %76, %80 : vector<8x8xf32>
    %82 = arith.truncf %81 : vector<8x8xf32> to vector<8x8xbf16>
    %cst_37 = arith.constant dense<0.000000e+00> : vector<8x8xf32>
    %83 = tpu.matmul %82, %68, %cst_37 {dimension_numbers = #tpu.dot_dimension_numbers<[1], [0], [0], [1], [0, 0, 1, 1], [], []>} : vector<8x8xbf16>, vector<8x8xbf16>, vector<8x8xf32> -> vector<8x8xf32>
    %84 = arith.truncf %83 : vector<8x8xf32> to vector<8x8xbf16>
    %c0_38 = arith.constant 0 : index
    %c8_39 = arith.constant 8 : index
    %85 = vector.load %arg25[%c0_38, %c8_39] : memref<8x32xbf16, #tpu.memory_space<vmem>>, vector<8x8xbf16>
    tpu.vector_store %arg25[%c0_38, %c8_39], %84 {strides = array<i32>} : memref<8x32xbf16, #tpu.memory_space<vmem>>, vector<8x8xbf16>,
    %86 = vector.extract_strided_slice %45 {offsets = [0, 16], sizes = [8, 8], strides = [1, 1]} : vector<8x32xbf16> to vector<8x8xbf16>
    %c0_40 = arith.constant 0 : index
    %c16 = arith.constant 16 : index
    %87 = vector.load %arg23[%c0_40, %c16] : memref<8x32xbf16, #tpu.memory_space<vmem>>, vector<8x8xbf16>
    %c0_41 = arith.constant 0 : index
    %c16_42 = arith.constant 16 : index
    %88 = vector.load %arg24[%c0_41, %c16_42] : memref<8x32xbf16, #tpu.memory_space<vmem>>, vector<8x8xbf16>
    %cst_43 = arith.constant dense<0.000000e+00> : vector<8x8xf32>
    %89 = tpu.matmul %86, %87, %cst_43 {dimension_numbers = #tpu.dot_dimension_numbers<[1], [1], [0], [0], [0, 0, 1, 0], [], []>} : vector<8x8xbf16>, vector<8x8xbf16>, vector<8x8xf32> -> vector<8x8xf32>
    %cst_44 = arith.constant 0.353553385 : f32
    %90 = vector.broadcast %cst_44 : f32 to vector<8x8xf32>
    %91 = arith.mulf %89, %90 : vector<8x8xf32>
    %cst_45 = arith.constant dense<0xFF800000> : vector<8xf32>
    %92 = vector.multi_reduction <maximumf>, %91, %cst_45 [1] : vector<8x8xf32> to vector<8xf32>
    %93 = vector.shape_cast %92 : vector<8xf32> to vector<8x1xf32>
    %94 = vector.broadcast %93 : vector<8x1xf32> to vector<8x8xf32>
    %95 = arith.subf %91, %94 : vector<8x8xf32>
    %96 = math.exp %95 : vector<8x8xf32>
    %cst_46 = arith.constant dense<0.000000e+00> : vector<8xf32>
    %97 = vector.multi_reduction <add>, %96, %cst_46 [1] : vector<8x8xf32> to vector<8xf32>
    %98 = vector.shape_cast %97 : vector<8xf32> to vector<8x1xf32>
    %99 = tpu.reciprocal %98 {approx = true} : vector<8x1xf32> -> vector<8x1xf32>
    %100 = vector.broadcast %99 : vector<8x1xf32> to vector<8x8xf32>
    %101 = arith.mulf %96, %100 : vector<8x8xf32>
    %102 = arith.truncf %101 : vector<8x8xf32> to vector<8x8xbf16>
    %cst_47 = arith.constant dense<0.000000e+00> : vector<8x8xf32>
    %103 = tpu.matmul %102, %88, %cst_47 {dimension_numbers = #tpu.dot_dimension_numbers<[1], [0], [0], [1], [0, 0, 1, 1], [], []>} : vector<8x8xbf16>, vector<8x8xbf16>, vector<8x8xf32> -> vector<8x8xf32>
    %104 = arith.truncf %103 : vector<8x8xf32> to vector<8x8xbf16>
    %c0_48 = arith.constant 0 : index
    %c16_49 = arith.constant 16 : index
    %105 = vector.load %arg25[%c0_48, %c16_49] : memref<8x32xbf16, #tpu.memory_space<vmem>>, vector<8x8xbf16>
    tpu.vector_store %arg25[%c0_48, %c16_49], %104 {strides = array<i32>} : memref<8x32xbf16, #tpu.memory_space<vmem>>, vector<8x8xbf16>,
    %106 = vector.extract_strided_slice %45 {offsets = [0, 24], sizes = [8, 8], strides = [1, 1]} : vector<8x32xbf16> to vector<8x8xbf16>
    %c0_50 = arith.constant 0 : index
    %c24 = arith.constant 24 : index
    %107 = vector.load %arg23[%c0_50, %c24] : memref<8x32xbf16, #tpu.memory_space<vmem>>, vector<8x8xbf16>
    %c0_51 = arith.constant 0 : index
    %c24_52 = arith.constant 24 : index
    %108 = vector.load %arg24[%c0_51, %c24_52] : memref<8x32xbf16, #tpu.memory_space<vmem>>, vector<8x8xbf16>
    %cst_53 = arith.constant dense<0.000000e+00> : vector<8x8xf32>
    %109 = tpu.matmul %106, %107, %cst_53 {dimension_numbers = #tpu.dot_dimension_numbers<[1], [1], [0], [0], [0, 0, 1, 0], [], []>} : vector<8x8xbf16>, vector<8x8xbf16>, vector<8x8xf32> -> vector<8x8xf32>
    %cst_54 = arith.constant 0.353553385 : f32
    %110 = vector.broadcast %cst_54 : f32 to vector<8x8xf32>
    %111 = arith.mulf %109, %110 : vector<8x8xf32>
    %cst_55 = arith.constant dense<0xFF800000> : vector<8xf32>
    %112 = vector.multi_reduction <maximumf>, %111, %cst_55 [1] : vector<8x8xf32> to vector<8xf32>
    %113 = vector.shape_cast %112 : vector<8xf32> to vector<8x1xf32>
    %114 = vector.broadcast %113 : vector<8x1xf32> to vector<8x8xf32>
    %115 = arith.subf %111, %114 : vector<8x8xf32>
    %116 = math.exp %115 : vector<8x8xf32>
    %cst_56 = arith.constant dense<0.000000e+00> : vector<8xf32>
    %117 = vector.multi_reduction <add>, %116, %cst_56 [1] : vector<8x8xf32> to vector<8xf32>
    %118 = vector.shape_cast %117 : vector<8xf32> to vector<8x1xf32>
    %119 = tpu.reciprocal %118 {approx = true} : vector<8x1xf32> -> vector<8x1xf32>
    %120 = vector.broadcast %119 : vector<8x1xf32> to vector<8x8xf32>
    %121 = arith.mulf %116, %120 : vector<8x8xf32>
    %122 = arith.truncf %121 : vector<8x8xf32> to vector<8x8xbf16>
    %cst_57 = arith.constant dense<0.000000e+00> : vector<8x8xf32>
    %123 = tpu.matmul %122, %108, %cst_57 {dimension_numbers = #tpu.dot_dimension_numbers<[1], [0], [0], [1], [0, 0, 1, 1], [], []>} : vector<8x8xbf16>, vector<8x8xbf16>, vector<8x8xf32> -> vector<8x8xf32>
    %124 = arith.truncf %123 : vector<8x8xf32> to vector<8x8xbf16>
    %c0_58 = arith.constant 0 : index
    %c24_59 = arith.constant 24 : index
    %125 = vector.load %arg25[%c0_58, %c24_59] : memref<8x32xbf16, #tpu.memory_space<vmem>>, vector<8x8xbf16>
    tpu.vector_store %arg25[%c0_58, %c24_59], %124 {strides = array<i32>} : memref<8x32xbf16, #tpu.memory_space<vmem>>, vector<8x8xbf16>,
    %c0_60 = arith.constant 0 : index
    %c0_61 = arith.constant 0 : index
    %126 = vector.load %arg25[%c0_60, %c0_61] : memref<8x32xbf16, #tpu.memory_space<vmem>>, vector<8x32xbf16>
    %c0_62 = arith.constant 0 : index
    %c0_63 = arith.constant 0 : index
    %127 = vector.load %arg14[%c0_62, %c0_63] : memref<32x32xbf16, #tpu.memory_space<vmem>>, vector<32x32xbf16>
    %cst_64 = arith.constant dense<0.000000e+00> : vector<8x32xf32>
    %128 = tpu.matmul %126, %127, %cst_64 {dimension_numbers = #tpu.dot_dimension_numbers<[1], [0], [0], [1], [0, 0, 1, 1], [], []>} : vector<8x32xbf16>, vector<32x32xbf16>, vector<8x32xf32> -> vector<8x32xf32>
    %c0_65 = arith.constant 0 : index
    %c0_66 = arith.constant 0 : index
    %129 = vector.load %arg15[%c0_65, %c0_66] : memref<1x32xf32, #tpu.memory_space<vmem>>, vector<1x32xf32>
    %130 = vector.shape_cast %129 : vector<1x32xf32> to vector<32xf32>
    %131 = vector.shape_cast %130 : vector<32xf32> to vector<1x32xf32>
    %132 = vector.broadcast %131 : vector<1x32xf32> to vector<8x32xf32>
    %133 = arith.addf %128, %132 : vector<8x32xf32>
    %134 = arith.addf %4, %133 : vector<8x32xf32>
    %c0_67 = arith.constant 0 : index
    %c0_68 = arith.constant 0 : index
    %135 = vector.load %arg16[%c0_67, %c0_68] : memref<1x32xf32, #tpu.memory_space<vmem>>, vector<1x32xf32>
    %136 = vector.shape_cast %135 : vector<1x32xf32> to vector<32xf32>
    %c0_69 = arith.constant 0 : index
    %c0_70 = arith.constant 0 : index
    %137 = vector.load %arg17[%c0_69, %c0_70] : memref<1x32xf32, #tpu.memory_space<vmem>>, vector<1x32xf32>
    %138 = vector.shape_cast %137 : vector<1x32xf32> to vector<32xf32>
    %cst_71 = arith.constant dense<0.000000e+00> : vector<8xf32>
    %139 = vector.multi_reduction <add>, %134, %cst_71 [1] : vector<8x32xf32> to vector<8xf32>
    %140 = vector.shape_cast %139 : vector<8xf32> to vector<8x1xf32>
    %cst_72 = arith.constant 3.200000e+01 : f32
    %141 = vector.broadcast %cst_72 : f32 to vector<8x1xf32>
    %142 = arith.divf %140, %141 : vector<8x1xf32>
    %143 = vector.broadcast %142 : vector<8x1xf32> to vector<8x32xf32>
    %144 = arith.subf %134, %143 : vector<8x32xf32>
    %145 = arith.mulf %144, %144 : vector<8x32xf32>
    %cst_73 = arith.constant dense<0.000000e+00> : vector<8xf32>
    %146 = vector.multi_reduction <add>, %145, %cst_73 [1] : vector<8x32xf32> to vector<8xf32>
    %147 = vector.shape_cast %146 : vector<8xf32> to vector<8x1xf32>
    %cst_74 = arith.constant 3.200000e+01 : f32
    %148 = vector.broadcast %cst_74 : f32 to vector<8x1xf32>
    %149 = arith.divf %147, %148 : vector<8x1xf32>
    %150 = vector.broadcast %142 : vector<8x1xf32> to vector<8x32xf32>
    %151 = arith.subf %134, %150 : vector<8x32xf32>
    %cst_75 = arith.constant 9.99999997E-7 : f32
    %152 = vector.broadcast %cst_75 : f32 to vector<8x1xf32>
    %153 = arith.addf %149, %152 : vector<8x1xf32>
    %154 = math.rsqrt %153 : vector<8x1xf32>
    %155 = vector.broadcast %154 : vector<8x1xf32> to vector<8x32xf32>
    %156 = arith.mulf %151, %155 : vector<8x32xf32>
    %157 = vector.shape_cast %136 : vector<32xf32> to vector<1x32xf32>
    %158 = vector.broadcast %157 : vector<1x32xf32> to vector<8x32xf32>
    %159 = arith.mulf %156, %158 : vector<8x32xf32>
    %160 = vector.shape_cast %138 : vector<32xf32> to vector<1x32xf32>
    %161 = vector.broadcast %160 : vector<1x32xf32> to vector<8x32xf32>
    %162 = arith.addf %159, %161 : vector<8x32xf32>
    %163 = arith.truncf %162 : vector<8x32xf32> to vector<8x32xbf16>
    %c0_76 = arith.constant 0 : index
    %c0_77 = arith.constant 0 : index
    %164 = vector.load %arg18[%c0_76, %c0_77] : memref<32x64xbf16, #tpu.memory_space<vmem>>, vector<32x64xbf16>
    %cst_78 = arith.constant dense<0.000000e+00> : vector<8x64xf32>
    %165 = tpu.matmul %163, %164, %cst_78 {dimension_numbers = #tpu.dot_dimension_numbers<[1], [0], [0], [1], [0, 0, 1, 1], [], []>} : vector<8x32xbf16>, vector<32x64xbf16>, vector<8x64xf32> -> vector<8x64xf32>
    %c0_79 = arith.constant 0 : index
    %c0_80 = arith.constant 0 : index
    %166 = vector.load %arg19[%c0_79, %c0_80] : memref<1x64xf32, #tpu.memory_space<vmem>>, vector<1x64xf32>
    %167 = vector.shape_cast %166 : vector<1x64xf32> to vector<64xf32>
    %168 = vector.shape_cast %167 : vector<64xf32> to vector<1x64xf32>
    %169 = vector.broadcast %168 : vector<1x64xf32> to vector<8x64xf32>
    %170 = arith.addf %165, %169 : vector<8x64xf32>
    %cst_81 = arith.constant 5.000000e-01 : f32
    %171 = vector.broadcast %cst_81 : f32 to vector<8x64xf32>
    %172 = arith.mulf %171, %170 : vector<8x64xf32>
    %cst_82 = arith.constant 0.707106769 : f32
    %173 = vector.broadcast %cst_82 : f32 to vector<8x64xf32>
    %174 = arith.mulf %170, %173 : vector<8x64xf32>
    %175 = math.erf %174 : vector<8x64xf32>
    %cst_83 = arith.constant 1.000000e+00 : f32
    %176 = vector.broadcast %cst_83 : f32 to vector<8x64xf32>
    %177 = arith.addf %176, %175 : vector<8x64xf32>
    %178 = arith.mulf %172, %177 : vector<8x64xf32>
    %179 = arith.truncf %178 : vector<8x64xf32> to vector<8x64xbf16>
    %c0_84 = arith.constant 0 : index
    %c0_85 = arith.constant 0 : index
    %180 = vector.load %arg20[%c0_84, %c0_85] : memref<64x32xbf16, #tpu.memory_space<vmem>>, vector<64x32xbf16>
    %cst_86 = arith.constant dense<0.000000e+00> : vector<8x32xf32>
    %181 = tpu.matmul %179, %180, %cst_86 {dimension_numbers = #tpu.dot_dimension_numbers<[1], [0], [0], [1], [0, 0, 1, 1], [], []>} : vector<8x64xbf16>, vector<64x32xbf16>, vector<8x32xf32> -> vector<8x32xf32>
    %c0_87 = arith.constant 0 : index
    %c0_88 = arith.constant 0 : index
    %182 = vector.load %arg21[%c0_87, %c0_88] : memref<1x32xf32, #tpu.memory_space<vmem>>, vector<1x32xf32>
    %183 = vector.shape_cast %182 : vector<1x32xf32> to vector<32xf32>
    %184 = vector.shape_cast %183 : vector<32xf32> to vector<1x32xf32>
    %185 = vector.broadcast %184 : vector<1x32xf32> to vector<8x32xf32>
    %186 = arith.addf %181, %185 : vector<8x32xf32>
    %187 = arith.addf %134, %186 : vector<8x32xf32>
    %c0_89 = arith.constant 0 : index
    %c0_90 = arith.constant 0 : index
    %c0_91 = arith.constant 0 : index
    %188 = vector.load %arg22[%c0_89, %c0_90, %c0_91] : memref<1x8x32xf32, #tpu.memory_space<vmem>>, vector<1x8x32xf32>
    %189 = vector.shape_cast %188 : vector<1x8x32xf32> to vector<8x32xf32>
    %190 = vector.shape_cast %187 : vector<8x32xf32> to vector<1x8x32xf32>
    tpu.vector_store %arg22[%c0_89, %c0_90, %c0_91], %190 {strides = array<i32>} : memref<1x8x32xf32, #tpu.memory_space<vmem>>, vector<1x8x32xf32>,
    return
  }
  func.func @transform_0(%arg0: i32, %arg1: i32) -> (i32, i32, i32) {
    %c0_i32 = arith.constant 0 : i32
    %c0_i32_0 = arith.constant 0 : i32
    return %arg0, %arg1, %c0_i32 : i32, i32, i32
  }
  func.func @transform_1(%arg0: i32, %arg1: i32) -> (i32, i32, i32) {
    %c0_i32 = arith.constant 0 : i32
    %c0_i32_0 = arith.constant 0 : i32
    %c0_i32_1 = arith.constant 0 : i32
    return %arg0, %c0_i32, %c0_i32_0 : i32, i32, i32
  }
  func.func @transform_2(%arg0: i32, %arg1: i32) -> (i32, i32, i32) {
    %c0_i32 = arith.constant 0 : i32
    %c0_i32_0 = arith.constant 0 : i32
    return %arg0, %arg1, %c0_i32 : i32, i32, i32
  }
  func.func @transform_3(%arg0: i32, %arg1: i32) -> (i32, i32, i32) {
    %c0_i32 = arith.constant 0 : i32
    %c0_i32_0 = arith.constant 0 : i32
    %c0_i32_1 = arith.constant 0 : i32
    return %arg0, %c0_i32, %c0_i32_0 : i32, i32, i32
  }
  func.func @transform_4(%arg0: i32, %arg1: i32) -> (i32, i32) {
    %c0_i32 = arith.constant 0 : i32
    %c0_i32_0 = arith.constant 0 : i32
    %c0_i32_1 = arith.constant 0 : i32
    return %c0_i32, %c0_i32_0 : i32, i32
  }
  func.func @transform_5(%arg0: i32, %arg1: i32) -> (i32, i32) {
    %c0_i32 = arith.constant 0 : i32
    %c0_i32_0 = arith.constant 0 : i32
    %c0_i32_1 = arith.constant 0 : i32
    return %c0_i32, %c0_i32_0 : i32, i32
  }
  func.func @transform_6(%arg0: i32, %arg1: i32) -> (i32, i32) {
    %c0_i32 = arith.constant 0 : i32
    %c0_i32_0 = arith.constant 0 : i32
    %c0_i32_1 = arith.constant 0 : i32
    return %c0_i32, %c0_i32_0 : i32, i32
  }
  func.func @transform_7(%arg0: i32, %arg1: i32) -> (i32, i32) {
    %c0_i32 = arith.constant 0 : i32
    %c0_i32_0 = arith.constant 0 : i32
    %c0_i32_1 = arith.constant 0 : i32
    return %c0_i32, %c0_i32_0 : i32, i32
  }
  func.func @transform_8(%arg0: i32, %arg1: i32) -> (i32, i32) {
    %c0_i32 = arith.constant 0 : i32
    %c0_i32_0 = arith.constant 0 : i32
    %c0_i32_1 = arith.constant 0 : i32
    return %c0_i32, %c0_i32_0 : i32, i32
  }
  func.func @transform_9(%arg0: i32, %arg1: i32) -> (i32, i32) {
    %c0_i32 = arith.constant 0 : i32
    %c0_i32_0 = arith.constant 0 : i32
    %c0_i32_1 = arith.constant 0 : i32
    return %c0_i32, %c0_i32_0 : i32, i32
  }
  func.func @transform_10(%arg0: i32, %arg1: i32) -> (i32, i32) {
    %c0_i32 = arith.constant 0 : i32
    %c0_i32_0 = arith.constant 0 : i32
    %c0_i32_1 = arith.constant 0 : i32
    return %c0_i32, %c0_i32_0 : i32, i32
  }
  func.func @transform_11(%arg0: i32, %arg1: i32) -> (i32, i32) {
    %c0_i32 = arith.constant 0 : i32
    %c0_i32_0 = arith.constant 0 : i32
    %c0_i32_1 = arith.constant 0 : i32
    return %c0_i32, %c0_i32_0 : i32, i32
  }
  func.func @transform_12(%arg0: i32, %arg1: i32) -> (i32, i32) {
    %c0_i32 = arith.constant 0 : i32
    %c0_i32_0 = arith.constant 0 : i32
    %c0_i32_1 = arith.constant 0 : i32
    return %c0_i32, %c0_i32_0 : i32, i32
  }
  func.func @transform_13(%arg0: i32, %arg1: i32) -> (i32, i32) {
    %c0_i32 = arith.constant 0 : i32
    %c0_i32_0 = arith.constant 0 : i32
    %c0_i32_1 = arith.constant 0 : i32
    return %c0_i32, %c0_i32_0 : i32, i32
  }
  func.func @transform_14(%arg0: i32, %arg1: i32) -> (i32, i32) {
    %c0_i32 = arith.constant 0 : i32
    %c0_i32_0 = arith.constant 0 : i32
    %c0_i32_1 = arith.constant 0 : i32
    return %c0_i32, %c0_i32_0 : i32, i32
  }
  func.func @transform_15(%arg0: i32, %arg1: i32) -> (i32, i32) {
    %c0_i32 = arith.constant 0 : i32
    %c0_i32_0 = arith.constant 0 : i32
    %c0_i32_1 = arith.constant 0 : i32
    return %c0_i32, %c0_i32_0 : i32, i32
  }
  func.func @transform_16(%arg0: i32, %arg1: i32) -> (i32, i32) {
    %c0_i32 = arith.constant 0 : i32
    %c0_i32_0 = arith.constant 0 : i32
    %c0_i32_1 = arith.constant 0 : i32
    return %c0_i32, %c0_i32_0 : i32, i32
  }
  func.func @transform_17(%arg0: i32, %arg1: i32) -> (i32, i32) {
    %c0_i32 = arith.constant 0 : i32
    %c0_i32_0 = arith.constant 0 : i32
    %c0_i32_1 = arith.constant 0 : i32
    return %c0_i32, %c0_i32_0 : i32, i32
  }
  func.func @transform_18(%arg0: i32, %arg1: i32) -> (i32, i32) {
    %c0_i32 = arith.constant 0 : i32
    %c0_i32_0 = arith.constant 0 : i32
    %c0_i32_1 = arith.constant 0 : i32
    return %c0_i32, %c0_i32_0 : i32, i32
  }
  func.func @transform_19(%arg0: i32, %arg1: i32) -> (i32, i32) {
    %c0_i32 = arith.constant 0 : i32
    %c0_i32_0 = arith.constant 0 : i32
    %c0_i32_1 = arith.constant 0 : i32
    return %c0_i32, %c0_i32_0 : i32, i32
  }
  func.func @transform_20(%arg0: i32, %arg1: i32) -> (i32, i32, i32) {
    %c0_i32 = arith.constant 0 : i32
    %c0_i32_0 = arith.constant 0 : i32
    return %arg0, %arg1, %c0_i32 : i32, i32, i32
  }
}

module attributes {stable_mosaic.version = 11 : i64} {
  func.func @block_kernel(%arg0: i32, %arg1: i32, %arg2: memref<1x8x32xf32, #tpu.memory_space<vmem>>, %arg3: memref<1x8x32xf32, #tpu.memory_space<vmem>>, %arg4: memref<1x8x1xf32, #tpu.memory_space<vmem>>, %arg5: memref<1x8x1xf32, #tpu.memory_space<vmem>>, %arg6: memref<1x32xf32, #tpu.memory_space<vmem>>, %arg7: memref<1x32xf32, #tpu.memory_space<vmem>>, %arg8: memref<32x32xbf16, #tpu.memory_space<vmem>>, %arg9: memref<1x32xf32, #tpu.memory_space<vmem>>, %arg10: memref<32x32xbf16, #tpu.memory_space<vmem>>, %arg11: memref<1x32xf32, #tpu.memory_space<vmem>>, %arg12: memref<32x32xbf16, #tpu.memory_space<vmem>>, %arg13: memref<1x32xf32, #tpu.memory_space<vmem>>, %arg14: memref<32x32xbf16, #tpu.memory_space<vmem>>, %arg15: memref<1x32xf32, #tpu.memory_space<vmem>>, %arg16: memref<1x32xf32, #tpu.memory_space<vmem>>, %arg17: memref<1x32xf32, #tpu.memory_space<vmem>>, %arg18: memref<32x64xbf16, #tpu.memory_space<vmem>>, %arg19: memref<1x64xf32, #tpu.memory_space<vmem>>, %arg20: memref<64x32xbf16, #tpu.memory_space<vmem>>, %arg21: memref<1x32xf32, #tpu.memory_space<vmem>>, %arg22: memref<1x8x32xf32, #tpu.memory_space<vmem>>, %arg23: memref<8x32xbf16, #tpu.memory_space<vmem>>, %arg24: memref<8x32xbf16, #tpu.memory_space<vmem>>, %arg25: memref<8x32xbf16, #tpu.memory_space<vmem>>) attributes {dimension_semantics = [#tpu.dimension_semantics<parallel>, #tpu.dimension_semantics<arbitrary>], iteration_bounds = array<i64: 2, 1>, scalar_prefetch = 0 : i64, scratch_operands = 3 : i64, tpu.core_type = #tpu.core_type<tc>, window_params = [{transform_indices = @transform_0, window_bounds = array<i64: 1, 8, 32>}, {transform_indices = @transform_1, window_bounds = array<i64: 1, 8, 32>}, {transform_indices = @transform_2, window_bounds = array<i64: 1, 8, 1>}, {transform_indices = @transform_3, window_bounds = array<i64: 1, 8, 1>}, {pipeline_mode = #tpu.pipeline_mode<synchronous>, transform_indices = @transform_4, window_bounds = array<i64: 1, 32>}, {pipeline_mode = #tpu.pipeline_mode<synchronous>, transform_indices = @transform_5, window_bounds = array<i64: 1, 32>}, {pipeline_mode = #tpu.pipeline_mode<synchronous>, transform_indices = @transform_6, window_bounds = array<i64: 32, 32>}, {pipeline_mode = #tpu.pipeline_mode<synchronous>, transform_indices = @transform_7, window_bounds = array<i64: 1, 32>}, {pipeline_mode = #tpu.pipeline_mode<synchronous>, transform_indices = @transform_8, window_bounds = array<i64: 32, 32>}, {pipeline_mode = #tpu.pipeline_mode<synchronous>, transform_indices = @transform_9, window_bounds = array<i64: 1, 32>}, {pipeline_mode = #tpu.pipeline_mode<synchronous>, transform_indices = @transform_10, window_bounds = array<i64: 32, 32>}, {pipeline_mode = #tpu.pipeline_mode<synchronous>, transform_indices = @transform_11, window_bounds = array<i64: 1, 32>}, {pipeline_mode = #tpu.pipeline_mode<synchronous>, transform_indices = @transform_12, window_bounds = array<i64: 32, 32>}, {pipeline_mode = #tpu.pipeline_mode<synchronous>, transform_indices = @transform_13, window_bounds = array<i64: 1, 32>}, {pipeline_mode = #tpu.pipeline_mode<synchronous>, transform_indices = @transform_14, window_bounds = array<i64: 1, 32>}, {pipeline_mode = #tpu.pipeline_mode<synchronous>, transform_indices = @transform_15, window_bounds = array<i64: 1, 32>}, {pipeline_mode = #tpu.pipeline_mode<synchronous>, transform_indices = @transform_16, window_bounds = array<i64: 32, 64>}, {pipeline_mode = #tpu.pipeline_mode<synchronous>, transform_indices = @transform_17, window_bounds = array<i64: 1, 64>}, {pipeline_mode = #tpu.pipeline_mode<synchronous>, transform_indices = @transform_18, window_bounds = array<i64: 64, 32>}, {pipeline_mode = #tpu.pipeline_mode<synchronous>, transform_indices = @transform_19, window_bounds = array<i64: 1, 32>}, {transform_indices = @transform_20, window_bounds = array<i64: 1, 8, 32>}]} {
    %c0_i32 = arith.constant 0 : i32
    %0 = arith.cmpi eq, %arg1, %c0_i32 : i32
    %1 = arith.extui %0 : i1 to i32
    %c0_i32_0 = arith.constant 0 : i32
    %2 = arith.cmpi ne, %1, %c0_i32_0 : i32
    scf.if %2 {
      %c0_92 = arith.constant 0 : index
      %c0_93 = arith.constant 0 : index
      %c0_94 = arith.constant 0 : index
      %191 = vector.load %arg3[%c0_92, %c0_93, %c0_94] : memref<1x8x32xf32, #tpu.memory_space<vmem>>, vector<1x8x32xf32>
      %192 = vector.shape_cast %191 : vector<1x8x32xf32> to vector<8x32xf32>
      %c0_95 = arith.constant 0 : index
      %c0_96 = arith.constant 0 : index
      %c0_97 = arith.constant 0 : index
      %193 = vector.load %arg5[%c0_95, %c0_96, %c0_97] : memref<1x8x1xf32, #tpu.memory_space<vmem>>, vector<1x8x1xf32>
      %194 = vector.shape_cast %193 : vector<1x8x1xf32> to vector<8x1xf32>
      %c0_98 = arith.constant 0 : index
      %c0_99 = arith.constant 0 : index
      %195 = vector.load %arg6[%c0_98, %c0_99] : memref<1x32xf32, #tpu.memory_space<vmem>>, vector<1x32xf32>
      %196 = vector.shape_cast %195 : vector<1x32xf32> to vector<32xf32>
      %c0_100 = arith.constant 0 : index
      %c0_101 = arith.constant 0 : index
      %197 = vector.load %arg7[%c0_100, %c0_101] : memref<1x32xf32, #tpu.memory_space<vmem>>, vector<1x32xf32>
      %198 = vector.shape_cast %197 : vector<1x32xf32> to vector<32xf32>
      %cst_102 = arith.constant dense<0.000000e+00> : vector<8xf32>
      %199 = vector.multi_reduction <add>, %192, %cst_102 [1] : vector<8x32xf32> to vector<8xf32>
      %200 = vector.shape_cast %199 : vector<8xf32> to vector<8x1xf32>
      %cst_103 = arith.constant 3.200000e+01 : f32
      %201 = vector.broadcast %cst_103 : f32 to vector<8x1xf32>
      %202 = arith.divf %200, %201 : vector<8x1xf32>
      %203 = vector.broadcast %202 : vector<8x1xf32> to vector<8x32xf32>
      %204 = arith.subf %192, %203 : vector<8x32xf32>
      %205 = arith.mulf %204, %204 : vector<8x32xf32>
      %cst_104 = arith.constant dense<0.000000e+00> : vector<8xf32>
      %206 = vector.multi_reduction <add>, %205, %cst_104 [1] : vector<8x32xf32> to vector<8xf32>
      %207 = vector.shape_cast %206 : vector<8xf32> to vector<8x1xf32>
      %cst_105 = arith.constant 3.200000e+01 : f32
      %208 = vector.broadcast %cst_105 : f32 to vector<8x1xf32>
      %209 = arith.divf %207, %208 : vector<8x1xf32>
      %210 = vector.broadcast %202 : vector<8x1xf32> to vector<8x32xf32>
      %211 = arith.subf %192, %210 : vector<8x32xf32>
      %cst_106 = arith.constant 9.99999997E-7 : f32
      %212 = vector.broadcast %cst_106 : f32 to vector<8x1xf32>
      %213 = arith.addf %209, %212 : vector<8x1xf32>
      %214 = math.rsqrt %213 : vector<8x1xf32>
      %215 = vector.broadcast %214 : vector<8x1xf32> to vector<8x32xf32>
      %216 = arith.mulf %211, %215 : vector<8x32xf32>
      %217 = vector.shape_cast %196 : vector<32xf32> to vector<1x32xf32>
      %218 = vector.broadcast %217 : vector<1x32xf32> to vector<8x32xf32>
      %219 = arith.mulf %216, %218 : vector<8x32xf32>
      %220 = vector.shape_cast %198 : vector<32xf32> to vector<1x32xf32>
      %221 = vector.broadcast %220 : vector<1x32xf32> to vector<8x32xf32>
      %222 = arith.addf %219, %221 : vector<8x32xf32>
      %223 = arith.truncf %222 : vector<8x32xf32> to vector<8x32xbf16>
      %c0_107 = arith.constant 0 : index
      %c0_108 = arith.constant 0 : index
      %224 = vector.load %arg10[%c0_107, %c0_108] : memref<32x32xbf16, #tpu.memory_space<vmem>>, vector<32x32xbf16>
      %cst_109 = arith.constant dense<0.000000e+00> : vector<8x32xf32>
      %225 = tpu.matmul %223, %224, %cst_109 {dimension_numbers = #tpu.dot_dimension_numbers<[1], [0], [0], [1], [0, 0, 1, 1], [], []>} : vector<8x32xbf16>, vector<32x32xbf16>, vector<8x32xf32> -> vector<8x32xf32>
      %c0_110 = arith.constant 0 : index
      %c0_111 = arith.constant 0 : index
      %226 = vector.load %arg11[%c0_110, %c0_111] : memref<1x32xf32, #tpu.memory_space<vmem>>, vector<1x32xf32>
      %227 = vector.shape_cast %226 : vector<1x32xf32> to vector<32xf32>
      %228 = vector.shape_cast %227 : vector<32xf32> to vector<1x32xf32>
      %229 = vector.broadcast %228 : vector<1x32xf32> to vector<8x32xf32>
      %230 = arith.addf %225, %229 : vector<8x32xf32>
      %c0_112 = arith.constant 0 : index
      %c0_113 = arith.constant 0 : index
      %231 = vector.load %arg12[%c0_112, %c0_113] : memref<32x32xbf16, #tpu.memory_space<vmem>>, vector<32x32xbf16>
      %cst_114 = arith.constant dense<0.000000e+00> : vector<8x32xf32>
      %232 = tpu.matmul %223, %231, %cst_114 {dimension_numbers = #tpu.dot_dimension_numbers<[1], [0], [0], [1], [0, 0, 1, 1], [], []>} : vector<8x32xbf16>, vector<32x32xbf16>, vector<8x32xf32> -> vector<8x32xf32>
      %c0_115 = arith.constant 0 : index
      %c0_116 = arith.constant 0 : index
      %233 = vector.load %arg13[%c0_115, %c0_116] : memref<1x32xf32, #tpu.memory_space<vmem>>, vector<1x32xf32>
      %234 = vector.shape_cast %233 : vector<1x32xf32> to vector<32xf32>
      %235 = vector.shape_cast %234 : vector<32xf32> to vector<1x32xf32>
      %236 = vector.broadcast %235 : vector<1x32xf32> to vector<8x32xf32>
      %237 = arith.addf %232, %236 : vector<8x32xf32>
      %238 = vector.broadcast %194 : vector<8x1xf32> to vector<8x32xf32>
      %239 = arith.mulf %230, %238 : vector<8x32xf32>
      %240 = arith.truncf %239 : vector<8x32xf32> to vector<8x32xbf16>
      %c0_117 = arith.constant 0 : index
      %c0_118 = arith.constant 0 : index
      %241 = vector.load %arg23[%c0_117, %c0_118] : memref<8x32xbf16, #tpu.memory_space<vmem>>, vector<8x32xbf16>
      tpu.vector_store %arg23[%c0_117, %c0_118], %240 {strides = array<i32>} : memref<8x32xbf16, #tpu.memory_space<vmem>>, vector<8x32xbf16>,
      %242 = vector.broadcast %194 : vector<8x1xf32> to vector<8x32xf32>
      %243 = arith.mulf %237, %242 : vector<8x32xf32>
      %244 = arith.truncf %243 : vector<8x32xf32> to vector<8x32xbf16>
      %c0_119 = arith.constant 0 : index
      %c0_120 = arith.constant 0 : index
      %245 = vector.load %arg24[%c0_119, %c0_120] : memref<8x32xbf16, #tpu.memory_space<vmem>>, vector<8x32xbf16>
      tpu.vector_store %arg24[%c0_119, %c0_120], %244 {strides = array<i32>} : memref<8x32xbf16, #tpu.memory_space<vmem>>, vector<8x32xbf16>,
    } else {
    }
    %c0 = arith.constant 0 : index
    %c0_1 = arith.constant 0 : index
    %c0_2 = arith.constant 0 : index
    %3 = vector.load %arg2[%c0, %c0_1, %c0_2] : memref<1x8x32xf32, #tpu.memory_space<vmem>>, vector<1x8x32xf32>
    %4 = vector.shape_cast %3 : vector<1x8x32xf32> to vector<8x32xf32>
    %c0_3 = arith.constant 0 : index
    %c0_4 = arith.constant 0 : index
    %c0_5 = arith.constant 0 : index
    %5 = vector.load %arg4[%c0_3, %c0_4, %c0_5] : memref<1x8x1xf32, #tpu.memory_space<vmem>>, vector<1x8x1xf32>
    %6 = vector.shape_cast %5 : vector<1x8x1xf32> to vector<8x1xf32>
    %c0_6 = arith.constant 0 : index
    %c0_7 = arith.constant 0 : index
    %7 = vector.load %arg6[%c0_6, %c0_7] : memref<1x32xf32, #tpu.memory_space<vmem>>, vector<1x32xf32>
    %8 = vector.shape_cast %7 : vector<1x32xf32> to vector<32xf32>
    %c0_8 = arith.constant 0 : index
    %c0_9 = arith.constant 0 : index
    %9 = vector.load %arg7[%c0_8, %c0_9] : memref<1x32xf32, #tpu.memory_space<vmem>>, vector<1x32xf32>
    %10 = vector.shape_cast %9 : vector<1x32xf32> to vector<32xf32>
    %cst = arith.constant dense<0.000000e+00> : vector<8xf32>
    %11 = vector.multi_reduction <add>, %4, %cst [1] : vector<8x32xf32> to vector<8xf32>
    %12 = vector.shape_cast %11 : vector<8xf32> to vector<8x1xf32>
    %cst_10 = arith.constant 3.200000e+01 : f32
    %13 = vector.broadcast %cst_10 : f32 to vector<8x1xf32>
    %14 = arith.divf %12, %13 : vector<8x1xf32>
    %15 = vector.broadcast %14 : vector<8x1xf32> to vector<8x32xf32>
    %16 = arith.subf %4, %15 : vector<8x32xf32>
    %17 = arith.mulf %16, %16 : vector<8x32xf32>
    %cst_11 = arith.constant dense<0.000000e+00> : vector<8xf32>
    %18 = vector.multi_reduction <add>, %17, %cst_11 [1] : vector<8x32xf32> to vector<8xf32>
    %19 = vector.shape_cast %18 : vector<8xf32> to vector<8x1xf32>
    %cst_12 = arith.constant 3.200000e+01 : f32
    %20 = vector.broadcast %cst_12 : f32 to vector<8x1xf32>
    %21 = arith.divf %19, %20 : vector<8x1xf32>
    %22 = vector.broadcast %14 : vector<8x1xf32> to vector<8x32xf32>
    %23 = arith.subf %4, %22 : vector<8x32xf32>
    %cst_13 = arith.constant 9.99999997E-7 : f32
    %24 = vector.broadcast %cst_13 : f32 to vector<8x1xf32>
    %25 = arith.addf %21, %24 : vector<8x1xf32>
    %26 = math.rsqrt %25 : vector<8x1xf32>
    %27 = vector.broadcast %26 : vector<8x1xf32> to vector<8x32xf32>
    %28 = arith.mulf %23, %27 : vector<8x32xf32>
    %29 = vector.shape_cast %8 : vector<32xf32> to vector<1x32xf32>
    %30 = vector.broadcast %29 : vector<1x32xf32> to vector<8x32xf32>
    %31 = arith.mulf %28, %30 : vector<8x32xf32>
    %32 = vector.shape_cast %10 : vector<32xf32> to vector<1x32xf32>
    %33 = vector.broadcast %32 : vector<1x32xf32> to vector<8x32xf32>
    %34 = arith.addf %31, %33 : vector<8x32xf32>
    %35 = arith.truncf %34 : vector<8x32xf32> to vector<8x32xbf16>
    %c0_14 = arith.constant 0 : index
    %c0_15 = arith.constant 0 : index
    %36 = vector.load %arg8[%c0_14, %c0_15] : memref<32x32xbf16, #tpu.memory_space<vmem>>, vector<32x32xbf16>
    %cst_16 = arith.constant dense<0.000000e+00> : vector<8x32xf32>
    %37 = tpu.matmul %35, %36, %cst_16 {dimension_numbers = #tpu.dot_dimension_numbers<[1], [0], [0], [1], [0, 0, 1, 1], [], []>} : vector<8x32xbf16>, vector<32x32xbf16>, vector<8x32xf32> -> vector<8x32xf32>
    %c0_17 = arith.constant 0 : index
    %c0_18 = arith.constant 0 : index
    %38 = vector.load %arg9[%c0_17, %c0_18] : memref<1x32xf32, #tpu.memory_space<vmem>>, vector<1x32xf32>
    %39 = vector.shape_cast %38 : vector<1x32xf32> to vector<32xf32>
    %40 = vector.shape_cast %39 : vector<32xf32> to vector<1x32xf32>
    %41 = vector.broadcast %40 : vector<1x32xf32> to vector<8x32xf32>
    %42 = arith.addf %37, %41 : vector<8x32xf32>
    %43 = vector.broadcast %6 : vector<8x1xf32> to vector<8x32xf32>
    %44 = arith.mulf %42, %43 : vector<8x32xf32>
    %45 = arith.truncf %44 : vector<8x32xf32> to vector<8x32xbf16>
    %46 = vector.extract_strided_slice %45 {offsets = [0, 0], sizes = [8, 8], strides = [1, 1]} : vector<8x32xbf16> to vector<8x8xbf16>
    %c0_19 = arith.constant 0 : index
    %c0_20 = arith.constant 0 : index
    %47 = vector.load %arg23[%c0_19, %c0_20] : memref<8x32xbf16, #tpu.memory_space<vmem>>, vector<8x8xbf16>
    %c0_21 = arith.constant 0 : index
    %c0_22 = arith.constant 0 : index
    %48 = vector.load %arg24[%c0_21, %c0_22] : memref<8x32xbf16, #tpu.memory_space<vmem>>, vector<8x8xbf16>
    %cst_23 = arith.constant dense<0.000000e+00> : vector<8x8xf32>
    %49 = tpu.matmul %46, %47, %cst_23 {dimension_numbers = #tpu.dot_dimension_numbers<[1], [1], [0], [0], [0, 0, 1, 0], [], []>} : vector<8x8xbf16>, vector<8x8xbf16>, vector<8x8xf32> -> vector<8x8xf32>
    %cst_24 = arith.constant 0.353553385 : f32
    %50 = vector.broadcast %cst_24 : f32 to vector<8x8xf32>
    %51 = arith.mulf %49, %50 : vector<8x8xf32>
    %cst_25 = arith.constant dense<0xFF800000> : vector<8xf32>
    %52 = vector.multi_reduction <maximumf>, %51, %cst_25 [1] : vector<8x8xf32> to vector<8xf32>
    %53 = vector.shape_cast %52 : vector<8xf32> to vector<8x1xf32>
    %54 = vector.broadcast %53 : vector<8x1xf32> to vector<8x8xf32>
    %55 = arith.subf %51, %54 : vector<8x8xf32>
    %56 = math.exp %55 : vector<8x8xf32>
    %cst_26 = arith.constant dense<0.000000e+00> : vector<8xf32>
    %57 = vector.multi_reduction <add>, %56, %cst_26 [1] : vector<8x8xf32> to vector<8xf32>
    %58 = vector.shape_cast %57 : vector<8xf32> to vector<8x1xf32>
    %59 = tpu.reciprocal %58 {approx = true} : vector<8x1xf32> -> vector<8x1xf32>
    %60 = vector.broadcast %59 : vector<8x1xf32> to vector<8x8xf32>
    %61 = arith.mulf %56, %60 : vector<8x8xf32>
    %62 = arith.truncf %61 : vector<8x8xf32> to vector<8x8xbf16>
    %cst_27 = arith.constant dense<0.000000e+00> : vector<8x8xf32>
    %63 = tpu.matmul %62, %48, %cst_27 {dimension_numbers = #tpu.dot_dimension_numbers<[1], [0], [0], [1], [0, 0, 1, 1], [], []>} : vector<8x8xbf16>, vector<8x8xbf16>, vector<8x8xf32> -> vector<8x8xf32>
    %64 = arith.truncf %63 : vector<8x8xf32> to vector<8x8xbf16>
    %c0_28 = arith.constant 0 : index
    %c0_29 = arith.constant 0 : index
    %65 = vector.load %arg25[%c0_28, %c0_29] : memref<8x32xbf16, #tpu.memory_space<vmem>>, vector<8x8xbf16>
    tpu.vector_store %arg25[%c0_28, %c0_29], %64 {strides = array<i32>} : memref<8x32xbf16, #tpu.memory_space<vmem>>, vector<8x8xbf16>,
    %66 = vector.extract_strided_slice %45 {offsets = [0, 8], sizes = [8, 8], strides = [1, 1]} : vector<8x32xbf16> to vector<8x8xbf16>
    %c0_30 = arith.constant 0 : index
    %c8 = arith.constant 8 : index
    %67 = vector.load %arg23[%c0_30, %c8] : memref<8x32xbf16, #tpu.memory_space<vmem>>, vector<8x8xbf16>
    %c0_31 = arith.constant 0 : index
    %c8_32 = arith.constant 8 : index
    %68 = vector.load %arg24[%c0_31, %c8_32] : memref<8x32xbf16, #tpu.memory_space<vmem>>, vector<8x8xbf16>
    %cst_33 = arith.constant dense<0.000000e+00> : vector<8x8xf32>
    %69 = tpu.matmul %66, %67, %cst_33 {dimension_numbers = #tpu.dot_dimension_numbers<[1], [1], [0], [0], [0, 0, 1, 0], [], []>} : vector<8x8xbf16>, vector<8x8xbf16>, vector<8x8xf32> -> vector<8x8xf32>
    %cst_34 = arith.constant 0.353553385 : f32
    %70 = vector.broadcast %cst_34 : f32 to vector<8x8xf32>
    %71 = arith.mulf %69, %70 : vector<8x8xf32>
    %cst_35 = arith.constant dense<0xFF800000> : vector<8xf32>
    %72 = vector.multi_reduction <maximumf>, %71, %cst_35 [1] : vector<8x8xf32> to vector<8xf32>
    %73 = vector.shape_cast %72 : vector<8xf32> to vector<8x1xf32>
    %74 = vector.broadcast %73 : vector<8x1xf32> to vector<8x8xf32>
    %75 = arith.subf %71, %74 : vector<8x8xf32>
    %76 = math.exp %75 : vector<8x8xf32>
    %cst_36 = arith.constant dense<0.000000e+00> : vector<8xf32>
    %77 = vector.multi_reduction <add>, %76, %cst_36 [1] : vector<8x8xf32> to vector<8xf32>
    %78 = vector.shape_cast %77 : vector<8xf32> to vector<8x1xf32>
    %79 = tpu.reciprocal %78 {approx = true} : vector<8x1xf32> -> vector<8x1xf32>
    %80 = vector.broadcast %79 : vector<8x1xf32> to vector<8x8xf32>
    %81 = arith.mulf %76, %80 : vector<8x8xf32>
    %82 = arith.truncf %81 : vector<8x8xf32> to vector<8x8xbf16>
    %cst_37 = arith.constant dense<0.000000e+00> : vector<8x8xf32>
    %83 = tpu.matmul %82, %68, %cst_37 {dimension_numbers = #tpu.dot_dimension_numbers<[1], [0], [0], [1], [0, 0, 1, 1], [], []>} : vector<8x8xbf16>, vector<8x8xbf16>, vector<8x8xf32> -> vector<8x8xf32>
    %84 = arith.truncf %83 : vector<8x8xf32> to vector<8x8xbf16>
    %c0_38 = arith.constant 0 : index
    %c8_39 = arith.constant 8 : index
    %85 = vector.load %arg25[%c0_38, %c8_39] : memref<8x32xbf16, #tpu.memory_space<vmem>>, vector<8x8xbf16>
    tpu.vector_store %arg25[%c0_38, %c8_39], %84 {strides = array<i32>} : memref<8x32xbf16, #tpu.memory_space<vmem>>, vector<8x8xbf16>,
    %86 = vector.extract_strided_slice %45 {offsets = [0, 16], sizes = [8, 8], strides = [1, 1]} : vector<8x32xbf16> to vector<8x8xbf16>
    %c0_40 = arith.constant 0 : index
    %c16 = arith.constant 16 : index
    %87 = vector.load %arg23[%c0_40, %c16] : memref<8x32xbf16, #tpu.memory_space<vmem>>, vector<8x8xbf16>
    %c0_41 = arith.constant 0 : index
    %c16_42 = arith.constant 16 : index
    %88 = vector.load %arg24[%c0_41, %c16_42] : memref<8x32xbf16, #tpu.memory_space<vmem>>, vector<8x8xbf16>
    %cst_43 = arith.constant dense<0.000000e+00> : vector<8x8xf32>
    %89 = tpu.matmul %86, %87, %cst_43 {dimension_numbers = #tpu.dot_dimension_numbers<[1], [1], [0], [0], [0, 0, 1, 0], [], []>} : vector<8x8xbf16>, vector<8x8xbf16>, vector<8x8xf32> -> vector<8x8xf32>
    %cst_44 = arith.constant 0.353553385 : f32
    %90 = vector.broadcast %cst_44 : f32 to vector<8x8xf32>
    %91 = arith.mulf %89, %90 : vector<8x8xf32>
    %cst_45 = arith.constant dense<0xFF800000> : vector<8xf32>
    %92 = vector.multi_reduction <maximumf>, %91, %cst_45 [1] : vector<8x8xf32> to vector<8xf32>
    %93 = vector.shape_cast %92 : vector<8xf32> to vector<8x1xf32>
    %94 = vector.broadcast %93 : vector<8x1xf32> to vector<8x8xf32>
    %95 = arith.subf %91, %94 : vector<8x8xf32>
    %96 = math.exp %95 : vector<8x8xf32>
    %cst_46 = arith.constant dense<0.000000e+00> : vector<8xf32>
    %97 = vector.multi_reduction <add>, %96, %cst_46 [1] : vector<8x8xf32> to vector<8xf32>
    %98 = vector.shape_cast %97 : vector<8xf32> to vector<8x1xf32>
    %99 = tpu.reciprocal %98 {approx = true} : vector<8x1xf32> -> vector<8x1xf32>
    %100 = vector.broadcast %99 : vector<8x1xf32> to vector<8x8xf32>
    %101 = arith.mulf %96, %100 : vector<8x8xf32>
    %102 = arith.truncf %101 : vector<8x8xf32> to vector<8x8xbf16>
    %cst_47 = arith.constant dense<0.000000e+00> : vector<8x8xf32>
    %103 = tpu.matmul %102, %88, %cst_47 {dimension_numbers = #tpu.dot_dimension_numbers<[1], [0], [0], [1], [0, 0, 1, 1], [], []>} : vector<8x8xbf16>, vector<8x8xbf16>, vector<8x8xf32> -> vector<8x8xf32>
    %104 = arith.truncf %103 : vector<8x8xf32> to vector<8x8xbf16>
    %c0_48 = arith.constant 0 : index
    %c16_49 = arith.constant 16 : index
    %105 = vector.load %arg25[%c0_48, %c16_49] : memref<8x32xbf16, #tpu.memory_space<vmem>>, vector<8x8xbf16>
    tpu.vector_store %arg25[%c0_48, %c16_49], %104 {strides = array<i32>} : memref<8x32xbf16, #tpu.memory_space<vmem>>, vector<8x8xbf16>,
    %106 = vector.extract_strided_slice %45 {offsets = [0, 24], sizes = [8, 8], strides = [1, 1]} : vector<8x32xbf16> to vector<8x8xbf16>
    %c0_50 = arith.constant 0 : index
    %c24 = arith.constant 24 : index
    %107 = vector.load %arg23[%c0_50, %c24] : memref<8x32xbf16, #tpu.memory_space<vmem>>, vector<8x8xbf16>
    %c0_51 = arith.constant 0 : index
    %c24_52 = arith.constant 24 : index
    %108 = vector.load %arg24[%c0_51, %c24_52] : memref<8x32xbf16, #tpu.memory_space<vmem>>, vector<8x8xbf16>
    %cst_53 = arith.constant dense<0.000000e+00> : vector<8x8xf32>
    %109 = tpu.matmul %106, %107, %cst_53 {dimension_numbers = #tpu.dot_dimension_numbers<[1], [1], [0], [0], [0, 0, 1, 0], [], []>} : vector<8x8xbf16>, vector<8x8xbf16>, vector<8x8xf32> -> vector<8x8xf32>
    %cst_54 = arith.constant 0.353553385 : f32
    %110 = vector.broadcast %cst_54 : f32 to vector<8x8xf32>
    %111 = arith.mulf %109, %110 : vector<8x8xf32>
    %cst_55 = arith.constant dense<0xFF800000> : vector<8xf32>
    %112 = vector.multi_reduction <maximumf>, %111, %cst_55 [1] : vector<8x8xf32> to vector<8xf32>
    %113 = vector.shape_cast %112 : vector<8xf32> to vector<8x1xf32>
    %114 = vector.broadcast %113 : vector<8x1xf32> to vector<8x8xf32>
    %115 = arith.subf %111, %114 : vector<8x8xf32>
    %116 = math.exp %115 : vector<8x8xf32>
    %cst_56 = arith.constant dense<0.000000e+00> : vector<8xf32>
    %117 = vector.multi_reduction <add>, %116, %cst_56 [1] : vector<8x8xf32> to vector<8xf32>
    %118 = vector.shape_cast %117 : vector<8xf32> to vector<8x1xf32>
    %119 = tpu.reciprocal %118 {approx = true} : vector<8x1xf32> -> vector<8x1xf32>
    %120 = vector.broadcast %119 : vector<8x1xf32> to vector<8x8xf32>
    %121 = arith.mulf %116, %120 : vector<8x8xf32>
    %122 = arith.truncf %121 : vector<8x8xf32> to vector<8x8xbf16>
    %cst_57 = arith.constant dense<0.000000e+00> : vector<8x8xf32>
    %123 = tpu.matmul %122, %108, %cst_57 {dimension_numbers = #tpu.dot_dimension_numbers<[1], [0], [0], [1], [0, 0, 1, 1], [], []>} : vector<8x8xbf16>, vector<8x8xbf16>, vector<8x8xf32> -> vector<8x8xf32>
    %124 = arith.truncf %123 : vector<8x8xf32> to vector<8x8xbf16>
    %c0_58 = arith.constant 0 : index
    %c24_59 = arith.constant 24 : index
    %125 = vector.load %arg25[%c0_58, %c24_59] : memref<8x32xbf16, #tpu.memory_space<vmem>>, vector<8x8xbf16>
    tpu.vector_store %arg25[%c0_58, %c24_59], %124 {strides = array<i32>} : memref<8x32xbf16, #tpu.memory_space<vmem>>, vector<8x8xbf16>,
    %c0_60 = arith.constant 0 : index
    %c0_61 = arith.constant 0 : index
    %126 = vector.load %arg25[%c0_60, %c0_61] : memref<8x32xbf16, #tpu.memory_space<vmem>>, vector<8x32xbf16>
    %c0_62 = arith.constant 0 : index
    %c0_63 = arith.constant 0 : index
    %127 = vector.load %arg14[%c0_62, %c0_63] : memref<32x32xbf16, #tpu.memory_space<vmem>>, vector<32x32xbf16>
    %cst_64 = arith.constant dense<0.000000e+00> : vector<8x32xf32>
    %128 = tpu.matmul %126, %127, %cst_64 {dimension_numbers = #tpu.dot_dimension_numbers<[1], [0], [0], [1], [0, 0, 1, 1], [], []>} : vector<8x32xbf16>, vector<32x32xbf16>, vector<8x32xf32> -> vector<8x32xf32>
    %c0_65 = arith.constant 0 : index
    %c0_66 = arith.constant 0 : index
    %129 = vector.load %arg15[%c0_65, %c0_66] : memref<1x32xf32, #tpu.memory_space<vmem>>, vector<1x32xf32>
    %130 = vector.shape_cast %129 : vector<1x32xf32> to vector<32xf32>
    %131 = vector.shape_cast %130 : vector<32xf32> to vector<1x32xf32>
    %132 = vector.broadcast %131 : vector<1x32xf32> to vector<8x32xf32>
    %133 = arith.addf %128, %132 : vector<8x32xf32>
    %134 = arith.addf %4, %133 : vector<8x32xf32>
    %c0_67 = arith.constant 0 : index
    %c0_68 = arith.constant 0 : index
    %135 = vector.load %arg16[%c0_67, %c0_68] : memref<1x32xf32, #tpu.memory_space<vmem>>, vector<1x32xf32>
    %136 = vector.shape_cast %135 : vector<1x32xf32> to vector<32xf32>
    %c0_69 = arith.constant 0 : index
    %c0_70 = arith.constant 0 : index
    %137 = vector.load %arg17[%c0_69, %c0_70] : memref<1x32xf32, #tpu.memory_space<vmem>>, vector<1x32xf32>
    %138 = vector.shape_cast %137 : vector<1x32xf32> to vector<32xf32>
    %cst_71 = arith.constant dense<0.000000e+00> : vector<8xf32>
    %139 = vector.multi_reduction <add>, %134, %cst_71 [1] : vector<8x32xf32> to vector<8xf32>
    %140 = vector.shape_cast %139 : vector<8xf32> to vector<8x1xf32>
    %cst_72 = arith.constant 3.200000e+01 : f32
    %141 = vector.broadcast %cst_72 : f32 to vector<8x1xf32>
    %142 = arith.divf %140, %141 : vector<8x1xf32>
    %143 = vector.broadcast %142 : vector<8x1xf32> to vector<8x32xf32>
    %144 = arith.subf %134, %143 : vector<8x32xf32>
    %145 = arith.mulf %144, %144 : vector<8x32xf32>
    %cst_73 = arith.constant dense<0.000000e+00> : vector<8xf32>
    %146 = vector.multi_reduction <add>, %145, %cst_73 [1] : vector<8x32xf32> to vector<8xf32>
    %147 = vector.shape_cast %146 : vector<8xf32> to vector<8x1xf32>
    %cst_74 = arith.constant 3.200000e+01 : f32
    %148 = vector.broadcast %cst_74 : f32 to vector<8x1xf32>
    %149 = arith.divf %147, %148 : vector<8x1xf32>
    %150 = vector.broadcast %142 : vector<8x1xf32> to vector<8x32xf32>
    %151 = arith.subf %134, %150 : vector<8x32xf32>
    %cst_75 = arith.constant 9.99999997E-7 : f32
    %152 = vector.broadcast %cst_75 : f32 to vector<8x1xf32>
    %153 = arith.addf %149, %152 : vector<8x1xf32>
    %154 = math.rsqrt %153 : vector<8x1xf32>
    %155 = vector.broadcast %154 : vector<8x1xf32> to vector<8x32xf32>
    %156 = arith.mulf %151, %155 : vector<8x32xf32>
    %157 = vector.shape_cast %136 : vector<32xf32> to vector<1x32xf32>
    %158 = vector.broadcast %157 : vector<1x32xf32> to vector<8x32xf32>
    %159 = arith.mulf %156, %158 : vector<8x32xf32>
    %160 = vector.shape_cast %138 : vector<32xf32> to vector<1x32xf32>
    %161 = vector.broadcast %160 : vector<1x32xf32> to vector<8x32xf32>
    %162 = arith.addf %159, %161 : vector<8x32xf32>
    %163 = arith.truncf %162 : vector<8x32xf32> to vector<8x32xbf16>
    %c0_76 = arith.constant 0 : index
    %c0_77 = arith.constant 0 : index
    %164 = vector.load %arg18[%c0_76, %c0_77] : memref<32x64xbf16, #tpu.memory_space<vmem>>, vector<32x64xbf16>
    %cst_78 = arith.constant dense<0.000000e+00> : vector<8x64xf32>
    %165 = tpu.matmul %163, %164, %cst_78 {dimension_numbers = #tpu.dot_dimension_numbers<[1], [0], [0], [1], [0, 0, 1, 1], [], []>} : vector<8x32xbf16>, vector<32x64xbf16>, vector<8x64xf32> -> vector<8x64xf32>
    %c0_79 = arith.constant 0 : index
    %c0_80 = arith.constant 0 : index
    %166 = vector.load %arg19[%c0_79, %c0_80] : memref<1x64xf32, #tpu.memory_space<vmem>>, vector<1x64xf32>
    %167 = vector.shape_cast %166 : vector<1x64xf32> to vector<64xf32>
    %168 = vector.shape_cast %167 : vector<64xf32> to vector<1x64xf32>
    %169 = vector.broadcast %168 : vector<1x64xf32> to vector<8x64xf32>
    %170 = arith.addf %165, %169 : vector<8x64xf32>
    %cst_81 = arith.constant 5.000000e-01 : f32
    %171 = vector.broadcast %cst_81 : f32 to vector<8x64xf32>
    %172 = arith.mulf %171, %170 : vector<8x64xf32>
    %cst_82 = arith.constant 0.707106769 : f32
    %173 = vector.broadcast %cst_82 : f32 to vector<8x64xf32>
    %174 = arith.mulf %170, %173 : vector<8x64xf32>
    %175 = math.erf %174 : vector<8x64xf32>
    %cst_83 = arith.constant 1.000000e+00 : f32
    %176 = vector.broadcast %cst_83 : f32 to vector<8x64xf32>
    %177 = arith.addf %176, %175 : vector<8x64xf32>
    %178 = arith.mulf %172, %177 : vector<8x64xf32>
    %179 = arith.truncf %178 : vector<8x64xf32> to vector<8x64xbf16>
    %c0_84 = arith.constant 0 : index
    %c0_85 = arith.constant 0 : index
    %180 = vector.load %arg20[%c0_84, %c0_85] : memref<64x32xbf16, #tpu.memory_space<vmem>>, vector<64x32xbf16>
    %cst_86 = arith.constant dense<0.000000e+00> : vector<8x32xf32>
    %181 = tpu.matmul %179, %180, %cst_86 {dimension_numbers = #tpu.dot_dimension_numbers<[1], [0], [0], [1], [0, 0, 1, 1], [], []>} : vector<8x64xbf16>, vector<64x32xbf16>, vector<8x32xf32> -> vector<8x32xf32>
    %c0_87 = arith.constant 0 : index
    %c0_88 = arith.constant 0 : index
    %182 = vector.load %arg21[%c0_87, %c0_88] : memref<1x32xf32, #tpu.memory_space<vmem>>, vector<1x32xf32>
    %183 = vector.shape_cast %182 : vector<1x32xf32> to vector<32xf32>
    %184 = vector.shape_cast %183 : vector<32xf32> to vector<1x32xf32>
    %185 = vector.broadcast %184 : vector<1x32xf32> to vector<8x32xf32>
    %186 = arith.addf %181, %185 : vector<8x32xf32>
    %187 = arith.addf %134, %186 : vector<8x32xf32>
    %c0_89 = arith.constant 0 : index
    %c0_90 = arith.constant 0 : index
    %c0_91 = arith.constant 0 : index
    %188 = vector.load %arg22[%c0_89, %c0_90, %c0_91] : memref<1x8x32xf32, #tpu.memory_space<vmem>>, vector<1x8x32xf32>
    %189 = vector.shape_cast %188 : vector<1x8x32xf32> to vector<8x32xf32>
    %190 = vector.shape_cast %187 : vector<8x32xf32> to vector<1x8x32xf32>
    tpu.vector_store %arg22[%c0_89, %c0_90, %c0_91], %190 {strides = array<i32>} : memref<1x8x32xf32, #tpu.memory_space<vmem>>, vector<1x8x32xf32>,
    return
  }
  func.func @transform_0(%arg0: i32, %arg1: i32) -> (i32, i32, i32) {
    %c0_i32 = arith.constant 0 : i32
    %c0_i32_0 = arith.constant 0 : i32
    return %arg0, %arg1, %c0_i32 : i32, i32, i32
  }
  func.func @transform_1(%arg0: i32, %arg1: i32) -> (i32, i32, i32) {
    %c0_i32 = arith.constant 0 : i32
    %c0_i32_0 = arith.constant 0 : i32
    %c0_i32_1 = arith.constant 0 : i32
    return %arg0, %c0_i32, %c0_i32_0 : i32, i32, i32
  }
  func.func @transform_2(%arg0: i32, %arg1: i32) -> (i32, i32, i32) {
    %c0_i32 = arith.constant 0 : i32
    %c0_i32_0 = arith.constant 0 : i32
    return %arg0, %arg1, %c0_i32 : i32, i32, i32
  }
  func.func @transform_3(%arg0: i32, %arg1: i32) -> (i32, i32, i32) {
    %c0_i32 = arith.constant 0 : i32
    %c0_i32_0 = arith.constant 0 : i32
    %c0_i32_1 = arith.constant 0 : i32
    return %arg0, %c0_i32, %c0_i32_0 : i32, i32, i32
  }
  func.func @transform_4(%arg0: i32, %arg1: i32) -> (i32, i32) {
    %c0_i32 = arith.constant 0 : i32
    %c0_i32_0 = arith.constant 0 : i32
    %c0_i32_1 = arith.constant 0 : i32
    return %c0_i32, %c0_i32_0 : i32, i32
  }
  func.func @transform_5(%arg0: i32, %arg1: i32) -> (i32, i32) {
    %c0_i32 = arith.constant 0 : i32
    %c0_i32_0 = arith.constant 0 : i32
    %c0_i32_1 = arith.constant 0 : i32
    return %c0_i32, %c0_i32_0 : i32, i32
  }
  func.func @transform_6(%arg0: i32, %arg1: i32) -> (i32, i32) {
    %c0_i32 = arith.constant 0 : i32
    %c0_i32_0 = arith.constant 0 : i32
    %c0_i32_1 = arith.constant 0 : i32
    return %c0_i32, %c0_i32_0 : i32, i32
  }
  func.func @transform_7(%arg0: i32, %arg1: i32) -> (i32, i32) {
    %c0_i32 = arith.constant 0 : i32
    %c0_i32_0 = arith.constant 0 : i32
    %c0_i32_1 = arith.constant 0 : i32
    return %c0_i32, %c0_i32_0 : i32, i32
  }
  func.func @transform_8(%arg0: i32, %arg1: i32) -> (i32, i32) {
    %c0_i32 = arith.constant 0 : i32
    %c0_i32_0 = arith.constant 0 : i32
    %c0_i32_1 = arith.constant 0 : i32
    return %c0_i32, %c0_i32_0 : i32, i32
  }
  func.func @transform_9(%arg0: i32, %arg1: i32) -> (i32, i32) {
    %c0_i32 = arith.constant 0 : i32
    %c0_i32_0 = arith.constant 0 : i32
    %c0_i32_1 = arith.constant 0 : i32
    return %c0_i32, %c0_i32_0 : i32, i32
  }
  func.func @transform_10(%arg0: i32, %arg1: i32) -> (i32, i32) {
    %c0_i32 = arith.constant 0 : i32
    %c0_i32_0 = arith.constant 0 : i32
    %c0_i32_1 = arith.constant 0 : i32
    return %c0_i32, %c0_i32_0 : i32, i32
  }
  func.func @transform_11(%arg0: i32, %arg1: i32) -> (i32, i32) {
    %c0_i32 = arith.constant 0 : i32
    %c0_i32_0 = arith.constant 0 : i32
    %c0_i32_1 = arith.constant 0 : i32
    return %c0_i32, %c0_i32_0 : i32, i32
  }
  func.func @transform_12(%arg0: i32, %arg1: i32) -> (i32, i32) {
    %c0_i32 = arith.constant 0 : i32
    %c0_i32_0 = arith.constant 0 : i32
    %c0_i32_1 = arith.constant 0 : i32
    return %c0_i32, %c0_i32_0 : i32, i32
  }
  func.func @transform_13(%arg0: i32, %arg1: i32) -> (i32, i32) {
    %c0_i32 = arith.constant 0 : i32
    %c0_i32_0 = arith.constant 0 : i32
    %c0_i32_1 = arith.constant 0 : i32
    return %c0_i32, %c0_i32_0 : i32, i32
  }
  func.func @transform_14(%arg0: i32, %arg1: i32) -> (i32, i32) {
    %c0_i32 = arith.constant 0 : i32
    %c0_i32_0 = arith.constant 0 : i32
    %c0_i32_1 = arith.constant 0 : i32
    return %c0_i32, %c0_i32_0 : i32, i32
  }
  func.func @transform_15(%arg0: i32, %arg1: i32) -> (i32, i32) {
    %c0_i32 = arith.constant 0 : i32
    %c0_i32_0 = arith.constant 0 : i32
    %c0_i32_1 = arith.constant 0 : i32
    return %c0_i32, %c0_i32_0 : i32, i32
  }
  func.func @transform_16(%arg0: i32, %arg1: i32) -> (i32, i32) {
    %c0_i32 = arith.constant 0 : i32
    %c0_i32_0 = arith.constant 0 : i32
    %c0_i32_1 = arith.constant 0 : i32
    return %c0_i32, %c0_i32_0 : i32, i32
  }
  func.func @transform_17(%arg0: i32, %arg1: i32) -> (i32, i32) {
    %c0_i32 = arith.constant 0 : i32
    %c0_i32_0 = arith.constant 0 : i32
    %c0_i32_1 = arith.constant 0 : i32
    return %c0_i32, %c0_i32_0 : i32, i32
  }
  func.func @transform_18(%arg0: i32, %arg1: i32) -> (i32, i32) {
    %c0_i32 = arith.constant 0 : i32
    %c0_i32_0 = arith.constant 0 : i32
    %c0_i32_1 = arith.constant 0 : i32
    return %c0_i32, %c0_i32_0 : i32, i32
  }
  func.func @transform_19(%arg0: i32, %arg1: i32) -> (i32, i32) {
    %c0_i32 = arith.constant 0 : i32
    %c0_i32_0 = arith.constant 0 : i32
    %c0_i32_1 = arith.constant 0 : i32
    return %c0_i32, %c0_i32_0 : i32, i32
  }
  func.func @transform_20(%arg0: i32, %arg1: i32) -> (i32, i32, i32) {
    %c0_i32 = arith.constant 0 : i32
    %c0_i32_0 = arith.constant 0 : i32
    return %arg0, %arg1, %c0_i32 : i32, i32, i32
  }
}

</mosaic_0001>

<bundles_post_ra>
// kernel: tpu_custom_call.1
= control target key start
LH: loop header
LB: loop body
LE: loop exit
PB: predicated region body
PF: predicated region fallthrough
CT: control target
= control target key end

     0   :  { %s3276_s0 = inlined_call_operand.vmem [shape: f32[2,8,32], index: 0, kind: input, shape index: {}]   ;;  %s3277_s1 = inlined_call_operand.vmem [shape: f32[2,8,32], index: 1, kind: input, shape index: {}]   ;;  %s3278_s2 = inlined_call_operand.vmem [shape: f32[2,8,1], index: 2, kind: input, shape index: {}]   ;;  %s3279_s3 = inlined_call_operand.vmem [shape: f32[2,8,1], index: 3, kind: input, shape index: {}]   ;;  %s3280_s4 = inlined_call_operand.hbm [shape: f32[1,32], index: 4, kind: input, shape index: {}]   ;;  %s3281_s5 = inlined_call_operand.hbm [shape: f32[1,32], index: 5, kind: input, shape index: {}]   ;;  %s3282_s6 = inlined_call_operand.vmem [shape: bf16[32,32], index: 6, kind: input, shape index: {}]   ;;  %s3283_s7 = inlined_call_operand.hbm [shape: f32[1,32], index: 7, kind: input, shape index: {}]   ;;  %s3284_s8 = inlined_call_operand.vmem [shape: bf16[32,32], index: 8, kind: input, shape index: {}]   ;;  %s3285_s9 = inlined_call_operand.vmem [shape: f32[1,32], index: 9, kind: input, shape index: {}]   ;;  %s3286_s10 = inlined_call_operand.vmem [shape: bf16[32,32], index: 10, kind: input, shape index: {}]   ;;  %s3287_s11 = inlined_call_operand.hbm [shape: f32[1,32], index: 11, kind: input, shape index: {}]   ;;  %s3288_s12 = inlined_call_operand.hbm [shape: bf16[32,32], index: 12, kind: input, shape index: {}]   ;;  %s3289_s13 = inlined_call_operand.hbm [shape: f32[1,32], index: 13, kind: input, shape index: {}]   ;;  %s3290_s14 = inlined_call_operand.hbm [shape: f32[1,32], index: 14, kind: input, shape index: {}]   ;;  %s3291_s15 = inlined_call_operand.hbm [shape: f32[1,32], index: 15, kind: input, shape index: {}]   ;;  %s3292_s16 = inlined_call_operand.vmem [shape: bf16[32,64], index: 16, kind: input, shape index: {}]   ;;  %s3293_s17 = inlined_call_operand.vmem [shape: f32[1,64], index: 17, kind: input, shape index: {}]   ;;  %s3294_s18 = inlined_call_operand.vmem [shape: bf16[64,32], index: 18, kind: input, shape index: {}]   ;;  %s3295_s19 = inlined_call_operand.vmem [shape: f32[1,32], index: 19, kind: input, shape index: {}]   ;;  %s3296_s20 = inlined_call_operand.hbm [shape: f32[2,8,32], index: 20, kind: output, shape index: {}]  }
   0x1   :  { %3309 = sst [smem:[#allocation33_spill]] %s3276_s0 }
   0x2   :  { %3310 = sst [smem:[#allocation34_spill]] %s3277_s1 }
   0x3   :  { %3311 = sst [smem:[#allocation35_spill]] %s3278_s2 }
   0x4   :  { %3312 = sst [smem:[#allocation36_spill]] %s3279_s3 }
   0x5   :  { %3313 = sst [smem:[#allocation37_spill]] %s3280_s4 }
   0x6   :  { %3314 = sst [smem:[#allocation38_spill]] %s3281_s5 }
   0x7   :  { %3315 = sst [smem:[#allocation39_spill]] %s3283_s7 }
   0x8   :  { %3316 = sst [smem:[#allocation40_spill]] %s3296_s20 }
   0x9   :  { %25 = vsyncpa [#allocation6], 0 }
   0xa   :  { %26 = vsyncpa [#allocation9], 0 }
   0xb   :  { %27 = vsyncpa [#allocation12], 0 }
   0xc   :  { %28 = vsyncpa [#allocation15], 0 }
   0xd   :  { %29 = vsyncpa [#allocation18], 0 }
   0xe   :  { %30 = vsyncpa [#allocation7], 0 }
   0xf   :  { %32 = vsyncpa [#allocation7 + $0x1], 0  ;;  %s2900_s1 = smov 0   ;;  %s2902_s22 = smov 0  }
  0x10   :  { %s2904_s23 = smov 0   ;;  %s2906_s24 = smov 0  }
  0x11   :  { %s2908_s2 = smov 0   ;;  %s2910_s25 = smov 0  }
  0x12 LB: > { %3317 = sst [smem:[#allocation26_spill]] %s2753_s1  ;;  %s2058_s3 = sadd.s32 4294967295, %s2773_s25   ;;  %s2773_s25 = sphi %s2910_s25, %s38_s25   ;;  %s2769_s2 = sphi %s2908_s2, %s3348_s2   ;;  %s2765_s24 = sphi %s2906_s24, %s3347_s24   ;;  %s2761_s23 = sphi %s2904_s23, %s3346_s23   ;;  %s2757_s22 = sphi %s2902_s22, %s3350_s22   ;;  %s2753_s1 = sphi %s2900_s1, %s3349_s1  }
  0x13   : > { %3318 = sst [smem:[#allocation27_spill]] %s2761_s23  ;;  %s2059_s26 = sadd.s32 4294967294, %s2773_s25  }
  0x14   : > { %3319 = sst [smem:[#allocation28_spill]] %s2769_s2  ;;  %s50_s27 = sadd.s32 1, %s2769_s2 }
  0x15   : > { %3320 = sst [smem:[#allocation29_spill]] %s2773_s25  ;;  %s503_s28 = sadd.s32 1, %s2761_s23 }
  0x16   : > { %p52_p0 = scmp.ge.s32.totalorder %s50_s27, 2  ;;  %p513_p1 = scmp.ne.s32.totalorder %s2761_s23, %s2757_s22 }
  0x17   : > { %p514_p2 = scmp.eq.s32.totalorder %s2058_s3, 1  ;;  %p519_p3 = scmp.ne.s32.totalorder %s2757_s22, %s2753_s1 }
  0x18   : > { %s3352_s27 = smov (%p52_p0, %s50_s27), 0  ;;  %p520_p5 = scmp.eq.s32.totalorder %s2059_s26, 1 }
  0x19   : > { %3321 = sst [smem:[#allocation30_spill]] %s3352_s27  ;;  %p2940_p4 = por %p514_p2, %p513_p1 }
  0x1a   : > { %s498_s29 = ssub.s32 %s2769_s2, %s3352_s27  ;;  %p2060_p6 = scmp.ge.s32.totalorder %s2773_s25, 1 }
  0x1b   : > { %s3322_s4 = scalar_select %p2940_p4, 1, 0 }
  0x1c   : > { %p501_p7 = scmp.eq.s32.totalorder %s498_s29, 0  ;;  %p2947_p8 = por %p520_p5, %p519_p3 }
  0x1d   : > { %p527_p9 = scmp.lt.s32.totalorder %s2773_s25, 3  ;;  %p2959_p11 = scmp.eq.s32.totalorder %s2058_s3, 0 }
  0x1e   : > { %s3323_s30 = scalar_select %p2947_p8, 1, 0 }
  0x1f   : > { %s2953_s0 = scalar_select %p501_p7, %s2761_s23, %s503_s28  }
  0x20   : > { %3324 = sst [smem:[#allocation31_spill]] %s3323_s30  ;;  %p2955_p10 = pnand %p2060_p6, %p527_p9 }
  0x21   : > { %3325 = sst [smem:[#allocation32_spill]] %s2953_s0  ;;  %s2775_s26 = smov [#allocation8]  }
  0x22   : > { %s3326_s21 = scalar_select %p2955_p10, 1, 0 }
  0x23   : > { %s3327_s1 = scalar_select %p2959_p11, 1, 0 }
  0x24   : > { %p2310_p12 = pneg %p2955_p10  ;;  %s551_s29 = sshll.u32 %s2775_s26, 4  ;;  %s552_s29 = int_to_ptr.vmem [resolvable:$true] %s551_s29 }
  0x25   : > { %s2776_s27 = smov [#allocation11]   ;;  %s2777_s0 = smov [#allocation14]  }
  0x26   : > { %s585_s2 = sshll.u32 %s2776_s27, 4  ;;  %p2967_p13 = pnand %p2959_p11, %p2310_p12  ;;  %s586_s2 = int_to_ptr.vmem [resolvable:$true] %s585_s2 }
  0x27   : > { %s609_s3 = sshll.u32 %s2777_s0, 4  ;;  %s2480_s30 = scalar_lea.vmem %s552_s29, 16  ;;  %s610_s3 = int_to_ptr.vmem [resolvable:$true] %s609_s3 }
  0x28   : > { %p2973_p0 = pneg %p2967_p13  ;;  %p2481_p1 = scmp.ne.s32.totalorder %s552_s29, %s2480_s30 }
  0x29   : > { %s2487_s27 = scalar_lea.vmem %s552_s29, 32  ;;  %p2488_p5 = scmp.lt.s32.totalorder %s552_s29, %s552_s29 }
  0x2a   : > { %p2483_p2 = pnand %p2481_p1, %p2973_p0  ;;  %p2489_p6 = scmp.lt.s32.totalorder %s2487_s27, %s2480_s30 }
  0x2c   : > { %p2484_p3 = pneg %p2483_p2  ;;  %p2490_p7 = por %p2489_p6, %p2488_p5 }
  0x2e   : > { %p2491_p9 = pnand %p2490_p7, %p2484_p3 }
  0x30   : > { %2494 = shalt.err (!%p2491_p9)
}
  0x31   : > { %s3330_s5 = sld [smem:[#allocation38_spill]]  ;;  %s2506_s25 = scalar_lea.vmem %s586_s2, 16 }
  0x32   : > { %p2507_p12 = scmp.ne.s32.totalorder %s586_s2, %s2506_s25  ;;  %s2513_s20 = scalar_lea.vmem %s586_s2, 32 }
  0x33   : > { %p2514_p1 = scmp.lt.s32.totalorder %s586_s2, %s586_s2  ;;  %p2515_p2 = scmp.lt.s32.totalorder %s2513_s20, %s2506_s25 }
  0x34   : > { %p2509_p8 = pnand %p2507_p12, %p2973_p0 }
  0x35   : > { %p2516_p11 = por %p2515_p2, %p2514_p1 }
  0x36   : > { %p2510_p4 = pneg %p2509_p8 }
  0x37   : > { %2316 = dma.hbm_to_vmem [thread:$0]  (!%p2967_p13), %s3330_s5, 16, %s552_s29, [#allocation9]  }
  0x38   : > { %p2517_p10 = pnand %p2516_p11, %p2510_p4 }
  0x3a   : > { %2520 = shalt.err (!%p2517_p10)
}
  0x3b   : > { %2322 = dma.hbm_to_vmem [thread:$0]  (!%p2967_p13), %s3287_s11, 16, %s586_s2, [#allocation12]  }
  0x3c   : > { %s2532_s29 = scalar_lea.vmem %s610_s3, 16  ;;  %s2539_s0 = scalar_lea.vmem %s610_s3, 32 }
  0x3d   : > { %p2533_p3 = scmp.ne.s32.totalorder %s610_s3, %s2532_s29  ;;  %p2540_p8 = scmp.lt.s32.totalorder %s610_s3, %s610_s3 }
  0x3e   : > { %p2541_p7 = scmp.lt.s32.totalorder %s2539_s0, %s2532_s29 }
  0x3f   : > { %p2535_p5 = pnand %p2533_p3, %p2973_p0 }
  0x40   : > { %p2542_p9 = por %p2541_p7, %p2540_p8 }
  0x41   : > { %p2536_p6 = pneg %p2535_p5 }
  0x43   : > { %p2543_p12 = pnand %p2542_p9, %p2536_p6 }
  0x45   : > { %2546 = shalt.err (!%p2543_p12)
}
  0x46   : > { %2328 = dma.hbm_to_vmem [thread:$0]  (!%p2967_p13), %s3289_s13, 16, %s610_s3, [#allocation15]  }
  0x47   : > { %s2778_s2 = smov [#allocation5]   ;;  %s2779_s30 = smov [#allocation10]  }
  0x48   : > { %s540_s26 = sshll.u32 %s2778_s2, 4  ;;  %s565_s27 = sshll.u32 %s2779_s30, 4  ;;  %s541_s26 = int_to_ptr.vmem [resolvable:$true] %s540_s26  ;;  %s566_s27 = int_to_ptr.vmem [resolvable:$true] %s565_s27 }
  0x49   : > { %s2558_s5 = scalar_lea.vmem %s541_s26, 16  ;;  %s2565_s29 = scalar_lea.vmem %s541_s26, 32 }
  0x4a   : > { %p2559_p4 = scmp.ne.s32.totalorder %s541_s26, %s2558_s5  ;;  %p2566_p1 = scmp.lt.s32.totalorder %s541_s26, %s541_s26 }
  0x4b   : > { %p2567_p2 = scmp.lt.s32.totalorder %s2565_s29, %s2558_s5 }
  0x4c   : > { %p2561_p10 = pnand %p2559_p4, %p2973_p0 }
  0x4d   : > { %p2568_p3 = por %p2567_p2, %p2566_p1 }
  0x4e   : > { %p2562_p11 = pneg %p2561_p10 }
  0x50   : > { %p2569_p5 = pnand %p2568_p3, %p2562_p11 }
  0x52   : > { %2572 = shalt.err (!%p2569_p5)
}
  0x53   : > { %s3331_s20 = sld [smem:[#allocation37_spill]]  ;;  %s2584_s25 = scalar_lea.vmem %s566_s27, 16 }
  0x54   : > { %p2585_p6 = scmp.ne.s32.totalorder %s566_s27, %s2584_s25  ;;  %s2591_s2 = scalar_lea.vmem %s566_s27, 32 }
  0x55   : > { %p2592_p9 = scmp.lt.s32.totalorder %s566_s27, %s566_s27  ;;  %p2593_p12 = scmp.lt.s32.totalorder %s2591_s2, %s2584_s25 }
  0x56   : > { %p2587_p8 = pnand %p2585_p6, %p2973_p0 }
  0x57   : > { %p2594_p4 = por %p2593_p12, %p2592_p9 }
  0x58   : > { %p2588_p7 = pneg %p2587_p8 }
  0x59   : > { %2313 = dma.hbm_to_vmem [thread:$0]  (!%p2967_p13), %s3331_s20, 16, %s541_s26, [#allocation6]  }
  0x5a   : > { %p2595_p10 = pnand %p2594_p4, %p2588_p7 }
  0x5c   : > { %2598 = shalt.err (!%p2595_p10)
}
  0x5d   : > { %s3332_s7 = sld [smem:[#allocation39_spill]]  ;;  %s2780_s29 = smov [#allocation13]  }
  0x5e   : > { %s595_s26 = sshll.u32 %s2780_s29, 4  ;;  %s596_s26 = int_to_ptr.vmem [resolvable:$true] %s595_s26 }
  0x5f   : > { %s2610_s3 = scalar_lea.vmem %s596_s26, 256  ;;  %p2618_p3 = scmp.lt.s32.totalorder %s596_s26, %s596_s26 }
  0x60   : > { %p2611_p11 = scmp.ne.s32.totalorder %s596_s26, %s2610_s3  ;;  %p2619_p5 = scmp.lt.s32.totalorder %s2610_s3, %s2610_s3 }
  0x62   : > { %p2613_p1 = pnand %p2611_p11, %p2973_p0  ;;  %p2620_p6 = por %p2619_p5, %p2618_p3 }
  0x63   : > { %2319 = dma.hbm_to_vmem [thread:$0]  (!%p2967_p13), %s3332_s7, 16, %s566_s27, [#allocation9]  }
  0x64   : > { %p2614_p2 = pneg %p2613_p1 }
  0x66   : > { %p2621_p8 = pnand %p2620_p6, %p2614_p2 }
  0x68   : > { %2624 = shalt.err (!%p2621_p8)
}
  0x69   : > { %s2781_s0 = smov 64   ;;  %s2782_s20 = smov 4  }
  0x6a   : > { %2325 = dma.hbm_to_vmem [thread:$0]  (!%p2967_p13), %s3288_s12, 256, %s596_s26, [#allocation12], %s2781_s0, %s2781_s0, %s2782_s20  }
  0x6b   : > { %s2783_s2 = smov [#allocation16]   ;;  %s2784_s30 = smov [#allocation17]  }
  0x6c   : > { %s620_s5 = sshll.u32 %s2783_s2, 4  ;;  %s631_s29 = sshll.u32 %s2784_s30, 4  ;;  %s621_s5 = int_to_ptr.vmem [resolvable:$true] %s620_s5  ;;  %s632_s29 = int_to_ptr.vmem [resolvable:$true] %s631_s29 }
  0x6d   : > { %s2636_s7 = scalar_lea.vmem %s621_s5, 16  ;;  %s2643_s3 = scalar_lea.vmem %s621_s5, 32 }
  0x6e   : > { %p2637_p7 = scmp.ne.s32.totalorder %s621_s5, %s2636_s7  ;;  %p2644_p4 = scmp.lt.s32.totalorder %s621_s5, %s621_s5 }
  0x6f   : > { %p2645_p10 = scmp.lt.s32.totalorder %s2643_s3, %s2636_s7 }
  0x70   : > { %p2639_p9 = pnand %p2637_p7, %p2973_p0 }
  0x71   : > { %p2646_p11 = por %p2645_p10, %p2644_p4 }
  0x72   : > { %p2640_p12 = pneg %p2639_p9 }
  0x74   : > { %p2647_p1 = pnand %p2646_p11, %p2640_p12 }
  0x76   : > { %2650 = shalt.err (!%p2647_p1)
}
  0x77   : > { %2331 = dma.hbm_to_vmem [thread:$0]  (!%p2967_p13), %s3290_s14, 16, %s621_s5, [#allocation15]  }
  0x78   : > { %s2662_s0 = scalar_lea.vmem %s632_s29, 16  ;;  %s2669_s20 = scalar_lea.vmem %s632_s29, 32 }
  0x79   : > { %p2663_p2 = scmp.ne.s32.totalorder %s632_s29, %s2662_s0  ;;  %p2670_p6 = scmp.lt.s32.totalorder %s632_s29, %s632_s29 }
  0x7a   : > { %p2671_p8 = scmp.lt.s32.totalorder %s2669_s20, %s2662_s0 }
  0x7b   : > { %p2665_p3 = pnand %p2663_p2, %p2973_p0 }
  0x7c   : > { %p2672_p7 = por %p2671_p8, %p2670_p6 }
  0x7d   : > { %p2666_p5 = pneg %p2665_p3 }
  0x7f   : > { %p2673_p9 = pnand %p2672_p7, %p2666_p5 }
  0x81   : > { %2676 = shalt.err (!%p2673_p9)
}
  0x82   : > { %2334 = dma.hbm_to_vmem [thread:$0]  (!%p2967_p13), %s3291_s15, 16, %s632_s29, [#allocation18]  }
  0x83   : > { %p3333_p12 = scmp.ne.s32.totalorder %s3326_s21, 0 }
  0x84   : > { %p3334_p4 = scmp.ne.s32.totalorder (!%p3333_p12), %s3327_s1, 0 }
  0x85   : > { %690 = sbr.rel (%p3333_p12) target bundleno = 2612 (0xa34), region = 100 }
  0x8a   : > { %2728 = dma.done.wait (%p3334_p4), [#allocation6], 16  }
  0x8b   : > { %2730 = vsyncadd (%p3334_p4), [#allocation6], 4294967280 }
  0x8c   : > { %2732 = dma.done.wait (%p3334_p4), [#allocation9], 32  }
  0x8d   : > { %2734 = vsyncadd (%p3334_p4), [#allocation9], 4294967264 }
  0x8e   : > { %2736 = dma.done.wait (%p3334_p4), [#allocation12], 272  }
  0x8f   : > { %2738 = vsyncadd (%p3334_p4), [#allocation12], 4294967024 }
  0x90   : > { %2740 = dma.done.wait (%p3334_p4), [#allocation15], 32  }
  0x91   : > { %2742 = vsyncadd (%p3334_p4), [#allocation15], 4294967264 }
  0x92   : > { %2744 = dma.done.wait (%p3334_p4), [#allocation18], 16  }
  0x93   : > { %2746 = vsyncadd (%p3334_p4), [#allocation18], 4294967280  ;;  %p793_p13 = scmp.lt.s32.totalorder %s2765_s24, 1  ;;  %s3335_s5 = sld [smem:[#allocation34_spill]]  ;;  %vm824_vm0 = vcmask 261120   ;;  %v2425_v14 = vld [vmem:[%s3284_s8 + $0x8] sm:$0xff]  }
  0x94   : > { %s3336_s25 = sld [smem:[#allocation33_spill]]  ;;  %v2426_v15 = vld [vmem:[%s3286_s10 + $0x8] sm:$0xff]   ;;  %v2785_v16 = vmov 0.0   ;;  %v2427_v17 = vld [vmem:[%s3284_s8] sm:$0xff]   ;;  %vm2786_vm1 = vmmov 0   ;;  %v2787_v19 = vmov 0  }
  0x95   : > { %s794_s23 = scalar_select %p793_p13, %s2765_s24, 1  ;;  %2176 = vmatprep.subr.bf16.mxu0 %v2785_v16  ;;  %2184 = vmatprep.subr.bf16.mxu1 %v2785_v16  ;;  %v2428_v18 = vld [vmem:[%s3286_s10] sm:$0xff]   ;;  %v2084_v29 = vld [vmem:[#allocation5] ss:$0 sm:$0xff]  ;;  %v2085_v31 = vld [vmem:[#allocation8] ss:$0 sm:$0xff] }
  0x96   : > { %2177 = vmatpush3.bf16.msra.mxu0 %v2425_v14  ;;  %2185 = vmatpush3.bf16.msra.mxu1 %v2426_v15  ;;  %s3337_s29 = sld [smem:[#allocation36_spill]]  ;;  %v2429_v36 = vld [vmem:[%s3282_s6 + $0x8] sm:$0xff]   ;;  %v2430_v39 = vld [vmem:[%s3282_s6] sm:$0xff]   ;;  %v2090_v43 = vld [vmem:[#allocation11] ss:$0 sm:$0xff]  ;;  %vm990_vm2 = vcmask 257024  }
  0x97   : > { %s3057_s21 = sshll.u32 %s794_s23, 3  ;;  %2178 = vmatprep.subr.bf16.mxu0 %v2785_v16  ;;  %2186 = vmatprep.subr.bf16.mxu1 %v2785_v16  ;;  %s3338_s1 = sld [smem:[#allocation35_spill]]  ;;  %v2086_v42 = vld [vmem:[%s3285_s9] ss:$0 sm:$0xff]  ;;  %v2096_v59 = vld [vmem:[#allocation10] ss:$0 sm:$0xff] }
  0x98   : > { %2180 = vmatprep.mubr.msk.bf16.mxu0 %vm2786_vm1, %v2785_v16  ;;  %2188 = vmatprep.mubr.msk.bf16.mxu1 %vm2786_vm1, %v2785_v16  ;;  %vm1104_vm3 = vcmask 64512   ;;  %vm1167_vm4 = vcmask 1043456   ;;  %s2788_s2 = smov 120   ;;  %vm1212_vm5 = vcmask 60416   ;;  %vm1341_vm6 = vcmask 126016   ;;  %s3339_s28 = sld [smem:[#allocation40_spill]] }
  0x99   : > { %s803_s30 = scalar_lea.vmem %s3335_s5, %s3057_s21  ;;  %2423 = vset.pattern.permute.xlu0 %v2787_v19  ;;  %2424 = vset.pattern.permute.xlu1 %v2787_v19  ;;  %s2789_s5 = smov 112   ;;  %vm1469_vm7 = vcmask 191616   ;;  %vm1597_vm8 = vcmask 257216   ;;  %vm1808_vm9 = vcmask 523264  }
  0x9a   : > { %s799_s26 = scalar_lea.vmem %s3336_s25, %s3057_s21  ;;  %v820_v0 = vld [vmem:[%s803_s30] sm:$0xff]  ;;  %2179 = vmatpush3.bf16.msra.mxu0 %v2427_v17  ;;  %2187 = vmatpush3.bf16.msra.mxu1 %v2428_v18  ;;  %s2790_s30 = smov 104  }
  0x9b   : > { %v3067_v1 = vld [vmem:[%s799_s26] sm:$0xff]  ;;  %v825_v2 = vsel %vm824_vm0, %v820_v0, 0.0  ;;  %2192 = vmatprep.subr.bf16.mxu0 %v2785_v16  ;;  %2200 = vmatprep.subr.bf16.mxu1 %v2785_v16  ;;  %s2793_s25 = smov 24   ;;  %p3340_p10 = scmp.ne.s32.totalorder %s3322_s4, 0 }
  0x9c   : > { %v1000_v3 = vsel %vm824_vm0, %v3067_v1, 0.0  ;;  %826 = vadd.xlane.f32.xlu0 %v825_v2  ;;  %s814_s3 = scalar_lea.vmem %s3337_s29, %s3057_s21  ;;  %s2791_s29 = smov 8  }
  0x9d   : > { %s810_s0 = scalar_lea.vmem %s3338_s1, %s3057_s21  ;;  %v821_v20 = vld [vmem:[%s814_s3] sm:$0xff]  ;;  %s2792_s3 = smov 16  }
  0x9e   : > { %v996_v21 = vld [vmem:[%s810_s0] sm:$0xff]  ;;  %s2134_s21 = sshll.u32 %s2765_s24, 7 }
  0xa0   : > { %1001 = vadd.xlane.f32.xlu0 %v1000_v3 }
  0xb6   : > { %985 = vperm.xlu0 %2423, %v821_v20  }
 0x125   : > { %v827_v4 = vpop.xlane.xlu0 %826 }
 0x126   : > { %v829_v5 = vmul.f32 0.03125, %v827_v4 }
 0x128   : > { %v830_v6 = vsub.f32 %v820_v0, %v829_v5 }
 0x129   : > { %v1002_v7 = vpop.xlane.xlu0 %1001 }
 0x12a   : > { %v1004_v8 = vmul.f32 0.03125, %v1002_v7  ;;  %v831_v9 = vmul.f32 %v830_v6, %v830_v6 }
 0x12c   : > { %v1005_v10 = vsub.f32 %v3067_v1, %v1004_v8  ;;  %v832_v11 = vsel %vm824_vm0, %v831_v9, 0.0 }
 0x12d   : > { %833 = vadd.xlane.f32.xlu1 %v832_v11 }
 0x12e   : > { %v1006_v12 = vmul.f32 %v1005_v10, %v1005_v10 }
 0x130   : > { %v1007_v13 = vsel %vm824_vm0, %v1006_v12, 0.0 }
 0x131   : > { %1008 = vadd.xlane.f32.xlu1 %v1007_v13  ;;  %v986_v44 = vpop.permute.xlu0 %985 }
 0x142   : > { %1097 = vperm.xlu1 %2424, %v996_v21  }
 0x1b6   : > { %v834_v22 = vpop.xlane.xlu1 %833 }
 0x1b7   : > { %v835_v23 = vmul.f32 0.03125, %v834_v22 }
 0x1b9   : > { %v836_v24 = vadd.f32 1e-06, %v835_v23 }
 0x1ba   : > { %v1009_v25 = vpop.xlane.xlu1 %1008 }
 0x1bb   : > { %2445 = vrsqrt.f32 %v836_v24  ;;  %v1010_v26 = vmul.f32 0.03125, %v1009_v25 }
 0x1bd   : > { %v1011_v27 = vadd.f32 1e-06, %v1010_v26 }
 0x1be   : > { %v1098_v63 = vpop.permute.xlu1 %1097 }
 0x1bf   : > { %2447 = vrsqrt.f32 %v1011_v27 }
 0x1c8   : > { %v2446_v28 = vpop.eup %2445 }
 0x1c9   : > { %v838_v30 = vmul.f32 %v2446_v28, %v830_v6 }
 0x1cb   : > { %v845_v32 = vmul.f32 %v2084_v29, %v838_v30 }
 0x1cc   : > { %v2448_v33 = vpop.eup %2447 }
 0x1cd   : > { %v1013_v34 = vmul.f32 %v2448_v33, %v1005_v10  ;;  %v852_v35 = vadd.f32 %v2085_v31, %v845_v32 }
 0x1cf   : > { %v853_v37 = vpack.c.bf16 %v852_v35, %v852_v35  ;;  %v1020_v38 = vmul.f32 %v2084_v29, %v1013_v34 }
 0x1d1   : > { %2181 = vmatmul.mubr.msk.bf16.vlgmr.msra.gmra.mxu0 %vm824_vm0, %v853_v37  ;;  %2189 = vmatmul.mubr.msk.bf16.vlgmr.msra.gmra.mxu1 %vm824_vm0, %v853_v37  ;;  %v1027_v40 = vadd.f32 %v2085_v31, %v1020_v38 }
 0x1d2   : > { %2193 = vmatpush3.bf16.msra.mxu0 %v2429_v36  ;;  %2196 = vmatprep.mubr.msk.bf16.mxu0 %vm2786_vm1, %v2785_v16 }
 0x1d3   : > { %2194 = vmatprep.subr.bf16.mxu0 %v2785_v16  ;;  %2202 = vmatprep.mubr.msk.bf16.mxu1 %vm2786_vm1, %v2785_v16  ;;  %v1028_v41 = vpack.c.bf16 %v1027_v40, %v1027_v40 }
 0x1d6   : > { %2195 = vmatpush3.bf16.msra.mxu0 %v2430_v39 }
 0x1d7   : > { %2206 = vmatprep.subr.bf16.mxu0 %v2785_v16 }
 0x1d9   : > { %2197 = vmatmul.mubr.msk.bf16.vlgmr.msra.gmra.mxu0 %vm824_vm0, %v1028_v41 }
 0x1da   : > { %2208 = vmatprep.mubr.msk.bf16.mxu0 %vm2786_vm1, %v2785_v16 }
 0x291   : > { %v914_v45 = vpop.f32.mrf.mxu0  ;;  %v977_v46 = vpop.f32.mrf.mxu1 }
 0x292   : > { %v915_v47 = vadd.f32 %v2086_v42, %v914_v45  ;;  %v978_v48 = vadd.f32 %v2090_v43, %v977_v46 }
 0x293   : > { %v2182_v49 = vpop.f32.mrf.mxu0  ;;  %v2190_v50 = vpop.f32.mrf.mxu1 }
 0x294   : > { %v988_v51 = vmul.f32 %v986_v44, %v915_v47  ;;  %v992_v52 = vmul.f32 %v986_v44, %v978_v48 }
 0x295   : > { %v917_v53 = vpop.f32.mrf.mxu0  ;;  %v980_v54 = vpop.f32.mrf.mxu1 }
 0x296   : > { %v989_v55 = vpack.c.bf16 %v988_v51, %v988_v51  ;;  %v993_v56 = vpack.c.bf16 %v992_v52, %v992_v52 }
 0x297   : > { %v2183_v57 = vpop.f32.mrf.mxu0  ;;  %v2191_v58 = vpop.f32.mrf.mxu1 }
 0x298   : > { %991 = vst.msk [vmem:[#allocation2] sm:$0xf] %vm990_vm2, %v989_v55  ;;  %994 = vst.msk [vmem:[#allocation3] sm:$0xf] %vm990_vm2, %v993_v56 }
 0x299   : > { %v1089_v60 = vpop.f32.mrf.mxu0 }
 0x29a   : > { %v1090_v62 = vadd.f32 %v2096_v59, %v1089_v60 }
 0x29b   : > { %v2198_v61 = vpop.f32.mrf.mxu0 }
 0x29c   : > { %v1100_v5 = vmul.f32 %v1098_v63, %v1090_v62 }
 0x29d   : > { %v1092_v0 = vpop.f32.mrf.mxu0 }
 0x29e   : > { %v1101_v9 = vpack.c.bf16 %v1100_v5, %v1100_v5 }
 0x29f   : > { %v2199_v2 = vpop.f32.mrf.mxu0  ;;  %v1102_v3 = vld [vmem:[#allocation2] sm:$0xf]  ;;  %v1103_v4 = vld [vmem:[#allocation3] sm:$0xf] }
 0x2a0   : > { %v1109_v6 = vsel %vm1104_vm3, %v1102_v3, 0  ;;  %v1169_v7 = vsel %vm1167_vm4, %v1103_v4, 0  ;;  %v2431_v8 = vld [vmem:[#allocation2] ss:$0 sps:$4 sm:$0xff]   ;;  %v2434_v61 = vld [vmem:[#allocation3] ss:$0 sps:$4 sm:$0xff]  }
 0x2a1   : > { %2201 = vmatpush3.bf16.xpose.msra.mxu1 %v1109_v6  ;;  %2207 = vmatpush3.bf16.msra.mxu0 %v1169_v7  ;;  %v2432_v10 = vld [vmem:[#allocation2] ss:$0 sps:$4 sm:$0xff]   ;;  %v2435_v2 = vld [vmem:[#allocation3] ss:$0 sps:$4 sm:$0xff]  }
 0x2a2   : > { %1222 = vrot.lane.b32.xlu1 %v2431_v8, %s2788_s2  ;;  %2212 = vmatprep.subr.bf16.mxu1 %v2785_v16  ;;  %v2433_v11 = vld [vmem:[#allocation2] ss:$0 sps:$4 sm:$0xff]  }
 0x2a3   : > { %2218 = vmatprep.subr.bf16.mxu0 %v2785_v16 }
 0x2a6   : > { %1217 = vrot.lane.b32.xlu1 %v1101_v9, %s2788_s2 }
 0x2a8   : > { %2203 = vmatmul.mubr.msk.bf16.vlgmr.msra.gmra.mxu1 %vm1104_vm3, %v1101_v9 }
 0x2a9   : > { %2214 = vmatprep.mubr.msk.bf16.mxu1 %vm2786_vm1, %v2785_v16 }
 0x2aa   : > { %1350 = vrot.lane.b32.xlu1 %v2432_v10, %s2789_s5 }
 0x2ae   : > { %1345 = vrot.lane.b32.xlu1 %v1101_v9, %s2789_s5 }
 0x2b2   : > { %1478 = vrot.lane.b32.xlu1 %v2433_v11, %s2790_s30 }
 0x2b6   : > { %1473 = vrot.lane.b32.xlu1 %v1101_v9, %s2790_s30  ;;  %v2436_v9 = vld [vmem:[#allocation3] ss:$0 sps:$4 sm:$0xff]  }
 0x314   : > { %v1223_v12 = vpop.permute.xlu1 %1222 }
 0x315   : > { %v1228_v13 = vsel %vm1104_vm3, %v1223_v12, 0 }
 0x316   : > { %2213 = vmatpush3.bf16.xpose.msra.mxu1 %v1228_v13 }
 0x317   : > { %2224 = vmatprep.subr.bf16.mxu1 %v2785_v16 }
 0x318   : > { %v1218_v14 = vpop.permute.xlu1 %1217 }
 0x31c   : > { %v1351_v15 = vpop.permute.xlu1 %1350 }
 0x31d   : > { %v1356_v17 = vsel %vm1104_vm3, %v1351_v15, 0  ;;  %2215 = vmatmul.mubr.msk.bf16.vlgmr.msra.gmra.mxu1 %vm1104_vm3, %v1218_v14 }
 0x31e   : > { %2225 = vmatpush3.bf16.xpose.msra.mxu1 %v1356_v17  ;;  %2226 = vmatprep.mubr.msk.bf16.mxu1 %vm2786_vm1, %v2785_v16 }
 0x31f   : > { %2236 = vmatprep.subr.bf16.mxu1 %v2785_v16 }
 0x320   : > { %v1346_v18 = vpop.permute.xlu1 %1345 }
 0x324   : > { %v1479_v19 = vpop.permute.xlu1 %1478 }
 0x325   : > { %v1484_v20 = vsel %vm1104_vm3, %v1479_v19, 0  ;;  %2227 = vmatmul.mubr.msk.bf16.vlgmr.msra.gmra.mxu1 %vm1104_vm3, %v1346_v18 }
 0x326   : > { %2237 = vmatpush3.bf16.xpose.msra.mxu1 %v1484_v20  ;;  %2238 = vmatprep.mubr.msk.bf16.mxu1 %vm2786_vm1, %v2785_v16 }
 0x327   : > { %2248 = vmatprep.subr.bf16.mxu1 %v2785_v16 }
 0x328   : > { %v1474_v21 = vpop.permute.xlu1 %1473 }
 0x32d   : > { %2239 = vmatmul.mubr.msk.bf16.vlgmr.msra.gmra.mxu1 %vm1104_vm3, %v1474_v21 }
 0x32e   : > { %2252 = vmatprep.mubr.msk.bf16.mxu1 %vm2786_vm1, %v2785_v16 }
 0x368   : > { %v1145_v22 = vpop.f32.mrf.mxu1 }
 0x369   : > { %v1151_v23 = vmul.f32 0.35355338, %v1145_v22 }
 0x36a   : > { %v2204_v24 = vpop.f32.mrf.mxu1 }
 0x36b   : > { %v1152_v25 = vsel %vm1104_vm3, %v1151_v23, -inf }
 0x36c   : > { %1153 = vmax.xlane.f32.xlu1 %v1152_v25  ;;  %v1148_v26 = vpop.f32.mrf.mxu1 }
 0x36e   : > { %v2205_v27 = vpop.f32.mrf.mxu1 }
 0x3dd   : > { %v1264_v28 = vpop.f32.mrf.mxu1 }
 0x3de   : > { %v1270_v29 = vmul.f32 0.35355338, %v1264_v28 }
 0x3df   : > { %v2216_v30 = vpop.f32.mrf.mxu1 }
 0x3e0   : > { %v1271_v31 = vsel %vm1104_vm3, %v1270_v29, -inf }
 0x3e1   : > { %1272 = vmax.xlane.f32.xlu0 %v1271_v31  ;;  %v1267_v32 = vpop.f32.mrf.mxu1 }
 0x3e3   : > { %v2217_v33 = vpop.f32.mrf.mxu1 }
 0x3e5   : > { %v1392_v34 = vpop.f32.mrf.mxu1 }
 0x3e6   : > { %v1398_v35 = vmul.f32 0.35355338, %v1392_v34 }
 0x3e7   : > { %v2228_v36 = vpop.f32.mrf.mxu1 }
 0x3e8   : > { %v1399_v37 = vsel %vm1104_vm3, %v1398_v35, -inf }
 0x3e9   : > { %1400 = vmax.xlane.f32.xlu0 %v1399_v37  ;;  %v1395_v38 = vpop.f32.mrf.mxu1 }
 0x3eb   : > { %v2229_v39 = vpop.f32.mrf.mxu1 }
 0x3ed   : > { %v1520_v40 = vpop.f32.mrf.mxu1 }
 0x3ee   : > { %v1526_v41 = vmul.f32 0.35355338, %v1520_v40 }
 0x3ef   : > { %v2240_v42 = vpop.f32.mrf.mxu1 }
 0x3f0   : > { %v1527_v43 = vsel %vm1104_vm3, %v1526_v41, -inf }
 0x3f1   : > { %1528 = vmax.xlane.f32.xlu1 %v1527_v43  ;;  %v1523_v44 = vpop.f32.mrf.mxu1 }
 0x3f2   : > { %v2437_v44 = vld [vmem:[#allocation13 + $0x8] sm:$0xff]  }
 0x3f3   : > { %v2241_v45 = vpop.f32.mrf.mxu1  ;;  %2249 = vmatpush3.bf16.msra.mxu1 %v2437_v44 }
 0x3f4   : > { %v2438_v45 = vld [vmem:[#allocation13] sm:$0xff]   ;;  %2250 = vmatprep.subr.bf16.mxu1 %v2785_v16 }
 0x3f5   : > { %v1154_v46 = vpop.xlane.xlu1 %1153 }
 0x3f6   : > { %v1155_v47 = vsub.f32 %v1151_v23, %v1154_v46 }
 0x3f7   : > { %2251 = vmatpush3.bf16.msra.mxu1 %v2438_v45 }
 0x3f8   : > { %v1156_v48 = vmul.f32 1.442695, %v1155_v47  ;;  %2264 = vmatprep.subr.bf16.mxu1 %v2785_v16 }
 0x3fa   : > { %2449 = vpow2.f32 %v1156_v48 }
 0x407   : > { %v2450_v49 = vpop.eup %2449 }
 0x408   : > { %v1158_v50 = vsel %vm1104_vm3, %v2450_v49, 0.0 }
 0x409   : > { %1159 = vadd.xlane.f32.xlu0 %v1158_v50 }
 0x46a   : > { %v1273_v51 = vpop.xlane.xlu0 %1272 }
 0x46b   : > { %v1274_v52 = vsub.f32 %v1270_v29, %v1273_v51 }
 0x46d   : > { %v1275_v53 = vmul.f32 1.442695, %v1274_v52 }
 0x46f   : > { %2451 = vpow2.f32 %v1275_v53 }
 0x472   : > { %v1401_v54 = vpop.xlane.xlu0 %1400 }
 0x473   : > { %v1402_v55 = vsub.f32 %v1398_v35, %v1401_v54 }
 0x475   : > { %v1403_v56 = vmul.f32 1.442695, %v1402_v55  ;;  %v2117_v55 = vld [vmem:[#allocation14] ss:$0 sm:$0xff] }
 0x477   : > { %2453 = vpow2.f32 %v1403_v56 }
 0x47a   : > { %v1529_v63 = vpop.xlane.xlu1 %1528 }
 0x47b   : > { %v1530_v0 = vsub.f32 %v1526_v41, %v1529_v63 }
 0x47c   : > { %v2452_v57 = vpop.eup %2451 }
 0x47d   : > { %v1277_v58 = vsel %vm1104_vm3, %v2452_v57, 0.0  ;;  %v1531_v3 = vmul.f32 1.442695, %v1530_v0 }
 0x47e   : > { %1278 = vadd.xlane.f32.xlu1 %v1277_v58 }
 0x484   : > { %v2454_v59 = vpop.eup %2453 }
 0x485   : > { %v1405_v60 = vsel %vm1104_vm3, %v2454_v59, 0.0 }
 0x486   : > { %1406 = vadd.xlane.f32.xlu0 %v1405_v60 }
 0x48f   : > { %1414 = vrot.lane.b32.xlu1 %v2434_v61, %s2789_s5 }
 0x492   : > { %v1160_v62 = vpop.xlane.xlu0 %1159 }
 0x493   : > { %2455 = vrcp.f32 %v1160_v62 }
 0x494   : > { %2457 = vpow2.f32 %v1531_v3 }
 0x49c   : > { %1286 = vrot.lane.b32.xlu0 %v2435_v2, %s2788_s2  ;;  %s3229_s2 = scalar_lea.hbm %s3339_s28, %s2134_s21 }
 0x4a0   : > { %v2456_v4 = vpop.eup %2455 }
 0x4a1   : > { %v1162_v5 = vmul.f32 %v2456_v4, %v2450_v49  ;;  %v2458_v7 = vpop.eup %2457 }
 0x4a2   : > { %v1533_v8 = vsel %vm1104_vm3, %v2458_v7, 0.0 }
 0x4a3   : > { %v1163_v6 = vpack.c.bf16 %v1162_v5, %v1162_v5  ;;  %v2439_v5 = vld [vmem:[%s3292_s16 + $0x8] sm:$0xff]  }
 0x4a5   : > { %2209 = vmatmul.mubr.msk.bf16.vlgmr.msra.gmra.mxu0 %vm1104_vm3, %v1163_v6 }
 0x4a6   : > { %2220 = vmatprep.mubr.msk.bf16.mxu0 %vm2786_vm1, %v2785_v16 }
 0x4b3   : > { %1534 = vadd.xlane.f32.xlu1 %v1533_v8 }
 0x4c4   : > { %1542 = vrot.lane.b32.xlu1 %v2436_v9, %s2790_s30  ;;  %s2794_s30 = smov [#allocation19]  }
 0x507   : > { %v1279_v10 = vpop.xlane.xlu1 %1278 }
 0x508   : > { %2459 = vrcp.f32 %v1279_v10  ;;  %v2121_v10 = vld [vmem:[#allocation16] ss:$0 sm:$0xff] }
 0x50b   : > { %v1415_v17 = vpop.permute.xlu1 %1414 }
 0x50c   : > { %v1420_v19 = vsel %vm1167_vm4, %v1415_v17, 0  ;;  %v2441_v17 = vld [vmem:[%s3294_s18 + $0x18] sm:$0xff]  }
 0x50f   : > { %v1407_v11 = vpop.xlane.xlu0 %1406 }
 0x510   : > { %2461 = vrcp.f32 %v1407_v11 }
 0x513   : > { %v1287_v12 = vpop.permute.xlu0 %1286 }
 0x514   : > { %v1292_v13 = vsel %vm1167_vm4, %v1287_v12, 0  ;;  %v2122_v12 = vld [vmem:[#allocation17] ss:$0 sm:$0xff] }
 0x515   : > { %v2460_v14 = vpop.eup %2459  ;;  %2219 = vmatpush3.bf16.msra.mxu0 %v1292_v13 }
 0x516   : > { %2230 = vmatprep.subr.bf16.mxu0 %v2785_v16  ;;  %v1281_v15 = vmul.f32 %v2460_v14, %v2452_v57 }
 0x518   : > { %v1282_v18 = vpack.c.bf16 %v1281_v15, %v1281_v15 }
 0x51a   : > { %2221 = vmatmul.mubr.msk.bf16.vlgmr.msra.gmra.mxu0 %vm1104_vm3, %v1282_v18  ;;  %v2442_v18 = vld [vmem:[%s3294_s18 + $0x10] sm:$0xff]  }
 0x51b   : > { %2231 = vmatpush3.bf16.msra.mxu0 %v1420_v19  ;;  %2232 = vmatprep.mubr.msk.bf16.mxu0 %vm2786_vm1, %v2785_v16  ;;  %v2443_v19 = vld [vmem:[%s3294_s18 + $0x8] sm:$0xff]  }
 0x51c   : > { %2242 = vmatprep.subr.bf16.mxu0 %v2785_v16 }
 0x51d   : > { %v2462_v20 = vpop.eup %2461 }
 0x51e   : > { %v1409_v21 = vmul.f32 %v2462_v20, %v2454_v59  ;;  %v2444_v20 = vld [vmem:[%s3294_s18] sm:$0xff]  }
 0x520   : > { %v1410_v22 = vpack.c.bf16 %v1409_v21, %v1409_v21  ;;  %v2123_v21 = vld [vmem:[%s3293_s17] ss:$0 sm:$0xff] }
 0x522   : > { %2233 = vmatmul.mubr.msk.bf16.vlgmr.msra.gmra.mxu0 %vm1104_vm3, %v1410_v22 }
 0x523   : > { %2244 = vmatprep.mubr.msk.bf16.mxu0 %vm2786_vm1, %v2785_v16 }
 0x53c   : > { %v1535_v23 = vpop.xlane.xlu1 %1534 }
 0x53d   : > { %2463 = vrcp.f32 %v1535_v23 }
 0x540   : > { %v1543_v24 = vpop.permute.xlu1 %1542 }
 0x541   : > { %v1548_v25 = vsel %vm1167_vm4, %v1543_v24, 0 }
 0x542   : > { %2243 = vmatpush3.bf16.msra.mxu0 %v1548_v25 }
 0x543   : > { %2256 = vmatprep.subr.bf16.mxu0 %v2785_v16 }
 0x54a   : > { %v2464_v26 = vpop.eup %2463 }
 0x54b   : > { %v1537_v27 = vmul.f32 %v2464_v26, %v2458_v7 }
 0x54d   : > { %v1538_v28 = vpack.c.bf16 %v1537_v27, %v1537_v27 }
 0x54f   : > { %2245 = vmatmul.mubr.msk.bf16.vlgmr.msra.gmra.mxu0 %vm1104_vm3, %v1538_v28 }
 0x550   : > { %2260 = vmatprep.mubr.msk.bf16.mxu0 %vm2786_vm1, %v2785_v16  ;;  %2257 = vmatpush3.bf16.msra.mxu0 %v2439_v5 }
 0x551   : > { %2258 = vmatprep.subr.bf16.mxu0 %v2785_v16 }
 0x565   : > { %v1205_v29 = vpop.f32.mrf.mxu0 }
 0x566   : > { %v1211_v30 = vpack.c.bf16 %v1205_v29, %v1205_v29 }
 0x567   : > { %v2210_v31 = vpop.f32.mrf.mxu0 }
 0x568   : > { %1213 = vst.msk [vmem:[#allocation4] sm:$0xf] %vm1212_vm5, %v1211_v30 }
 0x569   : > { %v1208_v32 = vpop.f32.mrf.mxu0 }
 0x56a   : > { %v2127_v32 = vld [vmem:[%s3295_s19] ss:$0 sm:$0xff] }
 0x56b   : > { %v2211_v33 = vpop.f32.mrf.mxu0 }
 0x5da   : > { %v1328_v34 = vpop.f32.mrf.mxu0 }
 0x5db   : > { %v2137_v35 = vpack.c.bf16 %v1328_v34, %v1328_v34 }
 0x5dc   : > { %v2222_v36 = vpop.f32.mrf.mxu0 }
 0x5dd   : > { %1338 = vrot.lane.b32.xlu0 %v2137_v35, %s2791_s29  ;;  %s2681_s29 = sshll.u32 %s2794_s30, 4  ;;  %s2682_s29 = int_to_ptr.vmem [resolvable:$false] %s2681_s29 }
 0x5de   : > { %v1331_v37 = vpop.f32.mrf.mxu0 }
 0x5e0   : > { %v2223_v38 = vpop.f32.mrf.mxu0 }
 0x5e2   : > { %v1456_v39 = vpop.f32.mrf.mxu0 }
 0x5e3   : > { %v2138_v40 = vpack.c.bf16 %v1456_v39, %v1456_v39 }
 0x5e4   : > { %v2234_v41 = vpop.f32.mrf.mxu0 }
 0x5e5   : > { %1466 = vrot.lane.b32.xlu1 %v2138_v40, %s2792_s3  ;;  %s2683_s3 = scalar_lea.vmem %s2682_s29, 256 }
 0x5e6   : > { %v1459_v42 = vpop.f32.mrf.mxu0 }
 0x5e8   : > { %v2235_v43 = vpop.f32.mrf.mxu0 }
 0x60f   : > { %v1584_v46 = vpop.f32.mrf.mxu0 }
 0x610   : > { %v2139_v47 = vpack.c.bf16 %v1584_v46, %v1584_v46 }
 0x611   : > { %v2246_v48 = vpop.f32.mrf.mxu0 }
 0x612   : > { %1594 = vrot.lane.b32.xlu0 %v2139_v47, %s2793_s25  ;;  %s790_s25 = sand.u32 1, %s2757_s22  }
 0x613   : > { %v1587_v49 = vpop.f32.mrf.mxu0  ;;  %s2079_s26 = sshll.u32 %s790_s25, 3  ;;  %s1855_s24 = scalar_lea.sflag [#allocation7], %s790_s25 }
 0x614   : > { %s792_s20 = scalar_lea.vmem [#allocation19], %s2079_s26 }
 0x615   : > { %v2247_v50 = vpop.f32.mrf.mxu0  ;;  %s1869_s7 = sshll.u32 %s792_s20, 4  ;;  %s3231_s7 = int_to_ptr.vmem [resolvable:$true] %s1869_s7 }
 0x616   : > { %s2677_s5 = scalar_lea.vmem %s3231_s7, 128  ;;  %p2684_p2 = scmp.lt.s32.totalorder %s3231_s7, %s2682_s29 }
 0x617   : > { %p2678_p0 = scmp.ne.s32.totalorder %s3231_s7, %s2677_s5  ;;  %p2685_p3 = scmp.lt.s32.totalorder %s2683_s3, %s2677_s5 }
 0x619   : > { %p2679_p11 = pnand %p2678_p0, %p3340_p10  ;;  %p2686_p5 = por %p2685_p3, %p2684_p2 }
 0x61b   : > { %p2680_p1 = pneg %p2679_p11 }
 0x61d   : > { %p2687_p6 = pnand %p2686_p5, %p2680_p1 }
 0x64f   : > { %v1339_v51 = vpop.permute.xlu0 %1338 }
 0x650   : > { %1342 = vst.msk [vmem:[#allocation4] sm:$0xf] %vm1341_vm6, %v1339_v51 }
 0x657   : > { %v1467_v52 = vpop.permute.xlu1 %1466 }
 0x658   : > { %1470 = vst.msk [vmem:[#allocation4] sm:$0xf] %vm1469_vm7, %v1467_v52 }
 0x684   : > { %v1595_v53 = vpop.permute.xlu0 %1594 }
 0x685   : > { %1598 = vst.msk [vmem:[#allocation4] sm:$0xf] %vm1597_vm8, %v1595_v53 }
 0x68c   : > { %v1599_v54 = vld [vmem:[#allocation4] sm:$0xf] }
 0x68d   : > { %2253 = vmatmul.mubr.msk.bf16.vlgmr.msra.gmra.mxu1 %vm824_vm0, %v1599_v54 }
 0x68e   : > { %2272 = vmatprep.mubr.msk.bf16.mxu1 %vm2786_vm1, %v2785_v16  ;;  %2265 = vmatpush3.bf16.msra.mxu1 %v2441_v17 }
 0x68f   : > { %2266 = vmatprep.subr.bf16.mxu1 %v2785_v16 }
 0x692   : > { %2267 = vmatpush3.bf16.msra.mxu1 %v2442_v18 }
 0x693   : > { %2268 = vmatprep.subr.bf16.mxu1 %v2785_v16 }
 0x696   : > { %2269 = vmatpush3.bf16.msra.mxu1 %v2443_v19 }
 0x697   : > { %2270 = vmatprep.subr.bf16.mxu1 %v2785_v16 }
 0x69a   : > { %2271 = vmatpush3.bf16.msra.mxu1 %v2444_v20 }
 0x74d   : > { %v1660_v56 = vpop.f32.mrf.mxu1 }
 0x74e   : > { %v1661_v57 = vadd.f32 %v2117_v55, %v1660_v56 }
 0x74f   : > { %v2254_v58 = vpop.f32.mrf.mxu1 }
 0x750   : > { %v3188_v59 = vadd.f32 %v1661_v57, %v3067_v1  ;;  %v2440_v1 = vld [vmem:[%s3292_s16] sm:$0xff]  }
 0x751   : > { %v1663_v60 = vpop.f32.mrf.mxu1  ;;  %2259 = vmatpush3.bf16.msra.mxu0 %v2440_v1 }
 0x752   : > { %v1669_v61 = vsel %vm824_vm0, %v3188_v59, 0.0 }
 0x753   : > { %1670 = vadd.xlane.f32.xlu1 %v1669_v61  ;;  %v2255_v62 = vpop.f32.mrf.mxu1 }
 0x7dc   : > { %v1671_v63 = vpop.xlane.xlu1 %1670 }
 0x7dd   : > { %v1672_v0 = vmul.f32 0.03125, %v1671_v63 }
 0x7df   : > { %v1673_v2 = vsub.f32 %v3188_v59, %v1672_v0 }
 0x7e1   : > { %v1674_v3 = vmul.f32 %v1673_v2, %v1673_v2 }
 0x7e3   : > { %v1675_v4 = vsel %vm824_vm0, %v1674_v3, 0.0 }
 0x7e4   : > { %1676 = vadd.xlane.f32.xlu0 %v1675_v4 }
 0x86d   : > { %v1677_v6 = vpop.xlane.xlu0 %1676 }
 0x86e   : > { %v1678_v7 = vmul.f32 0.03125, %v1677_v6 }
 0x870   : > { %v1679_v8 = vadd.f32 1e-06, %v1678_v7 }
 0x872   : > { %2465 = vrsqrt.f32 %v1679_v8 }
 0x87f   : > { %v2466_v9 = vpop.eup %2465 }
 0x880   : > { %v1681_v11 = vmul.f32 %v2466_v9, %v1673_v2 }
 0x882   : > { %v1688_v13 = vmul.f32 %v2121_v10, %v1681_v11 }
 0x884   : > { %v1695_v14 = vadd.f32 %v2122_v12, %v1688_v13 }
 0x886   : > { %v1696_v15 = vpack.c.bf16 %v1695_v14, %v1695_v14 }
 0x888   : > { %2261 = vmatmul.mubr.msk.bf16.vlgmr.msra.gmra.mxu0 %vm824_vm0, %v1696_v15 }
 0x948   : > { %v1757_v22 = vpop.f32.mrf.mxu0 }
 0x949   : > { %v1758_v23 = vadd.f32 %v2123_v21, %v1757_v22 }
 0x94a   : > { %v2262_v24 = vpop.f32.mrf.mxu0 }
 0x94b   : > { %v1764_v25 = vmul.f32 0.70710677, %v1758_v23  ;;  %v1763_v16 = vmul.f32 0.5, %v1758_v23 }
 0x94c   : > { %v1760_v26 = vpop.f32.mrf.mxu0 }
 0x94d   : > { %2467 = verf.f32 %v1764_v25 }
 0x94e   : > { %v2263_v27 = vpop.f32.mrf.mxu0 }
 0x95a   : > { %v2468_v28 = vpop.eup %2467 }
 0x95b   : > { %v1766_v29 = vadd.f32 1.0, %v2468_v28 }
 0x95d   : > { %v1767_v30 = vmul.f32 %v1766_v29, %v1763_v16 }
 0x95f   : > { %v1768_v31 = vpack.c.bf16 %v1767_v30, %v1767_v30 }
 0x961   : > { %2273 = vmatmul.mubr.msk.bf16.vlgmr.msra.gmra.mxu1 %vm1808_vm9, %v1768_v31 }
 0xa21   : > { %v1846_v33 = vpop.f32.mrf.mxu1 }
 0xa22   : > { %v1847_v34 = vadd.f32 %v2127_v32, %v1846_v33 }
 0xa23   : > { %v2274_v35 = vpop.f32.mrf.mxu1 }
 0xa24   : > { %v1852_v36 = vadd.f32 %v1847_v34, %v3188_v59 }
 0xa25   : > { %v1849_v37 = vpop.f32.mrf.mxu1 }
 0xa26   : > { %1853 = vst.msk [vmem:[%s792_s20] sm:$0xff] %vm824_vm0, %v1852_v36 }
 0xa27   : > { %v2275_v38 = vpop.f32.mrf.mxu1 }
 0xa28   : > { %2690 = shalt.err (!%p2687_p6)
}
 0xa29   : > { %s2691_s26 = scalar_lea.hbm %s3229_s2, 128  ;;  %s2695_s0 = scalar_lea.hbm %s3339_s28, 256 }
 0xa2a   : > { %p2692_p8 = scmp.ne.s32.totalorder %s3229_s2, %s2691_s26  ;;  %p2696_p12 = scmp.lt.s32.totalorder %s3229_s2, %s3339_s28 }
 0xa2b   : > { %p2697_p4 = scmp.lt.s32.totalorder %s2695_s0, %s2691_s26 }
 0xa2c   : > { %p2693_p7 = pnand %p2692_p8, %p3340_p10 }
 0xa2d   : > { %p2698_p13 = por %p2697_p4, %p2696_p12 }
 0xa2e   : > { %p2694_p9 = pneg %p2693_p7 }
 0xa30   : > { %p2699_p0 = pnand %p2698_p13, %p2694_p9 }
 0xa32   : > { %2702 = shalt.err (!%p2699_p0)
}
 0xa33   : > { %2308 = dma.vmem_to_hbm [thread:$0]  (%p3340_p10), %s3231_s7, 128, %s3229_s2, %s1855_s24  }
 0xa34 PF: > { %s3341_s27 = sld [smem:[#allocation29_spill]] }
 0xa35   : > { %s3342_s23 = sld [smem:[#allocation26_spill]] }
 0xa36   : > { %s3343_s5 = sld [smem:[#allocation31_spill]] }
 0xa3a   : > { %p2355_p11 = scmp.ge.s32.totalorder %s3341_s27, 2 }
 0xa3b   : > { %s1881_s30 = sand.u32 1, %s3342_s23  }
 0xa3c   : > { %p3344_p1 = scmp.ne.s32.totalorder %s3343_s5, 0  ;;  %s1882_s29 = scalar_lea.sflag [#allocation7], %s1881_s30 }
 0xa3e   : > { %p2336_p2 = pnand %p2355_p11, %p3344_p1 }
 0xa40   : > { %p2337_p3 = pneg %p2336_p2 }
 0xa42   : > { %2748 = dma.done.wait (%p2337_p3), %s1882_s29, 128  }
 0xa43   : > { %2750 = vsyncadd (%p2337_p3), %s1882_s29, 4294967168  ;;  %s38_s25 = sadd.s32 1, %s3341_s27   ;;  %s3345_s4 = sld [smem:[#allocation27_spill]] }
 0xa44   : > { %p35_p5 = scmp.ge.s32.totalorder %s38_s25, 4   ;;  %s3346_s23 = sld [smem:[#allocation32_spill]] }
 0xa45   : > { %s3347_s24 = sld [smem:[#allocation28_spill]]  ;;  %s3349_s1 = smov %s2757_s22 }
 0xa46   : > { %s3348_s2 = sld [smem:[#allocation30_spill]]  ;;  %37 = sbr.rel (!%p35_p5) target bundleno = 18 (0x12), region = 181 }
 0xa49   : > { %s3350_s22 = smov %s3345_s4 }
 0xa4b   :  { %1887 = vsyncpa [#allocation6], 1 }
 0xa4c   :  { %1889 = vsyncpa [#allocation6 + $0x1], 1 }
 0xa4d   :  { %1890 = vsyncpa [#allocation9], 1 }
 0xa4e   :  { %1891 = vsyncpa [#allocation12], 1 }
 0xa4f   :  { %1892 = vsyncpa [#allocation15], 1 }
 0xa50   :  { %1893 = vsyncpa [#allocation18], 1 }
 0xa51   :  { %1894 = vsyncpa [#allocation7], 1 }
 0xa52   :  { %1896 = vsyncpa [#allocation7 + $0x1], 1 }

// kernel: tpu_custom_call.1
= control target key start
LH: loop header
LB: loop body
LE: loop exit
PB: predicated region body
PF: predicated region fallthrough
CT: control target
= control target key end

     0   :  { %s3276_s0 = inlined_call_operand.vmem [shape: f32[2,8,32], index: 0, kind: input, shape index: {}]   ;;  %s3277_s1 = inlined_call_operand.vmem [shape: f32[2,8,32], index: 1, kind: input, shape index: {}]   ;;  %s3278_s2 = inlined_call_operand.vmem [shape: f32[2,8,1], index: 2, kind: input, shape index: {}]   ;;  %s3279_s3 = inlined_call_operand.vmem [shape: f32[2,8,1], index: 3, kind: input, shape index: {}]   ;;  %s3280_s4 = inlined_call_operand.hbm [shape: f32[1,32], index: 4, kind: input, shape index: {}]   ;;  %s3281_s5 = inlined_call_operand.hbm [shape: f32[1,32], index: 5, kind: input, shape index: {}]   ;;  %s3282_s6 = inlined_call_operand.vmem [shape: bf16[32,32], index: 6, kind: input, shape index: {}]   ;;  %s3283_s7 = inlined_call_operand.hbm [shape: f32[1,32], index: 7, kind: input, shape index: {}]   ;;  %s3284_s8 = inlined_call_operand.vmem [shape: bf16[32,32], index: 8, kind: input, shape index: {}]   ;;  %s3285_s9 = inlined_call_operand.vmem [shape: f32[1,32], index: 9, kind: input, shape index: {}]   ;;  %s3286_s10 = inlined_call_operand.vmem [shape: bf16[32,32], index: 10, kind: input, shape index: {}]   ;;  %s3287_s11 = inlined_call_operand.hbm [shape: f32[1,32], index: 11, kind: input, shape index: {}]   ;;  %s3288_s12 = inlined_call_operand.hbm [shape: bf16[32,32], index: 12, kind: input, shape index: {}]   ;;  %s3289_s13 = inlined_call_operand.hbm [shape: f32[1,32], index: 13, kind: input, shape index: {}]   ;;  %s3290_s14 = inlined_call_operand.hbm [shape: f32[1,32], index: 14, kind: input, shape index: {}]   ;;  %s3291_s15 = inlined_call_operand.hbm [shape: f32[1,32], index: 15, kind: input, shape index: {}]   ;;  %s3292_s16 = inlined_call_operand.vmem [shape: bf16[32,64], index: 16, kind: input, shape index: {}]   ;;  %s3293_s17 = inlined_call_operand.vmem [shape: f32[1,64], index: 17, kind: input, shape index: {}]   ;;  %s3294_s18 = inlined_call_operand.vmem [shape: bf16[64,32], index: 18, kind: input, shape index: {}]   ;;  %s3295_s19 = inlined_call_operand.vmem [shape: f32[1,32], index: 19, kind: input, shape index: {}]   ;;  %s3296_s20 = inlined_call_operand.hbm [shape: f32[2,8,32], index: 20, kind: output, shape index: {}]  }
   0x1   :  { %3309 = sst [smem:[#allocation33_spill]] %s3276_s0 }
   0x2   :  { %3310 = sst [smem:[#allocation34_spill]] %s3277_s1 }
   0x3   :  { %3311 = sst [smem:[#allocation35_spill]] %s3278_s2 }
   0x4   :  { %3312 = sst [smem:[#allocation36_spill]] %s3279_s3 }
   0x5   :  { %3313 = sst [smem:[#allocation37_spill]] %s3280_s4 }
   0x6   :  { %3314 = sst [smem:[#allocation38_spill]] %s3281_s5 }
   0x7   :  { %3315 = sst [smem:[#allocation39_spill]] %s3283_s7 }
   0x8   :  { %3316 = sst [smem:[#allocation40_spill]] %s3296_s20 }
   0x9   :  { %25 = vsyncpa [#allocation6], 0 }
   0xa   :  { %26 = vsyncpa [#allocation9], 0 }
   0xb   :  { %27 = vsyncpa [#allocation12], 0 }
   0xc   :  { %28 = vsyncpa [#allocation15], 0 }
   0xd   :  { %29 = vsyncpa [#allocation18], 0 }
   0xe   :  { %30 = vsyncpa [#allocation7], 0 }
   0xf   :  { %32 = vsyncpa [#allocation7 + $0x1], 0  ;;  %s2900_s1 = smov 0   ;;  %s2902_s22 = smov 0  }
  0x10   :  { %s2904_s23 = smov 0   ;;  %s2906_s24 = smov 0  }
  0x11   :  { %s2908_s2 = smov 0   ;;  %s2910_s25 = smov 0  }
  0x12 LB: > { %3317 = sst [smem:[#allocation26_spill]] %s2753_s1  ;;  %s2058_s3 = sadd.s32 4294967295, %s2773_s25   ;;  %s2773_s25 = sphi %s2910_s25, %s38_s25   ;;  %s2769_s2 = sphi %s2908_s2, %s3348_s2   ;;  %s2765_s24 = sphi %s2906_s24, %s3347_s24   ;;  %s2761_s23 = sphi %s2904_s23, %s3346_s23   ;;  %s2757_s22 = sphi %s2902_s22, %s3350_s22   ;;  %s2753_s1 = sphi %s2900_s1, %s3349_s1  }
  0x13   : > { %3318 = sst [smem:[#allocation27_spill]] %s2761_s23  ;;  %s2059_s26 = sadd.s32 4294967294, %s2773_s25  }
  0x14   : > { %3319 = sst [smem:[#allocation28_spill]] %s2769_s2  ;;  %s50_s27 = sadd.s32 1, %s2769_s2 }
  0x15   : > { %3320 = sst [smem:[#allocation29_spill]] %s2773_s25  ;;  %s503_s28 = sadd.s32 1, %s2761_s23 }
  0x16   : > { %p52_p0 = scmp.ge.s32.totalorder %s50_s27, 2  ;;  %p513_p1 = scmp.ne.s32.totalorder %s2761_s23, %s2757_s22 }
  0x17   : > { %p514_p2 = scmp.eq.s32.totalorder %s2058_s3, 1  ;;  %p519_p3 = scmp.ne.s32.totalorder %s2757_s22, %s2753_s1 }
  0x18   : > { %s3352_s27 = smov (%p52_p0, %s50_s27), 0  ;;  %p520_p5 = scmp.eq.s32.totalorder %s2059_s26, 1 }
  0x19   : > { %3321 = sst [smem:[#allocation30_spill]] %s3352_s27  ;;  %p2940_p4 = por %p514_p2, %p513_p1 }
  0x1a   : > { %s498_s29 = ssub.s32 %s2769_s2, %s3352_s27  ;;  %p2060_p6 = scmp.ge.s32.totalorder %s2773_s25, 1 }
  0x1b   : > { %s3322_s4 = scalar_select %p2940_p4, 1, 0 }
  0x1c   : > { %p501_p7 = scmp.eq.s32.totalorder %s498_s29, 0  ;;  %p2947_p8 = por %p520_p5, %p519_p3 }
  0x1d   : > { %p527_p9 = scmp.lt.s32.totalorder %s2773_s25, 3  ;;  %p2959_p11 = scmp.eq.s32.totalorder %s2058_s3, 0 }
  0x1e   : > { %s3323_s30 = scalar_select %p2947_p8, 1, 0 }
  0x1f   : > { %s2953_s0 = scalar_select %p501_p7, %s2761_s23, %s503_s28  }
  0x20   : > { %3324 = sst [smem:[#allocation31_spill]] %s3323_s30  ;;  %p2955_p10 = pnand %p2060_p6, %p527_p9 }
  0x21   : > { %3325 = sst [smem:[#allocation32_spill]] %s2953_s0  ;;  %s2775_s26 = smov [#allocation8]  }
  0x22   : > { %s3326_s21 = scalar_select %p2955_p10, 1, 0 }
  0x23   : > { %s3327_s1 = scalar_select %p2959_p11, 1, 0 }
  0x24   : > { %p2310_p12 = pneg %p2955_p10  ;;  %s551_s29 = sshll.u32 %s2775_s26, 4  ;;  %s552_s29 = int_to_ptr.vmem [resolvable:$true] %s551_s29 }
  0x25   : > { %s2776_s27 = smov [#allocation11]   ;;  %s2777_s0 = smov [#allocation14]  }
  0x26   : > { %s585_s2 = sshll.u32 %s2776_s27, 4  ;;  %p2967_p13 = pnand %p2959_p11, %p2310_p12  ;;  %s586_s2 = int_to_ptr.vmem [resolvable:$true] %s585_s2 }
  0x27   : > { %s609_s3 = sshll.u32 %s2777_s0, 4  ;;  %s2480_s30 = scalar_lea.vmem %s552_s29, 16  ;;  %s610_s3 = int_to_ptr.vmem [resolvable:$true] %s609_s3 }
  0x28   : > { %p2973_p0 = pneg %p2967_p13  ;;  %p2481_p1 = scmp.ne.s32.totalorder %s552_s29, %s2480_s30 }
  0x29   : > { %s2487_s27 = scalar_lea.vmem %s552_s29, 32  ;;  %p2488_p5 = scmp.lt.s32.totalorder %s552_s29, %s552_s29 }
  0x2a   : > { %p2483_p2 = pnand %p2481_p1, %p2973_p0  ;;  %p2489_p6 = scmp.lt.s32.totalorder %s2487_s27, %s2480_s30 }
  0x2c   : > { %p2484_p3 = pneg %p2483_p2  ;;  %p2490_p7 = por %p2489_p6, %p2488_p5 }
  0x2e   : > { %p2491_p9 = pnand %p2490_p7, %p2484_p3 }
  0x30   : > { %2494 = shalt.err (!%p2491_p9)
}
  0x31   : > { %s3330_s5 = sld [smem:[#allocation38_spill]]  ;;  %s2506_s25 = scalar_lea.vmem %s586_s2, 16 }
  0x32   : > { %p2507_p12 = scmp.ne.s32.totalorder %s586_s2, %s2506_s25  ;;  %s2513_s20 = scalar_lea.vmem %s586_s2, 32 }
  0x33   : > { %p2514_p1 = scmp.lt.s32.totalorder %s586_s2, %s586_s2  ;;  %p2515_p2 = scmp.lt.s32.totalorder %s2513_s20, %s2506_s25 }
  0x34   : > { %p2509_p8 = pnand %p2507_p12, %p2973_p0 }
  0x35   : > { %p2516_p11 = por %p2515_p2, %p2514_p1 }
  0x36   : > { %p2510_p4 = pneg %p2509_p8 }
  0x37   : > { %2316 = dma.hbm_to_vmem [thread:$0]  (!%p2967_p13), %s3330_s5, 16, %s552_s29, [#allocation9]  }
  0x38   : > { %p2517_p10 = pnand %p2516_p11, %p2510_p4 }
  0x3a   : > { %2520 = shalt.err (!%p2517_p10)
}
  0x3b   : > { %2322 = dma.hbm_to_vmem [thread:$0]  (!%p2967_p13), %s3287_s11, 16, %s586_s2, [#allocation12]  }
  0x3c   : > { %s2532_s29 = scalar_lea.vmem %s610_s3, 16  ;;  %s2539_s0 = scalar_lea.vmem %s610_s3, 32 }
  0x3d   : > { %p2533_p3 = scmp.ne.s32.totalorder %s610_s3, %s2532_s29  ;;  %p2540_p8 = scmp.lt.s32.totalorder %s610_s3, %s610_s3 }
  0x3e   : > { %p2541_p7 = scmp.lt.s32.totalorder %s2539_s0, %s2532_s29 }
  0x3f   : > { %p2535_p5 = pnand %p2533_p3, %p2973_p0 }
  0x40   : > { %p2542_p9 = por %p2541_p7, %p2540_p8 }
  0x41   : > { %p2536_p6 = pneg %p2535_p5 }
  0x43   : > { %p2543_p12 = pnand %p2542_p9, %p2536_p6 }
  0x45   : > { %2546 = shalt.err (!%p2543_p12)
}
  0x46   : > { %2328 = dma.hbm_to_vmem [thread:$0]  (!%p2967_p13), %s3289_s13, 16, %s610_s3, [#allocation15]  }
  0x47   : > { %s2778_s2 = smov [#allocation5]   ;;  %s2779_s30 = smov [#allocation10]  }
  0x48   : > { %s540_s26 = sshll.u32 %s2778_s2, 4  ;;  %s565_s27 = sshll.u32 %s2779_s30, 4  ;;  %s541_s26 = int_to_ptr.vmem [resolvable:$true] %s540_s26  ;;  %s566_s27 = int_to_ptr.vmem [resolvable:$true] %s565_s27 }
  0x49   : > { %s2558_s5 = scalar_lea.vmem %s541_s26, 16  ;;  %s2565_s29 = scalar_lea.vmem %s541_s26, 32 }
  0x4a   : > { %p2559_p4 = scmp.ne.s32.totalorder %s541_s26, %s2558_s5  ;;  %p2566_p1 = scmp.lt.s32.totalorder %s541_s26, %s541_s26 }
  0x4b   : > { %p2567_p2 = scmp.lt.s32.totalorder %s2565_s29, %s2558_s5 }
  0x4c   : > { %p2561_p10 = pnand %p2559_p4, %p2973_p0 }
  0x4d   : > { %p2568_p3 = por %p2567_p2, %p2566_p1 }
  0x4e   : > { %p2562_p11 = pneg %p2561_p10 }
  0x50   : > { %p2569_p5 = pnand %p2568_p3, %p2562_p11 }
  0x52   : > { %2572 = shalt.err (!%p2569_p5)
}
  0x53   : > { %s3331_s20 = sld [smem:[#allocation37_spill]]  ;;  %s2584_s25 = scalar_lea.vmem %s566_s27, 16 }
  0x54   : > { %p2585_p6 = scmp.ne.s32.totalorder %s566_s27, %s2584_s25  ;;  %s2591_s2 = scalar_lea.vmem %s566_s27, 32 }
  0x55   : > { %p2592_p9 = scmp.lt.s32.totalorder %s566_s27, %s566_s27  ;;  %p2593_p12 = scmp.lt.s32.totalorder %s2591_s2, %s2584_s25 }
  0x56   : > { %p2587_p8 = pnand %p2585_p6, %p2973_p0 }
  0x57   : > { %p2594_p4 = por %p2593_p12, %p2592_p9 }
  0x58   : > { %p2588_p7 = pneg %p2587_p8 }
  0x59   : > { %2313 = dma.hbm_to_vmem [thread:$0]  (!%p2967_p13), %s3331_s20, 16, %s541_s26, [#allocation6]  }
  0x5a   : > { %p2595_p10 = pnand %p2594_p4, %p2588_p7 }
  0x5c   : > { %2598 = shalt.err (!%p2595_p10)
}
  0x5d   : > { %s3332_s7 = sld [smem:[#allocation39_spill]]  ;;  %s2780_s29 = smov [#allocation13]  }
  0x5e   : > { %s595_s26 = sshll.u32 %s2780_s29, 4  ;;  %s596_s26 = int_to_ptr.vmem [resolvable:$true] %s595_s26 }
  0x5f   : > { %s2610_s3 = scalar_lea.vmem %s596_s26, 256  ;;  %p2618_p3 = scmp.lt.s32.totalorder %s596_s26, %s596_s26 }
  0x60   : > { %p2611_p11 = scmp.ne.s32.totalorder %s596_s26, %s2610_s3  ;;  %p2619_p5 = scmp.lt.s32.totalorder %s2610_s3, %s2610_s3 }
  0x62   : > { %p2613_p1 = pnand %p2611_p11, %p2973_p0  ;;  %p2620_p6 = por %p2619_p5, %p2618_p3 }
  0x63   : > { %2319 = dma.hbm_to_vmem [thread:$0]  (!%p2967_p13), %s3332_s7, 16, %s566_s27, [#allocation9]  }
  0x64   : > { %p2614_p2 = pneg %p2613_p1 }
  0x66   : > { %p2621_p8 = pnand %p2620_p6, %p2614_p2 }
  0x68   : > { %2624 = shalt.err (!%p2621_p8)
}
  0x69   : > { %s2781_s0 = smov 64   ;;  %s2782_s20 = smov 4  }
  0x6a   : > { %2325 = dma.hbm_to_vmem [thread:$0]  (!%p2967_p13), %s3288_s12, 256, %s596_s26, [#allocation12], %s2781_s0, %s2781_s0, %s2782_s20  }
  0x6b   : > { %s2783_s2 = smov [#allocation16]   ;;  %s2784_s30 = smov [#allocation17]  }
  0x6c   : > { %s620_s5 = sshll.u32 %s2783_s2, 4  ;;  %s631_s29 = sshll.u32 %s2784_s30, 4  ;;  %s621_s5 = int_to_ptr.vmem [resolvable:$true] %s620_s5  ;;  %s632_s29 = int_to_ptr.vmem [resolvable:$true] %s631_s29 }
  0x6d   : > { %s2636_s7 = scalar_lea.vmem %s621_s5, 16  ;;  %s2643_s3 = scalar_lea.vmem %s621_s5, 32 }
  0x6e   : > { %p2637_p7 = scmp.ne.s32.totalorder %s621_s5, %s2636_s7  ;;  %p2644_p4 = scmp.lt.s32.totalorder %s621_s5, %s621_s5 }
  0x6f   : > { %p2645_p10 = scmp.lt.s32.totalorder %s2643_s3, %s2636_s7 }
  0x70   : > { %p2639_p9 = pnand %p2637_p7, %p2973_p0 }
  0x71   : > { %p2646_p11 = por %p2645_p10, %p2644_p4 }
  0x72   : > { %p2640_p12 = pneg %p2639_p9 }
  0x74   : > { %p2647_p1 = pnand %p2646_p11, %p2640_p12 }
  0x76   : > { %2650 = shalt.err (!%p2647_p1)
}
  0x77   : > { %2331 = dma.hbm_to_vmem [thread:$0]  (!%p2967_p13), %s3290_s14, 16, %s621_s5, [#allocation15]  }
  0x78   : > { %s2662_s0 = scalar_lea.vmem %s632_s29, 16  ;;  %s2669_s20 = scalar_lea.vmem %s632_s29, 32 }
  0x79   : > { %p2663_p2 = scmp.ne.s32.totalorder %s632_s29, %s2662_s0  ;;  %p2670_p6 = scmp.lt.s32.totalorder %s632_s29, %s632_s29 }
  0x7a   : > { %p2671_p8 = scmp.lt.s32.totalorder %s2669_s20, %s2662_s0 }
  0x7b   : > { %p2665_p3 = pnand %p2663_p2, %p2973_p0 }
  0x7c   : > { %p2672_p7 = por %p2671_p8, %p2670_p6 }
  0x7d   : > { %p2666_p5 = pneg %p2665_p3 }
  0x7f   : > { %p2673_p9 = pnand %p2672_p7, %p2666_p5 }
  0x81   : > { %2676 = shalt.err (!%p2673_p9)
}
  0x82   : > { %2334 = dma.hbm_to_vmem [thread:$0]  (!%p2967_p13), %s3291_s15, 16, %s632_s29, [#allocation18]  }
  0x83   : > { %p3333_p12 = scmp.ne.s32.totalorder %s3326_s21, 0 }
  0x84   : > { %p3334_p4 = scmp.ne.s32.totalorder (!%p3333_p12), %s3327_s1, 0 }
  0x85   : > { %690 = sbr.rel (%p3333_p12) target bundleno = 2612 (0xa34), region = 100 }
  0x8a   : > { %2728 = dma.done.wait (%p3334_p4), [#allocation6], 16  }
  0x8b   : > { %2730 = vsyncadd (%p3334_p4), [#allocation6], 4294967280 }
  0x8c   : > { %2732 = dma.done.wait (%p3334_p4), [#allocation9], 32  }
  0x8d   : > { %2734 = vsyncadd (%p3334_p4), [#allocation9], 4294967264 }
  0x8e   : > { %2736 = dma.done.wait (%p3334_p4), [#allocation12], 272  }
  0x8f   : > { %2738 = vsyncadd (%p3334_p4), [#allocation12], 4294967024 }
  0x90   : > { %2740 = dma.done.wait (%p3334_p4), [#allocation15], 32  }
  0x91   : > { %2742 = vsyncadd (%p3334_p4), [#allocation15], 4294967264 }
  0x92   : > { %2744 = dma.done.wait (%p3334_p4), [#allocation18], 16  }
  0x93   : > { %2746 = vsyncadd (%p3334_p4), [#allocation18], 4294967280  ;;  %p793_p13 = scmp.lt.s32.totalorder %s2765_s24, 1  ;;  %s3335_s5 = sld [smem:[#allocation34_spill]]  ;;  %vm824_vm0 = vcmask 261120   ;;  %v2425_v14 = vld [vmem:[%s3284_s8 + $0x8] sm:$0xff]  }
  0x94   : > { %s3336_s25 = sld [smem:[#allocation33_spill]]  ;;  %v2426_v15 = vld [vmem:[%s3286_s10 + $0x8] sm:$0xff]   ;;  %v2785_v16 = vmov 0.0   ;;  %v2427_v17 = vld [vmem:[%s3284_s8] sm:$0xff]   ;;  %vm2786_vm1 = vmmov 0   ;;  %v2787_v19 = vmov 0  }
  0x95   : > { %s794_s23 = scalar_select %p793_p13, %s2765_s24, 1  ;;  %2176 = vmatprep.subr.bf16.mxu0 %v2785_v16  ;;  %2184 = vmatprep.subr.bf16.mxu1 %v2785_v16  ;;  %v2428_v18 = vld [vmem:[%s3286_s10] sm:$0xff]   ;;  %v2084_v29 = vld [vmem:[#allocation5] ss:$0 sm:$0xff]  ;;  %v2085_v31 = vld [vmem:[#allocation8] ss:$0 sm:$0xff] }
  0x96   : > { %2177 = vmatpush3.bf16.msra.mxu0 %v2425_v14  ;;  %2185 = vmatpush3.bf16.msra.mxu1 %v2426_v15  ;;  %s3337_s29 = sld [smem:[#allocation36_spill]]  ;;  %v2429_v36 = vld [vmem:[%s3282_s6 + $0x8] sm:$0xff]   ;;  %v2430_v39 = vld [vmem:[%s3282_s6] sm:$0xff]   ;;  %v2090_v43 = vld [vmem:[#allocation11] ss:$0 sm:$0xff]  ;;  %vm990_vm2 = vcmask 257024  }
  0x97   : > { %s3057_s21 = sshll.u32 %s794_s23, 3  ;;  %2178 = vmatprep.subr.bf16.mxu0 %v2785_v16  ;;  %2186 = vmatprep.subr.bf16.mxu1 %v2785_v16  ;;  %s3338_s1 = sld [smem:[#allocation35_spill]]  ;;  %v2086_v42 = vld [vmem:[%s3285_s9] ss:$0 sm:$0xff]  ;;  %v2096_v59 = vld [vmem:[#allocation10] ss:$0 sm:$0xff] }
  0x98   : > { %2180 = vmatprep.mubr.msk.bf16.mxu0 %vm2786_vm1, %v2785_v16  ;;  %2188 = vmatprep.mubr.msk.bf16.mxu1 %vm2786_vm1, %v2785_v16  ;;  %vm1104_vm3 = vcmask 64512   ;;  %vm1167_vm4 = vcmask 1043456   ;;  %s2788_s2 = smov 120   ;;  %vm1212_vm5 = vcmask 60416   ;;  %vm1341_vm6 = vcmask 126016   ;;  %s3339_s28 = sld [smem:[#allocation40_spill]] }
  0x99   : > { %s803_s30 = scalar_lea.vmem %s3335_s5, %s3057_s21  ;;  %2423 = vset.pattern.permute.xlu0 %v2787_v19  ;;  %2424 = vset.pattern.permute.xlu1 %v2787_v19  ;;  %s2789_s5 = smov 112   ;;  %vm1469_vm7 = vcmask 191616   ;;  %vm1597_vm8 = vcmask 257216   ;;  %vm1808_vm9 = vcmask 523264  }
  0x9a   : > { %s799_s26 = scalar_lea.vmem %s3336_s25, %s3057_s21  ;;  %v820_v0 = vld [vmem:[%s803_s30] sm:$0xff]  ;;  %2179 = vmatpush3.bf16.msra.mxu0 %v2427_v17  ;;  %2187 = vmatpush3.bf16.msra.mxu1 %v2428_v18  ;;  %s2790_s30 = smov 104  }
  0x9b   : > { %v3067_v1 = vld [vmem:[%s799_s26] sm:$0xff]  ;;  %v825_v2 = vsel %vm824_vm0, %v820_v0, 0.0  ;;  %2192 = vmatprep.subr.bf16.mxu0 %v2785_v16  ;;  %2200 = vmatprep.subr.bf16.mxu1 %v2785_v16  ;;  %s2793_s25 = smov 24   ;;  %p3340_p10 = scmp.ne.s32.totalorder %s3322_s4, 0 }
  0x9c   : > { %v1000_v3 = vsel %vm824_vm0, %v3067_v1, 0.0  ;;  %826 = vadd.xlane.f32.xlu0 %v825_v2  ;;  %s814_s3 = scalar_lea.vmem %s3337_s29, %s3057_s21  ;;  %s2791_s29 = smov 8  }
  0x9d   : > { %s810_s0 = scalar_lea.vmem %s3338_s1, %s3057_s21  ;;  %v821_v20 = vld [vmem:[%s814_s3] sm:$0xff]  ;;  %s2792_s3 = smov 16  }
  0x9e   : > { %v996_v21 = vld [vmem:[%s810_s0] sm:$0xff]  ;;  %s2134_s21 = sshll.u32 %s2765_s24, 7 }
  0xa0   : > { %1001 = vadd.xlane.f32.xlu0 %v1000_v3 }
  0xb6   : > { %985 = vperm.xlu0 %2423, %v821_v20  }
 0x125   : > { %v827_v4 = vpop.xlane.xlu0 %826 }
 0x126   : > { %v829_v5 = vmul.f32 0.03125, %v827_v4 }
 0x128   : > { %v830_v6 = vsub.f32 %v820_v0, %v829_v5 }
 0x129   : > { %v1002_v7 = vpop.xlane.xlu0 %1001 }
 0x12a   : > { %v1004_v8 = vmul.f32 0.03125, %v1002_v7  ;;  %v831_v9 = vmul.f32 %v830_v6, %v830_v6 }
 0x12c   : > { %v1005_v10 = vsub.f32 %v3067_v1, %v1004_v8  ;;  %v832_v11 = vsel %vm824_vm0, %v831_v9, 0.0 }
 0x12d   : > { %833 = vadd.xlane.f32.xlu1 %v832_v11 }
 0x12e   : > { %v1006_v12 = vmul.f32 %v1005_v10, %v1005_v10 }
 0x130   : > { %v1007_v13 = vsel %vm824_vm0, %v1006_v12, 0.0 }
 0x131   : > { %1008 = vadd.xlane.f32.xlu1 %v1007_v13  ;;  %v986_v44 = vpop.permute.xlu0 %985 }
 0x142   : > { %1097 = vperm.xlu1 %2424, %v996_v21  }
 0x1b6   : > { %v834_v22 = vpop.xlane.xlu1 %833 }
 0x1b7   : > { %v835_v23 = vmul.f32 0.03125, %v834_v22 }
 0x1b9   : > { %v836_v24 = vadd.f32 1e-06, %v835_v23 }
 0x1ba   : > { %v1009_v25 = vpop.xlane.xlu1 %1008 }
 0x1bb   : > { %2445 = vrsqrt.f32 %v836_v24  ;;  %v1010_v26 = vmul.f32 0.03125, %v1009_v25 }
 0x1bd   : > { %v1011_v27 = vadd.f32 1e-06, %v1010_v26 }
 0x1be   : > { %v1098_v63 = vpop.permute.xlu1 %1097 }
 0x1bf   : > { %2447 = vrsqrt.f32 %v1011_v27 }
 0x1c8   : > { %v2446_v28 = vpop.eup %2445 }
 0x1c9   : > { %v838_v30 = vmul.f32 %v2446_v28, %v830_v6 }
 0x1cb   : > { %v845_v32 = vmul.f32 %v2084_v29, %v838_v30 }
 0x1cc   : > { %v2448_v33 = vpop.eup %2447 }
 0x1cd   : > { %v1013_v34 = vmul.f32 %v2448_v33, %v1005_v10  ;;  %v852_v35 = vadd.f32 %v2085_v31, %v845_v32 }
 0x1cf   : > { %v853_v37 = vpack.c.bf16 %v852_v35, %v852_v35  ;;  %v1020_v38 = vmul.f32 %v2084_v29, %v1013_v34 }
 0x1d1   : > { %2181 = vmatmul.mubr.msk.bf16.vlgmr.msra.gmra.mxu0 %vm824_vm0, %v853_v37  ;;  %2189 = vmatmul.mubr.msk.bf16.vlgmr.msra.gmra.mxu1 %vm824_vm0, %v853_v37  ;;  %v1027_v40 = vadd.f32 %v2085_v31, %v1020_v38 }
 0x1d2   : > { %2193 = vmatpush3.bf16.msra.mxu0 %v2429_v36  ;;  %2196 = vmatprep.mubr.msk.bf16.mxu0 %vm2786_vm1, %v2785_v16 }
 0x1d3   : > { %2194 = vmatprep.subr.bf16.mxu0 %v2785_v16  ;;  %2202 = vmatprep.mubr.msk.bf16.mxu1 %vm2786_vm1, %v2785_v16  ;;  %v1028_v41 = vpack.c.bf16 %v1027_v40, %v1027_v40 }
 0x1d6   : > { %2195 = vmatpush3.bf16.msra.mxu0 %v2430_v39 }
 0x1d7   : > { %2206 = vmatprep.subr.bf16.mxu0 %v2785_v16 }
 0x1d9   : > { %2197 = vmatmul.mubr.msk.bf16.vlgmr.msra.gmra.mxu0 %vm824_vm0, %v1028_v41 }
 0x1da   : > { %2208 = vmatprep.mubr.msk.bf16.mxu0 %vm2786_vm1, %v2785_v16 }
 0x291   : > { %v914_v45 = vpop.f32.mrf.mxu0  ;;  %v977_v46 = vpop.f32.mrf.mxu1 }
 0x292   : > { %v915_v47 = vadd.f32 %v2086_v42, %v914_v45  ;;  %v978_v48 = vadd.f32 %v2090_v43, %v977_v46 }
 0x293   : > { %v2182_v49 = vpop.f32.mrf.mxu0  ;;  %v2190_v50 = vpop.f32.mrf.mxu1 }
 0x294   : > { %v988_v51 = vmul.f32 %v986_v44, %v915_v47  ;;  %v992_v52 = vmul.f32 %v986_v44, %v978_v48 }
 0x295   : > { %v917_v53 = vpop.f32.mrf.mxu0  ;;  %v980_v54 = vpop.f32.mrf.mxu1 }
 0x296   : > { %v989_v55 = vpack.c.bf16 %v988_v51, %v988_v51  ;;  %v993_v56 = vpack.c.bf16 %v992_v52, %v992_v52 }
 0x297   : > { %v2183_v57 = vpop.f32.mrf.mxu0  ;;  %v2191_v58 = vpop.f32.mrf.mxu1 }
 0x298   : > { %991 = vst.msk [vmem:[#allocation2] sm:$0xf] %vm990_vm2, %v989_v55  ;;  %994 = vst.msk [vmem:[#allocation3] sm:$0xf] %vm990_vm2, %v993_v56 }
 0x299   : > { %v1089_v60 = vpop.f32.mrf.mxu0 }
 0x29a   : > { %v1090_v62 = vadd.f32 %v2096_v59, %v1089_v60 }
 0x29b   : > { %v2198_v61 = vpop.f32.mrf.mxu0 }
 0x29c   : > { %v1100_v5 = vmul.f32 %v1098_v63, %v1090_v62 }
 0x29d   : > { %v1092_v0 = vpop.f32.mrf.mxu0 }
 0x29e   : > { %v1101_v9 = vpack.c.bf16 %v1100_v5, %v1100_v5 }
 0x29f   : > { %v2199_v2 = vpop.f32.mrf.mxu0  ;;  %v1102_v3 = vld [vmem:[#allocation2] sm:$0xf]  ;;  %v1103_v4 = vld [vmem:[#allocation3] sm:$0xf] }
 0x2a0   : > { %v1109_v6 = vsel %vm1104_vm3, %v1102_v3, 0  ;;  %v1169_v7 = vsel %vm1167_vm4, %v1103_v4, 0  ;;  %v2431_v8 = vld [vmem:[#allocation2] ss:$0 sps:$4 sm:$0xff]   ;;  %v2434_v61 = vld [vmem:[#allocation3] ss:$0 sps:$4 sm:$0xff]  }
 0x2a1   : > { %2201 = vmatpush3.bf16.xpose.msra.mxu1 %v1109_v6  ;;  %2207 = vmatpush3.bf16.msra.mxu0 %v1169_v7  ;;  %v2432_v10 = vld [vmem:[#allocation2] ss:$0 sps:$4 sm:$0xff]   ;;  %v2435_v2 = vld [vmem:[#allocation3] ss:$0 sps:$4 sm:$0xff]  }
 0x2a2   : > { %1222 = vrot.lane.b32.xlu1 %v2431_v8, %s2788_s2  ;;  %2212 = vmatprep.subr.bf16.mxu1 %v2785_v16  ;;  %v2433_v11 = vld [vmem:[#allocation2] ss:$0 sps:$4 sm:$0xff]  }
 0x2a3   : > { %2218 = vmatprep.subr.bf16.mxu0 %v2785_v16 }
 0x2a6   : > { %1217 = vrot.lane.b32.xlu1 %v1101_v9, %s2788_s2 }
 0x2a8   : > { %2203 = vmatmul.mubr.msk.bf16.vlgmr.msra.gmra.mxu1 %vm1104_vm3, %v1101_v9 }
 0x2a9   : > { %2214 = vmatprep.mubr.msk.bf16.mxu1 %vm2786_vm1, %v2785_v16 }
 0x2aa   : > { %1350 = vrot.lane.b32.xlu1 %v2432_v10, %s2789_s5 }
 0x2ae   : > { %1345 = vrot.lane.b32.xlu1 %v1101_v9, %s2789_s5 }
 0x2b2   : > { %1478 = vrot.lane.b32.xlu1 %v2433_v11, %s2790_s30 }
 0x2b6   : > { %1473 = vrot.lane.b32.xlu1 %v1101_v9, %s2790_s30  ;;  %v2436_v9 = vld [vmem:[#allocation3] ss:$0 sps:$4 sm:$0xff]  }
 0x314   : > { %v1223_v12 = vpop.permute.xlu1 %1222 }
 0x315   : > { %v1228_v13 = vsel %vm1104_vm3, %v1223_v12, 0 }
 0x316   : > { %2213 = vmatpush3.bf16.xpose.msra.mxu1 %v1228_v13 }
 0x317   : > { %2224 = vmatprep.subr.bf16.mxu1 %v2785_v16 }
 0x318   : > { %v1218_v14 = vpop.permute.xlu1 %1217 }
 0x31c   : > { %v1351_v15 = vpop.permute.xlu1 %1350 }
 0x31d   : > { %v1356_v17 = vsel %vm1104_vm3, %v1351_v15, 0  ;;  %2215 = vmatmul.mubr.msk.bf16.vlgmr.msra.gmra.mxu1 %vm1104_vm3, %v1218_v14 }
 0x31e   : > { %2225 = vmatpush3.bf16.xpose.msra.mxu1 %v1356_v17  ;;  %2226 = vmatprep.mubr.msk.bf16.mxu1 %vm2786_vm1, %v2785_v16 }
 0x31f   : > { %2236 = vmatprep.subr.bf16.mxu1 %v2785_v16 }
 0x320   : > { %v1346_v18 = vpop.permute.xlu1 %1345 }
 0x324   : > { %v1479_v19 = vpop.permute.xlu1 %1478 }
 0x325   : > { %v1484_v20 = vsel %vm1104_vm3, %v1479_v19, 0  ;;  %2227 = vmatmul.mubr.msk.bf16.vlgmr.msra.gmra.mxu1 %vm1104_vm3, %v1346_v18 }
 0x326   : > { %2237 = vmatpush3.bf16.xpose.msra.mxu1 %v1484_v20  ;;  %2238 = vmatprep.mubr.msk.bf16.mxu1 %vm2786_vm1, %v2785_v16 }
 0x327   : > { %2248 = vmatprep.subr.bf16.mxu1 %v2785_v16 }
 0x328   : > { %v1474_v21 = vpop.permute.xlu1 %1473 }
 0x32d   : > { %2239 = vmatmul.mubr.msk.bf16.vlgmr.msra.gmra.mxu1 %vm1104_vm3, %v1474_v21 }
 0x32e   : > { %2252 = vmatprep.mubr.msk.bf16.mxu1 %vm2786_vm1, %v2785_v16 }
 0x368   : > { %v1145_v22 = vpop.f32.mrf.mxu1 }
 0x369   : > { %v1151_v23 = vmul.f32 0.35355338, %v1145_v22 }
 0x36a   : > { %v2204_v24 = vpop.f32.mrf.mxu1 }
 0x36b   : > { %v1152_v25 = vsel %vm1104_vm3, %v1151_v23, -inf }
 0x36c   : > { %1153 = vmax.xlane.f32.xlu1 %v1152_v25  ;;  %v1148_v26 = vpop.f32.mrf.mxu1 }
 0x36e   : > { %v2205_v27 = vpop.f32.mrf.mxu1 }
 0x3dd   : > { %v1264_v28 = vpop.f32.mrf.mxu1 }
 0x3de   : > { %v1270_v29 = vmul.f32 0.35355338, %v1264_v28 }
 0x3df   : > { %v2216_v30 = vpop.f32.mrf.mxu1 }
 0x3e0   : > { %v1271_v31 = vsel %vm1104_vm3, %v1270_v29, -inf }
 0x3e1   : > { %1272 = vmax.xlane.f32.xlu0 %v1271_v31  ;;  %v1267_v32 = vpop.f32.mrf.mxu1 }
 0x3e3   : > { %v2217_v33 = vpop.f32.mrf.mxu1 }
 0x3e5   : > { %v1392_v34 = vpop.f32.mrf.mxu1 }
 0x3e6   : > { %v1398_v35 = vmul.f32 0.35355338, %v1392_v34 }
 0x3e7   : > { %v2228_v36 = vpop.f32.mrf.mxu1 }
 0x3e8   : > { %v1399_v37 = vsel %vm1104_vm3, %v1398_v35, -inf }
 0x3e9   : > { %1400 = vmax.xlane.f32.xlu0 %v1399_v37  ;;  %v1395_v38 = vpop.f32.mrf.mxu1 }
 0x3eb   : > { %v2229_v39 = vpop.f32.mrf.mxu1 }
 0x3ed   : > { %v1520_v40 = vpop.f32.mrf.mxu1 }
 0x3ee   : > { %v1526_v41 = vmul.f32 0.35355338, %v1520_v40 }
 0x3ef   : > { %v2240_v42 = vpop.f32.mrf.mxu1 }
 0x3f0   : > { %v1527_v43 = vsel %vm1104_vm3, %v1526_v41, -inf }
 0x3f1   : > { %1528 = vmax.xlane.f32.xlu1 %v1527_v43  ;;  %v1523_v44 = vpop.f32.mrf.mxu1 }
 0x3f2   : > { %v2437_v44 = vld [vmem:[#allocation13 + $0x8] sm:$0xff]  }
 0x3f3   : > { %v2241_v45 = vpop.f32.mrf.mxu1  ;;  %2249 = vmatpush3.bf16.msra.mxu1 %v2437_v44 }
 0x3f4   : > { %v2438_v45 = vld [vmem:[#allocation13] sm:$0xff]   ;;  %2250 = vmatprep.subr.bf16.mxu1 %v2785_v16 }
 0x3f5   : > { %v1154_v46 = vpop.xlane.xlu1 %1153 }
 0x3f6   : > { %v1155_v47 = vsub.f32 %v1151_v23, %v1154_v46 }
 0x3f7   : > { %2251 = vmatpush3.bf16.msra.mxu1 %v2438_v45 }
 0x3f8   : > { %v1156_v48 = vmul.f32 1.442695, %v1155_v47  ;;  %2264 = vmatprep.subr.bf16.mxu1 %v2785_v16 }
 0x3fa   : > { %2449 = vpow2.f32 %v1156_v48 }
 0x407   : > { %v2450_v49 = vpop.eup %2449 }
 0x408   : > { %v1158_v50 = vsel %vm1104_vm3, %v2450_v49, 0.0 }
 0x409   : > { %1159 = vadd.xlane.f32.xlu0 %v1158_v50 }
 0x46a   : > { %v1273_v51 = vpop.xlane.xlu0 %1272 }
 0x46b   : > { %v1274_v52 = vsub.f32 %v1270_v29, %v1273_v51 }
 0x46d   : > { %v1275_v53 = vmul.f32 1.442695, %v1274_v52 }
 0x46f   : > { %2451 = vpow2.f32 %v1275_v53 }
 0x472   : > { %v1401_v54 = vpop.xlane.xlu0 %1400 }
 0x473   : > { %v1402_v55 = vsub.f32 %v1398_v35, %v1401_v54 }
 0x475   : > { %v1403_v56 = vmul.f32 1.442695, %v1402_v55  ;;  %v2117_v55 = vld [vmem:[#allocation14] ss:$0 sm:$0xff] }
 0x477   : > { %2453 = vpow2.f32 %v1403_v56 }
 0x47a   : > { %v1529_v63 = vpop.xlane.xlu1 %1528 }
 0x47b   : > { %v1530_v0 = vsub.f32 %v1526_v41, %v1529_v63 }
 0x47c   : > { %v2452_v57 = vpop.eup %2451 }
 0x47d   : > { %v1277_v58 = vsel %vm1104_vm3, %v2452_v57, 0.0  ;;  %v1531_v3 = vmul.f32 1.442695, %v1530_v0 }
 0x47e   : > { %1278 = vadd.xlane.f32.xlu1 %v1277_v58 }
 0x484   : > { %v2454_v59 = vpop.eup %2453 }
 0x485   : > { %v1405_v60 = vsel %vm1104_vm3, %v2454_v59, 0.0 }
 0x486   : > { %1406 = vadd.xlane.f32.xlu0 %v1405_v60 }
 0x48f   : > { %1414 = vrot.lane.b32.xlu1 %v2434_v61, %s2789_s5 }
 0x492   : > { %v1160_v62 = vpop.xlane.xlu0 %1159 }
 0x493   : > { %2455 = vrcp.f32 %v1160_v62 }
 0x494   : > { %2457 = vpow2.f32 %v1531_v3 }
 0x49c   : > { %1286 = vrot.lane.b32.xlu0 %v2435_v2, %s2788_s2  ;;  %s3229_s2 = scalar_lea.hbm %s3339_s28, %s2134_s21 }
 0x4a0   : > { %v2456_v4 = vpop.eup %2455 }
 0x4a1   : > { %v1162_v5 = vmul.f32 %v2456_v4, %v2450_v49  ;;  %v2458_v7 = vpop.eup %2457 }
 0x4a2   : > { %v1533_v8 = vsel %vm1104_vm3, %v2458_v7, 0.0 }
 0x4a3   : > { %v1163_v6 = vpack.c.bf16 %v1162_v5, %v1162_v5  ;;  %v2439_v5 = vld [vmem:[%s3292_s16 + $0x8] sm:$0xff]  }
 0x4a5   : > { %2209 = vmatmul.mubr.msk.bf16.vlgmr.msra.gmra.mxu0 %vm1104_vm3, %v1163_v6 }
 0x4a6   : > { %2220 = vmatprep.mubr.msk.bf16.mxu0 %vm2786_vm1, %v2785_v16 }
 0x4b3   : > { %1534 = vadd.xlane.f32.xlu1 %v1533_v8 }
 0x4c4   : > { %1542 = vrot.lane.b32.xlu1 %v2436_v9, %s2790_s30  ;;  %s2794_s30 = smov [#allocation19]  }
 0x507   : > { %v1279_v10 = vpop.xlane.xlu1 %1278 }
 0x508   : > { %2459 = vrcp.f32 %v1279_v10  ;;  %v2121_v10 = vld [vmem:[#allocation16] ss:$0 sm:$0xff] }
 0x50b   : > { %v1415_v17 = vpop.permute.xlu1 %1414 }
 0x50c   : > { %v1420_v19 = vsel %vm1167_vm4, %v1415_v17, 0  ;;  %v2441_v17 = vld [vmem:[%s3294_s18 + $0x18] sm:$0xff]  }
 0x50f   : > { %v1407_v11 = vpop.xlane.xlu0 %1406 }
 0x510   : > { %2461 = vrcp.f32 %v1407_v11 }
 0x513   : > { %v1287_v12 = vpop.permute.xlu0 %1286 }
 0x514   : > { %v1292_v13 = vsel %vm1167_vm4, %v1287_v12, 0  ;;  %v2122_v12 = vld [vmem:[#allocation17] ss:$0 sm:$0xff] }
 0x515   : > { %v2460_v14 = vpop.eup %2459  ;;  %2219 = vmatpush3.bf16.msra.mxu0 %v1292_v13 }
 0x516   : > { %2230 = vmatprep.subr.bf16.mxu0 %v2785_v16  ;;  %v1281_v15 = vmul.f32 %v2460_v14, %v2452_v57 }
 0x518   : > { %v1282_v18 = vpack.c.bf16 %v1281_v15, %v1281_v15 }
 0x51a   : > { %2221 = vmatmul.mubr.msk.bf16.vlgmr.msra.gmra.mxu0 %vm1104_vm3, %v1282_v18  ;;  %v2442_v18 = vld [vmem:[%s3294_s18 + $0x10] sm:$0xff]  }
 0x51b   : > { %2231 = vmatpush3.bf16.msra.mxu0 %v1420_v19  ;;  %2232 = vmatprep.mubr.msk.bf16.mxu0 %vm2786_vm1, %v2785_v16  ;;  %v2443_v19 = vld [vmem:[%s3294_s18 + $0x8] sm:$0xff]  }
 0x51c   : > { %2242 = vmatprep.subr.bf16.mxu0 %v2785_v16 }
 0x51d   : > { %v2462_v20 = vpop.eup %2461 }
 0x51e   : > { %v1409_v21 = vmul.f32 %v2462_v20, %v2454_v59  ;;  %v2444_v20 = vld [vmem:[%s3294_s18] sm:$0xff]  }
 0x520   : > { %v1410_v22 = vpack.c.bf16 %v1409_v21, %v1409_v21  ;;  %v2123_v21 = vld [vmem:[%s3293_s17] ss:$0 sm:$0xff] }
 0x522   : > { %2233 = vmatmul.mubr.msk.bf16.vlgmr.msra.gmra.mxu0 %vm1104_vm3, %v1410_v22 }
 0x523   : > { %2244 = vmatprep.mubr.msk.bf16.mxu0 %vm2786_vm1, %v2785_v16 }
 0x53c   : > { %v1535_v23 = vpop.xlane.xlu1 %1534 }
 0x53d   : > { %2463 = vrcp.f32 %v1535_v23 }
 0x540   : > { %v1543_v24 = vpop.permute.xlu1 %1542 }
 0x541   : > { %v1548_v25 = vsel %vm1167_vm4, %v1543_v24, 0 }
 0x542   : > { %2243 = vmatpush3.bf16.msra.mxu0 %v1548_v25 }
 0x543   : > { %2256 = vmatprep.subr.bf16.mxu0 %v2785_v16 }
 0x54a   : > { %v2464_v26 = vpop.eup %2463 }
 0x54b   : > { %v1537_v27 = vmul.f32 %v2464_v26, %v2458_v7 }
 0x54d   : > { %v1538_v28 = vpack.c.bf16 %v1537_v27, %v1537_v27 }
 0x54f   : > { %2245 = vmatmul.mubr.msk.bf16.vlgmr.msra.gmra.mxu0 %vm1104_vm3, %v1538_v28 }
 0x550   : > { %2260 = vmatprep.mubr.msk.bf16.mxu0 %vm2786_vm1, %v2785_v16  ;;  %2257 = vmatpush3.bf16.msra.mxu0 %v2439_v5 }
 0x551   : > { %2258 = vmatprep.subr.bf16.mxu0 %v2785_v16 }
 0x565   : > { %v1205_v29 = vpop.f32.mrf.mxu0 }
 0x566   : > { %v1211_v30 = vpack.c.bf16 %v1205_v29, %v1205_v29 }
 0x567   : > { %v2210_v31 = vpop.f32.mrf.mxu0 }
 0x568   : > { %1213 = vst.msk [vmem:[#allocation4] sm:$0xf] %vm1212_vm5, %v1211_v30 }
 0x569   : > { %v1208_v32 = vpop.f32.mrf.mxu0 }
 0x56a   : > { %v2127_v32 = vld [vmem:[%s3295_s19] ss:$0 sm:$0xff] }
 0x56b   : > { %v2211_v33 = vpop.f32.mrf.mxu0 }
 0x5da   : > { %v1328_v34 = vpop.f32.mrf.mxu0 }
 0x5db   : > { %v2137_v35 = vpack.c.bf16 %v1328_v34, %v1328_v34 }
 0x5dc   : > { %v2222_v36 = vpop.f32.mrf.mxu0 }
 0x5dd   : > { %1338 = vrot.lane.b32.xlu0 %v2137_v35, %s2791_s29  ;;  %s2681_s29 = sshll.u32 %s2794_s30, 4  ;;  %s2682_s29 = int_to_ptr.vmem [resolvable:$false] %s2681_s29 }
 0x5de   : > { %v1331_v37 = vpop.f32.mrf.mxu0 }
 0x5e0   : > { %v2223_v38 = vpop.f32.mrf.mxu0 }
 0x5e2   : > { %v1456_v39 = vpop.f32.mrf.mxu0 }
 0x5e3   : > { %v2138_v40 = vpack.c.bf16 %v1456_v39, %v1456_v39 }
 0x5e4   : > { %v2234_v41 = vpop.f32.mrf.mxu0 }
 0x5e5   : > { %1466 = vrot.lane.b32.xlu1 %v2138_v40, %s2792_s3  ;;  %s2683_s3 = scalar_lea.vmem %s2682_s29, 256 }
 0x5e6   : > { %v1459_v42 = vpop.f32.mrf.mxu0 }
 0x5e8   : > { %v2235_v43 = vpop.f32.mrf.mxu0 }
 0x60f   : > { %v1584_v46 = vpop.f32.mrf.mxu0 }
 0x610   : > { %v2139_v47 = vpack.c.bf16 %v1584_v46, %v1584_v46 }
 0x611   : > { %v2246_v48 = vpop.f32.mrf.mxu0 }
 0x612   : > { %1594 = vrot.lane.b32.xlu0 %v2139_v47, %s2793_s25  ;;  %s790_s25 = sand.u32 1, %s2757_s22  }
 0x613   : > { %v1587_v49 = vpop.f32.mrf.mxu0  ;;  %s2079_s26 = sshll.u32 %s790_s25, 3  ;;  %s1855_s24 = scalar_lea.sflag [#allocation7], %s790_s25 }
 0x614   : > { %s792_s20 = scalar_lea.vmem [#allocation19], %s2079_s26 }
 0x615   : > { %v2247_v50 = vpop.f32.mrf.mxu0  ;;  %s1869_s7 = sshll.u32 %s792_s20, 4  ;;  %s3231_s7 = int_to_ptr.vmem [resolvable:$true] %s1869_s7 }
 0x616   : > { %s2677_s5 = scalar_lea.vmem %s3231_s7, 128  ;;  %p2684_p2 = scmp.lt.s32.totalorder %s3231_s7, %s2682_s29 }
 0x617   : > { %p2678_p0 = scmp.ne.s32.totalorder %s3231_s7, %s2677_s5  ;;  %p2685_p3 = scmp.lt.s32.totalorder %s2683_s3, %s2677_s5 }
 0x619   : > { %p2679_p11 = pnand %p2678_p0, %p3340_p10  ;;  %p2686_p5 = por %p2685_p3, %p2684_p2 }
 0x61b   : > { %p2680_p1 = pneg %p2679_p11 }
 0x61d   : > { %p2687_p6 = pnand %p2686_p5, %p2680_p1 }
 0x64f   : > { %v1339_v51 = vpop.permute.xlu0 %1338 }
 0x650   : > { %1342 = vst.msk [vmem:[#allocation4] sm:$0xf] %vm1341_vm6, %v1339_v51 }
 0x657   : > { %v1467_v52 = vpop.permute.xlu1 %1466 }
 0x658   : > { %1470 = vst.msk [vmem:[#allocation4] sm:$0xf] %vm1469_vm7, %v1467_v52 }
 0x684   : > { %v1595_v53 = vpop.permute.xlu0 %1594 }
 0x685   : > { %1598 = vst.msk [vmem:[#allocation4] sm:$0xf] %vm1597_vm8, %v1595_v53 }
 0x68c   : > { %v1599_v54 = vld [vmem:[#allocation4] sm:$0xf] }
 0x68d   : > { %2253 = vmatmul.mubr.msk.bf16.vlgmr.msra.gmra.mxu1 %vm824_vm0, %v1599_v54 }
 0x68e   : > { %2272 = vmatprep.mubr.msk.bf16.mxu1 %vm2786_vm1, %v2785_v16  ;;  %2265 = vmatpush3.bf16.msra.mxu1 %v2441_v17 }
 0x68f   : > { %2266 = vmatprep.subr.bf16.mxu1 %v2785_v16 }
 0x692   : > { %2267 = vmatpush3.bf16.msra.mxu1 %v2442_v18 }
 0x693   : > { %2268 = vmatprep.subr.bf16.mxu1 %v2785_v16 }
 0x696   : > { %2269 = vmatpush3.bf16.msra.mxu1 %v2443_v19 }
 0x697   : > { %2270 = vmatprep.subr.bf16.mxu1 %v2785_v16 }
 0x69a   : > { %2271 = vmatpush3.bf16.msra.mxu1 %v2444_v20 }
 0x74d   : > { %v1660_v56 = vpop.f32.mrf.mxu1 }
 0x74e   : > { %v1661_v57 = vadd.f32 %v2117_v55, %v1660_v56 }
 0x74f   : > { %v2254_v58 = vpop.f32.mrf.mxu1 }
 0x750   : > { %v3188_v59 = vadd.f32 %v1661_v57, %v3067_v1  ;;  %v2440_v1 = vld [vmem:[%s3292_s16] sm:$0xff]  }
 0x751   : > { %v1663_v60 = vpop.f32.mrf.mxu1  ;;  %2259 = vmatpush3.bf16.msra.mxu0 %v2440_v1 }
 0x752   : > { %v1669_v61 = vsel %vm824_vm0, %v3188_v59, 0.0 }
 0x753   : > { %1670 = vadd.xlane.f32.xlu1 %v1669_v61  ;;  %v2255_v62 = vpop.f32.mrf.mxu1 }
 0x7dc   : > { %v1671_v63 = vpop.xlane.xlu1 %1670 }
 0x7dd   : > { %v1672_v0 = vmul.f32 0.03125, %v1671_v63 }
 0x7df   : > { %v1673_v2 = vsub.f32 %v3188_v59, %v1672_v0 }
 0x7e1   : > { %v1674_v3 = vmul.f32 %v1673_v2, %v1673_v2 }
 0x7e3   : > { %v1675_v4 = vsel %vm824_vm0, %v1674_v3, 0.0 }
 0x7e4   : > { %1676 = vadd.xlane.f32.xlu0 %v1675_v4 }
 0x86d   : > { %v1677_v6 = vpop.xlane.xlu0 %1676 }
 0x86e   : > { %v1678_v7 = vmul.f32 0.03125, %v1677_v6 }
 0x870   : > { %v1679_v8 = vadd.f32 1e-06, %v1678_v7 }
 0x872   : > { %2465 = vrsqrt.f32 %v1679_v8 }
 0x87f   : > { %v2466_v9 = vpop.eup %2465 }
 0x880   : > { %v1681_v11 = vmul.f32 %v2466_v9, %v1673_v2 }
 0x882   : > { %v1688_v13 = vmul.f32 %v2121_v10, %v1681_v11 }
 0x884   : > { %v1695_v14 = vadd.f32 %v2122_v12, %v1688_v13 }
 0x886   : > { %v1696_v15 = vpack.c.bf16 %v1695_v14, %v1695_v14 }
 0x888   : > { %2261 = vmatmul.mubr.msk.bf16.vlgmr.msra.gmra.mxu0 %vm824_vm0, %v1696_v15 }
 0x948   : > { %v1757_v22 = vpop.f32.mrf.mxu0 }
 0x949   : > { %v1758_v23 = vadd.f32 %v2123_v21, %v1757_v22 }
 0x94a   : > { %v2262_v24 = vpop.f32.mrf.mxu0 }
 0x94b   : > { %v1764_v25 = vmul.f32 0.70710677, %v1758_v23  ;;  %v1763_v16 = vmul.f32 0.5, %v1758_v23 }
 0x94c   : > { %v1760_v26 = vpop.f32.mrf.mxu0 }
 0x94d   : > { %2467 = verf.f32 %v1764_v25 }
 0x94e   : > { %v2263_v27 = vpop.f32.mrf.mxu0 }
 0x95a   : > { %v2468_v28 = vpop.eup %2467 }
 0x95b   : > { %v1766_v29 = vadd.f32 1.0, %v2468_v28 }
 0x95d   : > { %v1767_v30 = vmul.f32 %v1766_v29, %v1763_v16 }
 0x95f   : > { %v1768_v31 = vpack.c.bf16 %v1767_v30, %v1767_v30 }
 0x961   : > { %2273 = vmatmul.mubr.msk.bf16.vlgmr.msra.gmra.mxu1 %vm1808_vm9, %v1768_v31 }
 0xa21   : > { %v1846_v33 = vpop.f32.mrf.mxu1 }
 0xa22   : > { %v1847_v34 = vadd.f32 %v2127_v32, %v1846_v33 }
 0xa23   : > { %v2274_v35 = vpop.f32.mrf.mxu1 }
 0xa24   : > { %v1852_v36 = vadd.f32 %v1847_v34, %v3188_v59 }
 0xa25   : > { %v1849_v37 = vpop.f32.mrf.mxu1 }
 0xa26   : > { %1853 = vst.msk [vmem:[%s792_s20] sm:$0xff] %vm824_vm0, %v1852_v36 }
 0xa27   : > { %v2275_v38 = vpop.f32.mrf.mxu1 }
 0xa28   : > { %2690 = shalt.err (!%p2687_p6)
}
 0xa29   : > { %s2691_s26 = scalar_lea.hbm %s3229_s2, 128  ;;  %s2695_s0 = scalar_lea.hbm %s3339_s28, 256 }
 0xa2a   : > { %p2692_p8 = scmp.ne.s32.totalorder %s3229_s2, %s2691_s26  ;;  %p2696_p12 = scmp.lt.s32.totalorder %s3229_s2, %s3339_s28 }
 0xa2b   : > { %p2697_p4 = scmp.lt.s32.totalorder %s2695_s0, %s2691_s26 }
 0xa2c   : > { %p2693_p7 = pnand %p2692_p8, %p3340_p10 }
 0xa2d   : > { %p2698_p13 = por %p2697_p4, %p2696_p12 }
 0xa2e   : > { %p2694_p9 = pneg %p2693_p7 }
 0xa30   : > { %p2699_p0 = pnand %p2698_p13, %p2694_p9 }
 0xa32   : > { %2702 = shalt.err (!%p2699_p0)
}
 0xa33   : > { %2308 = dma.vmem_to_hbm [thread:$0]  (%p3340_p10), %s3231_s7, 128, %s3229_s2, %s1855_s24  }
 0xa34 PF: > { %s3341_s27 = sld [smem:[#allocation29_spill]] }
 0xa35   : > { %s3342_s23 = sld [smem:[#allocation26_spill]] }
 0xa36   : > { %s3343_s5 = sld [smem:[#allocation31_spill]] }
 0xa3a   : > { %p2355_p11 = scmp.ge.s32.totalorder %s3341_s27, 2 }
 0xa3b   : > { %s1881_s30 = sand.u32 1, %s3342_s23  }
 0xa3c   : > { %p3344_p1 = scmp.ne.s32.totalorder %s3343_s5, 0  ;;  %s1882_s29 = scalar_lea.sflag [#allocation7], %s1881_s30 }
 0xa3e   : > { %p2336_p2 = pnand %p2355_p11, %p3344_p1 }
 0xa40   : > { %p2337_p3 = pneg %p2336_p2 }
 0xa42   : > { %2748 = dma.done.wait (%p2337_p3), %s1882_s29, 128  }
 0xa43   : > { %2750 = vsyncadd (%p2337_p3), %s1882_s29, 4294967168  ;;  %s38_s25 = sadd.s32 1, %s3341_s27   ;;  %s3345_s4 = sld [smem:[#allocation27_spill]] }
 0xa44   : > { %p35_p5 = scmp.ge.s32.totalorder %s38_s25, 4   ;;  %s3346_s23 = sld [smem:[#allocation32_spill]] }
 0xa45   : > { %s3347_s24 = sld [smem:[#allocation28_spill]]  ;;  %s3349_s1 = smov %s2757_s22 }
 0xa46   : > { %s3348_s2 = sld [smem:[#allocation30_spill]]  ;;  %37 = sbr.rel (!%p35_p5) target bundleno = 18 (0x12), region = 181 }
 0xa49   : > { %s3350_s22 = smov %s3345_s4 }
 0xa4b   :  { %1887 = vsyncpa [#allocation6], 1 }
 0xa4c   :  { %1889 = vsyncpa [#allocation6 + $0x1], 1 }
 0xa4d   :  { %1890 = vsyncpa [#allocation9], 1 }
 0xa4e   :  { %1891 = vsyncpa [#allocation12], 1 }
 0xa4f   :  { %1892 = vsyncpa [#allocation15], 1 }
 0xa50   :  { %1893 = vsyncpa [#allocation18], 1 }
 0xa51   :  { %1894 = vsyncpa [#allocation7], 1 }
 0xa52   :  { %1896 = vsyncpa [#allocation7 + $0x1], 1 }

</bundles_post_ra>
